<compile_context>
chip_gen: v6e
topology: v6e:2x2x1
jax: 0.10.0
libtpu: 0.0.40
codegen_flags: <defaults>
</compile_context>

<pallas_src>
import jax
import jax.numpy as jnp
from jax.experimental import pallas as pl
from jax.experimental.pallas import tpu as pltpu


def _rope_kernel(cos_ref, sin_ref, q_ref, k_ref, qo_ref, ko_ref):
    # cos/sin blocks: (TS, D) float32, sin already carries the rotate_half sign.
    # q/k blocks:     (TS, D) in the input dtype.
    cos = cos_ref[...]
    sin_signed = sin_ref[...]

    def apply(x_ref, o_ref):
        x = x_ref[...].astype(jnp.float32)
        d = x.shape[-1]
        half = d // 2
        # Sign lives in sin_signed, so rotate_half(x)*sin == concat([x2, x1])*sin_signed.
        rot = jnp.concatenate([x[..., half:], x[..., :half]], axis=-1)
        o_ref[...] = (x * cos + rot * sin_signed).astype(o_ref.dtype)

    apply(q_ref, qo_ref)
    apply(k_ref, ko_ref)


def _cos_sin_tables(seq_len: int, dim: int):
    """Mirrors RotaryEmbedding._update_cos_sin_tables (fp32), with the
    rotate_half sign ([-1]*D/2 + [+1]*D/2) folded into the sin table."""
    inv_freq = 1.0 / (10000.0 ** (jnp.arange(0, dim, 2, dtype=jnp.float32) / dim))
    t = jnp.arange(seq_len, dtype=jnp.float32)
    freqs = jnp.einsum("i,j->ij", t, inv_freq)           # (S, D/2)
    emb = jnp.concatenate([freqs, freqs], axis=-1)       # (S, D)
    cos = jnp.cos(emb)
    sin = jnp.sin(emb)
    sign = jnp.concatenate(
        [-jnp.ones((dim // 2,), jnp.float32), jnp.ones((dim // 2,), jnp.float32)]
    )
    return cos, sin * sign                                # both (S, D) float32


def rotary_embedding(q: jax.Array, k: jax.Array, *, seq_tile_target: int = 2048):
    """q, k: (B, S, D). Returns (q_rot, k_rot) with identical shapes/dtypes."""
    assert q.shape == k.shape, "wrapper assumes matching q/k shapes"
    assert q.dtype == k.dtype
    B, S, D = q.shape
    assert D % 2 == 0

    # Tables built from k's seq length (seq_dimension=-2), as in the PyTorch module.
    cos, sin_signed = _cos_sin_tables(S, D)               # (S, D) f32

    itemsize = jnp.dtype(q.dtype).itemsize
    # Sublane packing requirement for the q/k dtype: 8 (f32), 16 (bf16), 32 (int8/fp8).
    sublane = max(8, 32 // max(itemsize, 1))

    # Fixed, well-shaped sequence tile + cdiv grid (handles any S robustly).
    if S <= seq_tile_target:
        ts = S                                            # full-extent block: always legal
    else:
        ts = max(sublane, (seq_tile_target // sublane) * sublane)

    def step_bytes(t):
        # Double-buffered per-step VMEM: 2 f32 tables + q/k in + q/k out.
        return 2 * (2 * t * D * 4 + 4 * t * D * itemsize)

    VMEM_BUDGET = 24 << 20   # fits v7x (64 MiB physical / 32 MiB scoped) with headroom
    while step_bytes(ts) > VMEM_BUDGET and ts > sublane:
        ts = max(sublane, ((ts // 2) // sublane) * sublane)

    s_tiles = pl.cdiv(S, ts)

    if s_tiles >= 2 or B == 1:
        # S outer (slow), B inner (fast): cos/sin block index only changes with the
        # S tile -> tables are DMA'd once per S tile, not once per batch.
        grid = (s_tiles, B)
        table_spec = pl.BlockSpec((ts, D), lambda s, b: (s, 0))
        qk_spec = pl.BlockSpec((None, ts, D), lambda s, b: (b, s, 0))
    else:
        # Single S tile: put B outer so the shardable leading axis has >=2 steps
        # on v7x megacore. Table re-DMA costs only 2*S*D, negligible vs 4*B*S*D.
        grid = (B, s_tiles)
        table_spec = pl.BlockSpec((ts, D), lambda b, s: (s, 0))
        qk_spec = pl.BlockSpec((None, ts, D), lambda b, s: (b, s, 0))

    vmem_limit = int(min(56 << 20, max(32 << 20, step_bytes(ts) + (8 << 20))))

    cost = pl.CostEstimate(
        flops=6 * B * S * D,
        transcendentals=0,
        bytes_accessed=4 * B * S * D * itemsize + 2 * S * D * 4,
    )

    q_out, k_out = pl.pallas_call(
        _rope_kernel,
        out_shape=(
            jax.ShapeDtypeStruct((B, S, D), q.dtype),
            jax.ShapeDtypeStruct((B, S, D), k.dtype),
        ),
        grid_spec=pltpu.PrefetchScalarGridSpec(
            num_scalar_prefetch=0,
            grid=grid,
            in_specs=[table_spec, table_spec, qk_spec, qk_spec],
            out_specs=[qk_spec, qk_spec],
        ),
        compiler_params=pltpu.CompilerParams(
            dimension_semantics=("parallel", "parallel"),
            vmem_limit_bytes=vmem_limit,
        ),
        input_output_aliases={2: 0, 3: 1},   # q -> q_out, k -> k_out (donatable)
        cost_estimate=cost,
    )(cos, sin_signed, q, k)
    return q_out, k_out


# ---- pure-JAX reference (mirrors the PyTorch code exactly, no sign folding) ----
def _rotate_half_ref(x):
    d = x.shape[-1]
    x1, x2 = x[..., : d // 2], x[..., d // 2:]
    return jnp.concatenate([-x2, x1], axis=-1)


def _apply_rope_ref(x, cos, sin):
    cos = cos[:, : x.shape[-2], :]
    sin = sin[:, : x.shape[-2], :]
    return x * cos + _rotate_half_ref(x) * sin


def rotary_embedding_ref(q, k):
    dim = k.shape[-1]
    inv_freq = 1.0 / (10000.0 ** (jnp.arange(0, dim, 2, dtype=jnp.float32) / dim))
    t = jnp.arange(k.shape[-2], dtype=jnp.float32)
    freqs = jnp.einsum("i,j->ij", t, inv_freq)
    emb = jnp.concatenate([freqs, freqs], axis=-1)
    cos = jnp.cos(emb)[None, :, :]
    sin = jnp.sin(emb)[None, :, :]
    return _apply_rope_ref(q, cos, sin), _apply_rope_ref(k, cos, sin)


def _check(q, k, atol, rtol, **kw):
    # Reference first (inputs are never mutated, but keep ordering explicit).
    q_ref, k_ref = rotary_embedding_ref(q, k)
    q_out, k_out = rotary_embedding(q, k, **kw)
    jax.block_until_ready((q_out, k_out))
    assert q_out.dtype == q.dtype and k_out.dtype == k.dtype
    assert jnp.allclose(q_out.astype(jnp.float32), q_ref, atol=atol, rtol=rtol)
    assert jnp.allclose(k_out.astype(jnp.float32), k_ref, atol=atol, rtol=rtol)


if __name__ == "__main__":
    key = jax.random.PRNGKey(0)

    # Case 1: lane-dense head dim, single S tile -> B-outer megacore grid (2, 1).
    kq, kk = jax.random.split(key)
    q = jax.random.normal(kq, (2, 1024, 128), dtype=jnp.float32)
    k = jax.random.normal(kk, (2, 1024, 128), dtype=jnp.float32)
    _check(q, k, atol=1e-5, rtol=1e-5)

    # Case 2: non-divisible S exercises the fixed-tile + cdiv grid (partial last block).
    kq2, kk2 = jax.random.split(jax.random.PRNGKey(1))
    q2 = jax.random.normal(kq2, (2, 160, 128), dtype=jnp.float32)
    k2 = jax.random.normal(kk2, (2, 160, 128), dtype=jnp.float32)
    _check(q2, k2, atol=1e-5, rtol=1e-5, seq_tile_target=64)

    # Case 3: small sub-128 head dim (masked-lane path).
    kq3, kk3 = jax.random.split(jax.random.PRNGKey(2))
    q3 = jax.random.normal(kq3, (2, 8, 32), dtype=jnp.float32)
    k3 = jax.random.normal(kk3, (2, 8, 32), dtype=jnp.float32)
    _check(q3, k3, atol=1e-5, rtol=1e-5)

    # Case 4: bf16 inputs with fp32 tables / fp32 in-kernel compute.
    kq4, kk4 = jax.random.split(jax.random.PRNGKey(3))
    q4 = jax.random.normal(kq4, (2, 64, 64), dtype=jnp.bfloat16)
    k4 = jax.random.normal(kk4, (2, 64, 64), dtype=jnp.bfloat16)
    _check(q4, k4, atol=2e-2, rtol=2e-2)

    print("KERNEL_OK")
</pallas_src>

<mosaic_0001>
module attributes {stable_mosaic.version = 11 : i64} {
  func.func @_rope_kernel(%arg0: i32, %arg1: i32, %arg2: memref<1024x128xf32, #tpu.memory_space<vmem>>, %arg3: memref<1024x128xf32, #tpu.memory_space<vmem>>, %arg4: memref<1x1024x128xf32, #tpu.memory_space<vmem>>, %arg5: memref<1x1024x128xf32, #tpu.memory_space<vmem>>, %arg6: memref<1x1024x128xf32, #tpu.memory_space<vmem>>, %arg7: memref<1x1024x128xf32, #tpu.memory_space<vmem>>) attributes {dimension_semantics = [#tpu.dimension_semantics<parallel>, #tpu.dimension_semantics<parallel>], iteration_bounds = array<i64: 2, 1>, scalar_prefetch = 0 : i64, scratch_operands = 0 : i64, tpu.core_type = #tpu.core_type<tc>, window_params = [{transform_indices = @transform_0, window_bounds = array<i64: 1024, 128>}, {transform_indices = @transform_1, window_bounds = array<i64: 1024, 128>}, {transform_indices = @transform_2, window_bounds = array<i64: 1, 1024, 128>}, {transform_indices = @transform_3, window_bounds = array<i64: 1, 1024, 128>}, {transform_indices = @transform_4, window_bounds = array<i64: 1, 1024, 128>}, {transform_indices = @transform_5, window_bounds = array<i64: 1, 1024, 128>}]} {
    %c0 = arith.constant 0 : index
    %c0_0 = arith.constant 0 : index
    %0 = vector.load %arg2[%c0, %c0_0] : memref<1024x128xf32, #tpu.memory_space<vmem>>, vector<1024x128xf32>
    %c0_1 = arith.constant 0 : index
    %c0_2 = arith.constant 0 : index
    %1 = vector.load %arg3[%c0_1, %c0_2] : memref<1024x128xf32, #tpu.memory_space<vmem>>, vector<1024x128xf32>
    %c0_3 = arith.constant 0 : index
    %c0_4 = arith.constant 0 : index
    %c0_5 = arith.constant 0 : index
    %2 = vector.load %arg4[%c0_3, %c0_4, %c0_5] : memref<1x1024x128xf32, #tpu.memory_space<vmem>>, vector<1x1024x128xf32>
    %3 = vector.shape_cast %2 : vector<1x1024x128xf32> to vector<1024x128xf32>
    %4 = vector.extract_strided_slice %3 {offsets = [0, 64], sizes = [1024, 64], strides = [1, 1]} : vector<1024x128xf32> to vector<1024x64xf32>
    %5 = vector.extract_strided_slice %3 {offsets = [0, 0], sizes = [1024, 64], strides = [1, 1]} : vector<1024x128xf32> to vector<1024x64xf32>
    %6 = tpu.concatenate %4, %5 in 1 : vector<1024x64xf32>, vector<1024x64xf32> -> vector<1024x128xf32>
    %7 = arith.mulf %3, %0 : vector<1024x128xf32>
    %8 = arith.mulf %6, %1 : vector<1024x128xf32>
    %9 = arith.addf %7, %8 : vector<1024x128xf32>
    %c0_6 = arith.constant 0 : index
    %c0_7 = arith.constant 0 : index
    %c0_8 = arith.constant 0 : index
    %10 = vector.load %arg6[%c0_6, %c0_7, %c0_8] : memref<1x1024x128xf32, #tpu.memory_space<vmem>>, vector<1x1024x128xf32>
    %11 = vector.shape_cast %10 : vector<1x1024x128xf32> to vector<1024x128xf32>
    %12 = vector.shape_cast %9 : vector<1024x128xf32> to vector<1x1024x128xf32>
    tpu.vector_store %arg6[%c0_6, %c0_7, %c0_8], %12 {strides = array<i32>} : memref<1x1024x128xf32, #tpu.memory_space<vmem>>, vector<1x1024x128xf32>,
    %c0_9 = arith.constant 0 : index
    %c0_10 = arith.constant 0 : index
    %c0_11 = arith.constant 0 : index
    %13 = vector.load %arg5[%c0_9, %c0_10, %c0_11] : memref<1x1024x128xf32, #tpu.memory_space<vmem>>, vector<1x1024x128xf32>
    %14 = vector.shape_cast %13 : vector<1x1024x128xf32> to vector<1024x128xf32>
    %15 = vector.extract_strided_slice %14 {offsets = [0, 64], sizes = [1024, 64], strides = [1, 1]} : vector<1024x128xf32> to vector<1024x64xf32>
    %16 = vector.extract_strided_slice %14 {offsets = [0, 0], sizes = [1024, 64], strides = [1, 1]} : vector<1024x128xf32> to vector<1024x64xf32>
    %17 = tpu.concatenate %15, %16 in 1 : vector<1024x64xf32>, vector<1024x64xf32> -> vector<1024x128xf32>
    %18 = arith.mulf %14, %0 : vector<1024x128xf32>
    %19 = arith.mulf %17, %1 : vector<1024x128xf32>
    %20 = arith.addf %18, %19 : vector<1024x128xf32>
    %c0_12 = arith.constant 0 : index
    %c0_13 = arith.constant 0 : index
    %c0_14 = arith.constant 0 : index
    %21 = vector.load %arg7[%c0_12, %c0_13, %c0_14] : memref<1x1024x128xf32, #tpu.memory_space<vmem>>, vector<1x1024x128xf32>
    %22 = vector.shape_cast %21 : vector<1x1024x128xf32> to vector<1024x128xf32>
    %23 = vector.shape_cast %20 : vector<1024x128xf32> to vector<1x1024x128xf32>
    tpu.vector_store %arg7[%c0_12, %c0_13, %c0_14], %23 {strides = array<i32>} : memref<1x1024x128xf32, #tpu.memory_space<vmem>>, vector<1x1024x128xf32>,
    return
  }
  func.func @transform_0(%arg0: i32, %arg1: i32) -> (i32, i32) {
    %c0_i32 = arith.constant 0 : i32
    %c0_i32_0 = arith.constant 0 : i32
    return %arg1, %c0_i32 : i32, i32
  }
  func.func @transform_1(%arg0: i32, %arg1: i32) -> (i32, i32) {
    %c0_i32 = arith.constant 0 : i32
    %c0_i32_0 = arith.constant 0 : i32
    return %arg1, %c0_i32 : i32, i32
  }
  func.func @transform_2(%arg0: i32, %arg1: i32) -> (i32, i32, i32) {
    %c0_i32 = arith.constant 0 : i32
    %c0_i32_0 = arith.constant 0 : i32
    return %arg0, %arg1, %c0_i32 : i32, i32, i32
  }
  func.func @transform_3(%arg0: i32, %arg1: i32) -> (i32, i32, i32) {
    %c0_i32 = arith.constant 0 : i32
    %c0_i32_0 = arith.constant 0 : i32
    return %arg0, %arg1, %c0_i32 : i32, i32, i32
  }
  func.func @transform_4(%arg0: i32, %arg1: i32) -> (i32, i32, i32) {
    %c0_i32 = arith.constant 0 : i32
    %c0_i32_0 = arith.constant 0 : i32
    return %arg0, %arg1, %c0_i32 : i32, i32, i32
  }
  func.func @transform_5(%arg0: i32, %arg1: i32) -> (i32, i32, i32) {
    %c0_i32 = arith.constant 0 : i32
    %c0_i32_0 = arith.constant 0 : i32
    return %arg0, %arg1, %c0_i32 : i32, i32, i32
  }
}

</mosaic_0001>

<bundles_post_ra>
// kernel: tpu_custom_call.1
= control target key start
LH: loop header
LB: loop body
LE: loop exit
PB: predicated region body
PF: predicated region fallthrough
CT: control target
= control target key end

     0   :  { %s7131_s0 = inlined_call_operand.vmem [shape: f32[1024,128], index: 0, kind: input, shape index: {}]   ;;  %s7132_s1 = inlined_call_operand.vmem [shape: f32[1024,128], index: 1, kind: input, shape index: {}]   ;;  %s7133_s2 = inlined_call_operand.hbm [shape: f32[2,1024,128], index: 2, kind: input, shape index: {}, may-alias: {2,4}]   ;;  %s7134_s3 = inlined_call_operand.hbm [shape: f32[2,1024,128], index: 3, kind: input, shape index: {}, may-alias: {3,5}]   ;;  %s7135_s4 = inlined_call_operand.hbm [shape: f32[2,1024,128], index: 4, kind: output, shape index: {0}, may-alias: {2,4}]   ;;  %s7136_s5 = inlined_call_operand.hbm [shape: f32[2,1024,128], index: 5, kind: output, shape index: {1}, may-alias: {3,5}]  }
   0x1   :  { %7161 = sst [smem:[#allocation25_spill]] %s7133_s2 }
   0x2   :  { %11 = vsyncpa [#allocation3], 0 }
   0x3   :  { %13 = vsyncpa [#allocation3 + $0x1], 0 }
   0x4   :  { %14 = vsyncpa [#allocation6], 0 }
   0x5   :  { %16 = vsyncpa [#allocation6 + $0x1], 0 }
   0x6   :  { %17 = vsyncpa [#allocation4], 0 }
   0x7   :  { %19 = vsyncpa [#allocation4 + $0x1], 0 }
   0x8   :  { %20 = vsyncpa [#allocation9], 0 }
   0x9   :  { %22 = vsyncpa [#allocation9 + $0x1], 0  ;;  %s3790_s18 = smov 0   ;;  %s3792_s19 = smov 0  }
   0xa   :  { %s3794_s20 = smov 0   ;;  %s3796_s21 = smov 0  }
   0xb   :  { %s3798_s22 = smov 0   ;;  %s3800_s23 = smov 0  }
   0xc LB: > { %s3143_s24 = sadd.s32 4294967295, %s3749_s23   ;;  %s3144_s25 = sadd.s32 4294967294, %s3749_s23   ;;  %s3749_s23 = sphi %s3800_s23, %s28_s23   ;;  %s3745_s22 = sphi %s3798_s22, %s7223_s22   ;;  %s3741_s21 = sphi %s3796_s21, %s7222_s21   ;;  %s3737_s20 = sphi %s3794_s20, %s7221_s20   ;;  %s3733_s19 = sphi %s3792_s19, %s7220_s19   ;;  %s3729_s18 = sphi %s3790_s18, %s7219_s18  }
   0xd   : > { %s40_s26 = sadd.s32 1, %s3745_s22  ;;  %s101_s27 = sadd.s32 1, %s3737_s20 }
   0xe   : > { %p42_p0 = scmp.ge.s32.totalorder %s40_s26, 2  ;;  %p108_p1 = scmp.ne.s32.totalorder %s3737_s20, %s3733_s19 }
   0xf   : > { %p109_p2 = scmp.eq.s32.totalorder %s3749_s23, 0  ;;  %p114_p3 = scmp.ne.s32.totalorder %s3733_s19, %s3729_s18 }
  0x10   : > { %s7225_s26 = smov (%p42_p0, %s40_s26), 0  ;;  %p115_p5 = scmp.eq.s32.totalorder %s3143_s24, 0 }
  0x11   : > { %7162 = sst [smem:[#allocation14_spill]] %s7225_s26  ;;  %p3831_p4 = por %p109_p2, %p108_p1 }
  0x12   : > { %s96_s29 = ssub.s32 %s3745_s22, %s7225_s26  ;;  %p168_p6 = scmp.eq.s32.totalorder %s3143_s24, 1 }
  0x13   : > { %p99_p7 = scmp.eq.s32.totalorder %s96_s29, 0  ;;  %p3837_p8 = por %p115_p5, %p114_p3 }
  0x14   : > { %p3841_p9 = por %p168_p6, %p108_p1  ;;  %p174_p10 = scmp.eq.s32.totalorder %s3144_s25, 1 }
  0x15   : > { %s3846_s7 = scalar_select %p99_p7, %s3737_s20, %s101_s27  }
  0x16   : > { %p3848_p11 = por %p174_p10, %p114_p3  ;;  %p3148_p12 = scmp.ge.s32.totalorder %s3749_s23, 2 }
  0x17   : > { %7166 = sst [smem:[#allocation15_spill]] %s3846_s7  ;;  %p3194_p13 = scmp.lt.s32.totalorder %s3749_s23, 2 }
  0x18   : > { %s3855_s9 = sand.u32 1, %s3737_s20   ;;  %s3168_s11 = sshll.u32 %s3745_s22, 14 }
  0x19   : > { %s3149_s10 = sshll.u32 %s3855_s9, 10  ;;  %s7168_s2 = sld [smem:[#allocation25_spill]] }
  0x1a   : > { %s244_s15 = scalar_lea.vmem [#allocation2], %s3149_s10  ;;  %p3868_p0 = pnand %p3194_p13, %p3831_p4 }
  0x1b   : > { %s253_s16 = sshll.u32 %s244_s15, 4  ;;  %p3155_p1 = scmp.ge.s32.totalorder %s3749_s23, 1  ;;  %s254_s16 = int_to_ptr.vmem [resolvable:$true] %s253_s16 }
  0x1c   : > { %s241_s24 = scalar_lea.sflag [#allocation3], %s3855_s9  ;;  %p3581_p2 = pneg %p3868_p0 }
  0x1d   : > { %s3592_s25 = scalar_lea.vmem %s254_s16, 16384  ;;  %s3751_s27 = smov [#allocation2]  }
  0x1e   : > { %p3593_p3 = scmp.ne.s32.totalorder %s254_s16, %s3592_s25  ;;  %s3597_s29 = sshll.u32 %s3751_s27, 4  ;;  %s3598_s29 = int_to_ptr.vmem [resolvable:$false] %s3597_s29 }
  0x1f   : > { %s252_s14 = scalar_lea.hbm %s7168_s2, %s3168_s11  ;;  %s3599_s28 = scalar_lea.vmem %s3598_s29, 32768 }
  0x20   : > { %p3595_p5 = pnand %p3593_p3, %p3581_p2  ;;  %p3600_p4 = scmp.lt.s32.totalorder %s254_s16, %s3598_s29 }
  0x21   : > { %p3601_p7 = scmp.lt.s32.totalorder %s3599_s28, %s3592_s25 }
  0x22   : > { %p3596_p6 = pneg %p3595_p5 }
  0x23   : > { %p3602_p10 = por %p3601_p7, %p3600_p4 }
  0x25   : > { %p3603_p13 = pnand %p3602_p10, %p3596_p6 }
  0x27   : > { %3606 = shalt.err (!%p3603_p13)
}
  0x28   : > { %s3752_s12 = smov 128   ;;  %s3753_s13 = smov 8  }
  0x29   : > { %3183 = dma.hbm_to_vmem [thread:$0]  (!%p3868_p0), %s252_s14, 16384, %s254_s16, %s241_s24, %s3752_s12, %s3752_s12, %s3753_s13  }
  0x2a   : > { %p284_p3 = scmp.lt.s32.totalorder %s3749_s23, 3  ;;  %s275_s25 = scalar_lea.hbm %s7134_s3, %s3168_s11 }
  0x2b   : > { %s267_s28 = scalar_lea.vmem [#allocation5], %s3149_s10  ;;  %s264_s26 = scalar_lea.sflag [#allocation6], %s3855_s9 }
  0x2c   : > { %p3889_p5 = pnand %p3155_p1, %p284_p3  ;;  %s276_s2 = sshll.u32 %s267_s28, 4  ;;  %s277_s2 = int_to_ptr.vmem [resolvable:$true] %s276_s2 }
  0x2d   : > { %s3620_s7 = scalar_lea.vmem %s277_s2, 16384  ;;  %s3754_s14 = smov [#allocation5]  }
  0x2e   : > { %p3621_p6 = scmp.ne.s32.totalorder %s277_s2, %s3620_s7  ;;  %s3625_s16 = sshll.u32 %s3754_s14, 4  ;;  %s3626_s16 = int_to_ptr.vmem [resolvable:$false] %s3625_s16 }
  0x2f   : > { %s3627_s11 = scalar_lea.vmem %s3626_s16, 32768  ;;  %p3628_p10 = scmp.lt.s32.totalorder %s277_s2, %s3626_s16 }
  0x30   : > { %p3623_p4 = pnand %p3621_p6, %p3581_p2  ;;  %p3629_p1 = scmp.lt.s32.totalorder %s3627_s11, %s3620_s7 }
  0x32   : > { %p3624_p7 = pneg %p3623_p4  ;;  %p3630_p13 = por %p3629_p1, %p3628_p10 }
  0x34   : > { %p3631_p3 = pnand %p3630_p13, %p3624_p7 }
  0x36   : > { %3634 = shalt.err (!%p3631_p3)
}
  0x37   : > { %3186 = dma.hbm_to_vmem [thread:$0]  (!%p3868_p0), %s275_s25, 16384, %s277_s2, %s264_s26, %s3752_s12, %s3752_s12, %s3753_s13  }
  0x38   : > { %288 = sbr.rel (%p3889_p5) target bundleno = 720 (0x2d0), region = 36 }
  0x3d   : > { %s3904_s9 = sand.u32 1, %s3733_s19  }
  0x3e   : > { %s3907_s10 = sshll.u32 %s3904_s9, 10  ;;  %s291_s24 = scalar_lea.sflag [#allocation3], %s3904_s9 }
  0x3f   : > { %s3911_s7 = scalar_lea.vmem [#allocation2], %s3907_s10 }
  0x40   : > { %3712 = dma.done.wait (%p3837_p8), %s291_s24, 16384  }
  0x41   : > { %3714 = vsyncadd (%p3837_p8), %s291_s24, 4294950912  ;;  %s300_s2 = scalar_lea.sflag [#allocation6], %s3904_s9  ;;  %s3919_s26 = scalar_lea.vmem [#allocation5], %s3907_s10 }
  0x42   : > { %3716 = dma.done.wait (%p3837_p8), %s300_s2, 16384  }
  0x43   : > { %3718 = vsyncadd (%p3837_p8), %s300_s2, 4294950912  ;;  %v3926_v0 = vld [vmem:[%s3911_s7 + $0x10] sm:$0xff]  ;;  %s3755_s17 = smov 64   ;;  %v3931_v1 = vld [vmem:[%s3911_s7] sm:$0xff]  ;;  %s4256_s28 = scalar_lea.vmem [#allocation7], %s3907_s10 }
  0x44   : > { %882 = vrot.lane.b32.xlu1 %v3926_v0, %s3755_s17  ;;  %878 = vrot.lane.b32.xlu0 %v3931_v1, %s3755_s17  ;;  %v3936_v2 = vld [vmem:[%s3911_s7 + $0x18] sm:$0xff]  ;;  %v3939_v3 = vld [vmem:[%s3911_s7 + $0x8] sm:$0xff]  ;;  %s5699_s29 = scalar_lea.vmem [#allocation8], %s3907_s10  ;;  %s3170_s11 = sshll.u32 %s3741_s21, 14 }
  0x45   : > { %v3946_v4 = vld [vmem:[%s3911_s7 + $0x28] sm:$0xff]  ;;  %v3949_v5 = vld [vmem:[%s3911_s7 + $0x20] sm:$0xff]  ;;  %v3956_v6 = vld [vmem:[%s3911_s7 + $0x38] sm:$0xff]  ;;  %s2947_s10 = sshll.u32 %s4256_s28, 4  ;;  %s6524_s13 = scalar_lea.hbm %s7135_s4, %s3170_s11  ;;  %s6535_s10 = int_to_ptr.vmem [resolvable:$true] %s2947_s10 }
  0x46   : > { %v3959_v7 = vld [vmem:[%s3911_s7 + $0x30] sm:$0xff]  ;;  %v3966_v8 = vld [vmem:[%s3911_s7 + $0x48] sm:$0xff]  ;;  %v3969_v9 = vld [vmem:[%s3911_s7 + $0x40] sm:$0xff]  ;;  %s3635_s24 = scalar_lea.vmem %s6535_s10, 16384  ;;  %s3756_s2 = smov [#allocation7]  }
  0x47   : > { %v3976_v10 = vld [vmem:[%s3911_s7 + $0x58] sm:$0xff]  ;;  %v3979_v11 = vld [vmem:[%s3911_s7 + $0x50] sm:$0xff]  ;;  %v3986_v12 = vld [vmem:[%s3911_s7 + $0x68] sm:$0xff]  ;;  %p3636_p8 = scmp.ne.s32.totalorder %s6535_s10, %s3635_s24  ;;  %s3639_s30 = sshll.u32 %s3756_s2, 4  ;;  %s3640_s30 = int_to_ptr.vmem [resolvable:$false] %s3639_s30 }
  0x48   : > { %884 = vrot.lane.b32.xlu1 %v3936_v2, %s3755_s17  ;;  %880 = vrot.lane.b32.xlu0 %v3939_v3, %s3755_s17  ;;  %v3989_v13 = vld [vmem:[%s3911_s7 + $0x60] sm:$0xff]  ;;  %v3996_v14 = vld [vmem:[%s3911_s7 + $0x78] sm:$0xff]  ;;  %s3641_s12 = scalar_lea.vmem %s3640_s30, 32768  ;;  %p3642_p5 = scmp.lt.s32.totalorder %s6535_s10, %s3640_s30 }
  0x49   : > { %v3999_v15 = vld [vmem:[%s3911_s7 + $0x70] sm:$0xff]  ;;  %v4006_v16 = vld [vmem:[%s3911_s7 + $0x88] sm:$0xff]  ;;  %v4009_v17 = vld [vmem:[%s3911_s7 + $0x80] sm:$0xff]  ;;  %p3637_p0 = pnand %p3636_p8, %p3841_p9  ;;  %p3643_p6 = scmp.lt.s32.totalorder %s3641_s12, %s3635_s24 }
  0x4a   : > { %v4016_v18 = vld [vmem:[%s3911_s7 + $0x98] sm:$0xff]  ;;  %v4019_v19 = vld [vmem:[%s3911_s7 + $0x90] sm:$0xff]  ;;  %v4026_v20 = vld [vmem:[%s3911_s7 + $0xa8] sm:$0xff] }
  0x4b   : > { %v4029_v21 = vld [vmem:[%s3911_s7 + $0xa0] sm:$0xff]  ;;  %v4036_v22 = vld [vmem:[%s3911_s7 + $0xb8] sm:$0xff]  ;;  %v4039_v23 = vld [vmem:[%s3911_s7 + $0xb0] sm:$0xff]  ;;  %p3638_p2 = pneg %p3637_p0  ;;  %p3644_p4 = por %p3643_p6, %p3642_p5 }
  0x4c   : > { %888 = vrot.lane.b32.xlu1 %v3946_v4, %s3755_s17  ;;  %886 = vrot.lane.b32.xlu0 %v3949_v5, %s3755_s17  ;;  %v4046_v24 = vld [vmem:[%s3911_s7 + $0xc8] sm:$0xff]  ;;  %v4049_v25 = vld [vmem:[%s3911_s7 + $0xc0] sm:$0xff] }
  0x4d   : > { %v4056_v26 = vld [vmem:[%s3911_s7 + $0xd8] sm:$0xff]  ;;  %v4059_v27 = vld [vmem:[%s3911_s7 + $0xd0] sm:$0xff]  ;;  %v4066_v28 = vld [vmem:[%s3911_s7 + $0xe8] sm:$0xff]  ;;  %p3645_p7 = pnand %p3644_p4, %p3638_p2 }
  0x4e   : > { %v4069_v29 = vld [vmem:[%s3911_s7 + $0xe0] sm:$0xff]  ;;  %v4076_v30 = vld [vmem:[%s3911_s7 + $0xf8] sm:$0xff]  ;;  %v4079_v31 = vld [vmem:[%s3911_s7 + $0xf0] sm:$0xff] }
  0x4f   : > { %v4086_v32 = vld [vmem:[%s3911_s7 + $0x108] sm:$0xff]  ;;  %v4089_v33 = vld [vmem:[%s3911_s7 + $0x100] sm:$0xff]  ;;  %v4096_v34 = vld [vmem:[%s3911_s7 + $0x118] sm:$0xff] }
  0x50   : > { %892 = vrot.lane.b32.xlu1 %v3956_v6, %s3755_s17  ;;  %890 = vrot.lane.b32.xlu0 %v3959_v7, %s3755_s17  ;;  %v4099_v35 = vld [vmem:[%s3911_s7 + $0x110] sm:$0xff]  ;;  %v4106_v36 = vld [vmem:[%s3911_s7 + $0x128] sm:$0xff] }
  0x51   : > { %v4109_v37 = vld [vmem:[%s3911_s7 + $0x120] sm:$0xff]  ;;  %v4116_v38 = vld [vmem:[%s3911_s7 + $0x138] sm:$0xff]  ;;  %v4119_v39 = vld [vmem:[%s3911_s7 + $0x130] sm:$0xff] }
  0x52   : > { %v4126_v40 = vld [vmem:[%s3911_s7 + $0x148] sm:$0xff]  ;;  %v4129_v41 = vld [vmem:[%s3911_s7 + $0x140] sm:$0xff]  ;;  %v4136_v42 = vld [vmem:[%s3911_s7 + $0x158] sm:$0xff] }
  0x53   : > { %v4139_v43 = vld [vmem:[%s3911_s7 + $0x150] sm:$0xff]  ;;  %v4146_v44 = vld [vmem:[%s3911_s7 + $0x168] sm:$0xff]  ;;  %v4149_v45 = vld [vmem:[%s3911_s7 + $0x160] sm:$0xff] }
  0x54   : > { %896 = vrot.lane.b32.xlu1 %v3966_v8, %s3755_s17  ;;  %894 = vrot.lane.b32.xlu0 %v3969_v9, %s3755_s17  ;;  %v4156_v46 = vld [vmem:[%s3911_s7 + $0x178] sm:$0xff]  ;;  %v4159_v47 = vld [vmem:[%s3911_s7 + $0x170] sm:$0xff] }
  0x55   : > { %v4166_v48 = vld [vmem:[%s3911_s7 + $0x188] sm:$0xff]  ;;  %v4169_v49 = vld [vmem:[%s3911_s7 + $0x180] sm:$0xff]  ;;  %v4176_v50 = vld [vmem:[%s3911_s7 + $0x198] sm:$0xff] }
  0x56   : > { %7171 = vst [vmem:[#allocation16_spill] sm:$0xff] %v4169_v49  ;;  %7172 = vst [vmem:[#allocation17_spill] sm:$0xff] %v4176_v50  ;;  %v4179_v51 = vld [vmem:[%s3911_s7 + $0x190] sm:$0xff]  ;;  %v4186_v52 = vld [vmem:[%s3911_s7 + $0x1a8] sm:$0xff] }
  0x57   : > { %7173 = vst [vmem:[#allocation18_spill] sm:$0xff] %v4179_v51  ;;  %7174 = vst [vmem:[#allocation19_spill] sm:$0xff] %v4186_v52  ;;  %v4189_v53 = vld [vmem:[%s3911_s7 + $0x1a0] sm:$0xff]  ;;  %v4196_v54 = vld [vmem:[%s3911_s7 + $0x1b8] sm:$0xff] }
  0x58   : > { %900 = vrot.lane.b32.xlu1 %v3976_v10, %s3755_s17  ;;  %898 = vrot.lane.b32.xlu0 %v3979_v11, %s3755_s17  ;;  %7175 = vst [vmem:[#allocation20_spill] sm:$0xff] %v4189_v53  ;;  %7176 = vst [vmem:[#allocation21_spill] sm:$0xff] %v4196_v54  ;;  %v4199_v55 = vld [vmem:[%s3911_s7 + $0x1b0] sm:$0xff]  ;;  %v4206_v56 = vld [vmem:[%s3911_s7 + $0x1c8] sm:$0xff] }
  0x59   : > { %7177 = vst [vmem:[#allocation22_spill] sm:$0xff] %v4199_v55  ;;  %7178 = vst [vmem:[#allocation23_spill] sm:$0xff] %v4206_v56  ;;  %v368_v57 = vld [vmem:[%s7131_s0 + $0x10] sm:$0xff]  ;;  %v4212_v58 = vld [vmem:[%s3911_s7 + $0x1c0] sm:$0xff] }
  0x5a   : > { %7179 = vst [vmem:[#allocation24_spill] sm:$0xff] %v4212_v58  ;;  %v366_v59 = vld [vmem:[%s7131_s0] sm:$0xff]  ;;  %v496_v60 = vld [vmem:[%s7132_s1 + $0x10] sm:$0xff]  ;;  %v1264_v61 = vmul.f32 %v3926_v0, %v368_v57  ;;  %v681_v63 = vld [vmem:[%s3911_s7 + $0x1d8] sm:$0xff] }
  0x5b   : > { %v494_v62 = vld [vmem:[%s7132_s1] sm:$0xff]  ;;  %v367_v0 = vld [vmem:[%s7131_s0 + $0x8] sm:$0xff] }
  0x5c   : > { %904 = vrot.lane.b32.xlu1 %v3986_v12, %s3755_s17  ;;  %902 = vrot.lane.b32.xlu0 %v3989_v13, %s3755_s17 }
  0x60   : > { %908 = vrot.lane.b32.xlu1 %v3996_v14, %s3755_s17  ;;  %906 = vrot.lane.b32.xlu0 %v3999_v15, %s3755_s17 }
  0x64   : > { %912 = vrot.lane.b32.xlu1 %v4006_v16, %s3755_s17  ;;  %910 = vrot.lane.b32.xlu0 %v4009_v17, %s3755_s17 }
  0x68   : > { %916 = vrot.lane.b32.xlu1 %v4016_v18, %s3755_s17  ;;  %914 = vrot.lane.b32.xlu0 %v4019_v19, %s3755_s17 }
  0x6c   : > { %920 = vrot.lane.b32.xlu1 %v4026_v20, %s3755_s17  ;;  %918 = vrot.lane.b32.xlu0 %v4029_v21, %s3755_s17 }
  0x70   : > { %924 = vrot.lane.b32.xlu1 %v4036_v22, %s3755_s17  ;;  %922 = vrot.lane.b32.xlu0 %v4039_v23, %s3755_s17 }
  0x74   : > { %928 = vrot.lane.b32.xlu1 %v4046_v24, %s3755_s17  ;;  %926 = vrot.lane.b32.xlu0 %v4049_v25, %s3755_s17 }
  0x78   : > { %932 = vrot.lane.b32.xlu1 %v4056_v26, %s3755_s17  ;;  %930 = vrot.lane.b32.xlu0 %v4059_v27, %s3755_s17 }
  0x7c   : > { %936 = vrot.lane.b32.xlu1 %v4066_v28, %s3755_s17  ;;  %934 = vrot.lane.b32.xlu0 %v4069_v29, %s3755_s17 }
  0x80   : > { %940 = vrot.lane.b32.xlu1 %v4076_v30, %s3755_s17  ;;  %938 = vrot.lane.b32.xlu0 %v4079_v31, %s3755_s17 }
  0x84   : > { %944 = vrot.lane.b32.xlu1 %v4086_v32, %s3755_s17  ;;  %942 = vrot.lane.b32.xlu0 %v4089_v33, %s3755_s17 }
  0x88   : > { %948 = vrot.lane.b32.xlu1 %v4096_v34, %s3755_s17  ;;  %946 = vrot.lane.b32.xlu0 %v4099_v35, %s3755_s17 }
  0x8c   : > { %952 = vrot.lane.b32.xlu1 %v4106_v36, %s3755_s17  ;;  %950 = vrot.lane.b32.xlu0 %v4109_v37, %s3755_s17 }
  0x90   : > { %956 = vrot.lane.b32.xlu1 %v4116_v38, %s3755_s17  ;;  %954 = vrot.lane.b32.xlu0 %v4119_v39, %s3755_s17 }
  0x94   : > { %960 = vrot.lane.b32.xlu1 %v4126_v40, %s3755_s17  ;;  %958 = vrot.lane.b32.xlu0 %v4129_v41, %s3755_s17 }
  0x98   : > { %964 = vrot.lane.b32.xlu1 %v4136_v42, %s3755_s17  ;;  %962 = vrot.lane.b32.xlu0 %v4139_v43, %s3755_s17 }
  0x9c   : > { %968 = vrot.lane.b32.xlu1 %v4146_v44, %s3755_s17  ;;  %966 = vrot.lane.b32.xlu0 %v4149_v45, %s3755_s17 }
  0xa0   : > { %972 = vrot.lane.b32.xlu1 %v4156_v46, %s3755_s17  ;;  %970 = vrot.lane.b32.xlu0 %v4159_v47, %s3755_s17 }
  0xa4   : > { %976 = vrot.lane.b32.xlu1 %v4166_v48, %s3755_s17  ;;  %974 = vrot.lane.b32.xlu0 %v4169_v49, %s3755_s17  ;;  %v683_v49 = vld [vmem:[%s3911_s7 + $0x1e8] sm:$0xff] }
  0xa8   : > { %980 = vrot.lane.b32.xlu1 %v4176_v50, %s3755_s17  ;;  %978 = vrot.lane.b32.xlu0 %v4179_v51, %s3755_s17  ;;  %v495_v50 = vld [vmem:[%s7132_s1 + $0x8] sm:$0xff] }
  0xac   : > { %984 = vrot.lane.b32.xlu1 %v4186_v52, %s3755_s17  ;;  %982 = vrot.lane.b32.xlu0 %v4189_v53, %s3755_s17  ;;  %v680_v53 = vld [vmem:[%s3911_s7 + $0x1d0] sm:$0xff] }
  0xb0   : > { %988 = vrot.lane.b32.xlu1 %v4196_v54, %s3755_s17  ;;  %986 = vrot.lane.b32.xlu0 %v4199_v55, %s3755_s17  ;;  %v1262_v55 = vmul.f32 %v3931_v1, %v366_v59  ;;  %v497_v1 = vld [vmem:[%s7132_s1 + $0x18] sm:$0xff] }
  0xb4   : > { %992 = vrot.lane.b32.xlu1 %v4206_v56, %s3755_s17  ;;  %990 = vrot.lane.b32.xlu0 %v4212_v58, %s3755_s17  ;;  %v369_v56 = vld [vmem:[%s7131_s0 + $0x18] sm:$0xff] }
  0xb5   : > { %v1265_v59 = vmul.f32 %v3936_v2, %v369_v56  ;;  %v370_v2 = vld [vmem:[%s7131_s0 + $0x20] sm:$0xff] }
  0xb6   : > { %v883_v54 = vpop.permute.xlu1 %882  ;;  %v879_v58 = vpop.permute.xlu0 %878 }
  0xb7   : > { %v1392_v57 = vmul.f32 %v883_v54, %v496_v60  ;;  %v1390_v52 = vmul.f32 %v879_v58, %v494_v62  ;;  %v1263_v54 = vmul.f32 %v3939_v3, %v367_v0  ;;  %v371_v58 = vld [vmem:[%s7131_s0 + $0x28] sm:$0xff]  ;;  %v685_v0 = vld [vmem:[%s3911_s7 + $0x1f8] sm:$0xff] }
  0xb8   : > { %996 = vrot.lane.b32.xlu1 %v681_v63, %s3755_s17  ;;  %994 = vrot.lane.b32.xlu0 %v680_v53, %s3755_s17  ;;  %v682_v63 = vld [vmem:[%s3911_s7 + $0x1e0] sm:$0xff] }
  0xb9   : > { %v1520_v51 = vadd.f32 %v1392_v57, %v1264_v61  ;;  %v1518_v60 = vadd.f32 %v1390_v52, %v1262_v55  ;;  %v499_v52 = vld [vmem:[%s7132_s1 + $0x28] sm:$0xff]  ;;  %v1267_v55 = vmul.f32 %v3946_v4, %v371_v58  ;;  %v1266_v57 = vmul.f32 %v3949_v5, %v370_v2  ;;  %v372_v4 = vld [vmem:[%s7131_s0 + $0x30] sm:$0xff]  ;;  %v501_v5 = vld [vmem:[%s7132_s1 + $0x38] sm:$0xff] }
  0xba   : > { %v885_v62 = vpop.permute.xlu1 %884  ;;  %v881_v3 = vpop.permute.xlu0 %880  ;;  %v500_v2 = vld [vmem:[%s7132_s1 + $0x30] sm:$0xff] }
  0xbb   : > { %1648 = vst [vmem:[%s4256_s28 + $0x10] sm:$0xff] %v1520_v51  ;;  %v1393_v53 = vmul.f32 %v885_v62, %v497_v1  ;;  %1646 = vst [vmem:[%s4256_s28] sm:$0xff] %v1518_v60  ;;  %v1391_v56 = vmul.f32 %v881_v3, %v495_v50  ;;  %v498_v51 = vld [vmem:[%s7132_s1 + $0x20] sm:$0xff]  ;;  %v684_v60 = vld [vmem:[%s3911_s7 + $0x1f0] sm:$0xff]  ;;  %v1268_v3 = vmul.f32 %v3959_v7, %v372_v4 }
  0xbc   : > { %1000 = vrot.lane.b32.xlu1 %v683_v49, %s3755_s17  ;;  %998 = vrot.lane.b32.xlu0 %v682_v63, %s3755_s17  ;;  %v373_v49 = vld [vmem:[%s7131_s0 + $0x38] sm:$0xff]  ;;  %v503_v7 = vld [vmem:[%s7132_s1 + $0x48] sm:$0xff] }
  0xbd   : > { %v1521_v61 = vadd.f32 %v1393_v53, %v1265_v59  ;;  %v1519_v50 = vadd.f32 %v1391_v56, %v1263_v54  ;;  %v1269_v54 = vmul.f32 %v3956_v6, %v373_v49  ;;  %v687_v53 = vld [vmem:[%s3911_s7 + $0x208] sm:$0xff]  ;;  %v374_v6 = vld [vmem:[%s7131_s0 + $0x40] sm:$0xff] }
  0xbe   : > { %v889_v1 = vpop.permute.xlu1 %888  ;;  %v887_v58 = vpop.permute.xlu0 %886  ;;  %v375_v56 = vld [vmem:[%s7131_s0 + $0x48] sm:$0xff]  ;;  %v1270_v4 = vmul.f32 %v3969_v9, %v374_v6  ;;  %v505_v9 = vld [vmem:[%s7132_s1 + $0x58] sm:$0xff] }
  0xbf   : > { %1649 = vst [vmem:[%s4256_s28 + $0x18] sm:$0xff] %v1521_v61  ;;  %v1395_v59 = vmul.f32 %v889_v1, %v499_v52  ;;  %1647 = vst [vmem:[%s4256_s28 + $0x8] sm:$0xff] %v1519_v50  ;;  %v1394_v62 = vmul.f32 %v887_v58, %v498_v51  ;;  %v686_v51 = vld [vmem:[%s3911_s7 + $0x200] sm:$0xff] }
  0xc0   : > { %1004 = vrot.lane.b32.xlu1 %v685_v0, %s3755_s17  ;;  %1002 = vrot.lane.b32.xlu0 %v684_v60, %s3755_s17  ;;  %v502_v1 = vld [vmem:[%s7132_s1 + $0x40] sm:$0xff]  ;;  %v689_v60 = vld [vmem:[%s3911_s7 + $0x218] sm:$0xff] }
  0xc1   : > { %v1523_v63 = vadd.f32 %v1395_v59, %v1267_v55  ;;  %v1522_v52 = vadd.f32 %v1394_v62, %v1266_v57  ;;  %v1271_v57 = vmul.f32 %v3966_v8, %v375_v56  ;;  %v377_v59 = vld [vmem:[%s7131_s0 + $0x58] sm:$0xff]  ;;  %v376_v8 = vld [vmem:[%s7131_s0 + $0x50] sm:$0xff] }
  0xc2   : > { %v893_v61 = vpop.permute.xlu1 %892  ;;  %v891_v0 = vpop.permute.xlu0 %890  ;;  %v504_v56 = vld [vmem:[%s7132_s1 + $0x50] sm:$0xff] }
  0xc3   : > { %1651 = vst [vmem:[%s4256_s28 + $0x28] sm:$0xff] %v1523_v63  ;;  %v1397_v55 = vmul.f32 %v893_v61, %v501_v5  ;;  %1650 = vst [vmem:[%s4256_s28 + $0x20] sm:$0xff] %v1522_v52  ;;  %v1396_v49 = vmul.f32 %v891_v0, %v500_v2  ;;  %v688_v5 = vld [vmem:[%s3911_s7 + $0x210] sm:$0xff]  ;;  %v691_v52 = vld [vmem:[%s3911_s7 + $0x228] sm:$0xff]  ;;  %v1272_v61 = vmul.f32 %v3979_v11, %v376_v8 }
  0xc4   : > { %1008 = vrot.lane.b32.xlu1 %v687_v53, %s3755_s17  ;;  %1006 = vrot.lane.b32.xlu0 %v686_v51, %s3755_s17  ;;  %v1273_v53 = vmul.f32 %v3976_v10, %v377_v59  ;;  %v379_v51 = vld [vmem:[%s7131_s0 + $0x68] sm:$0xff]  ;;  %v690_v0 = vld [vmem:[%s3911_s7 + $0x220] sm:$0xff] }
  0xc5   : > { %v1525_v50 = vadd.f32 %v1397_v55, %v1269_v54  ;;  %v1524_v58 = vadd.f32 %v1396_v49, %v1268_v3  ;;  %v378_v10 = vld [vmem:[%s7131_s0 + $0x60] sm:$0xff]  ;;  %v507_v11 = vld [vmem:[%s7132_s1 + $0x68] sm:$0xff]  ;;  %v692_v8 = vld [vmem:[%s3911_s7 + $0x230] sm:$0xff] }
  0xc6   : > { %v897_v62 = vpop.permute.xlu1 %896  ;;  %v895_v63 = vpop.permute.xlu0 %894  ;;  %v1274_v59 = vmul.f32 %v3989_v13, %v378_v10  ;;  %v509_v13 = vld [vmem:[%s7132_s1 + $0x78] sm:$0xff] }
  0xc7   : > { %1653 = vst [vmem:[%s4256_s28 + $0x38] sm:$0xff] %v1525_v50  ;;  %v1399_v54 = vmul.f32 %v897_v62, %v503_v7  ;;  %1652 = vst [vmem:[%s4256_s28 + $0x30] sm:$0xff] %v1524_v58  ;;  %v1398_v2 = vmul.f32 %v895_v63, %v502_v1  ;;  %v1275_v50 = vmul.f32 %v3986_v12, %v379_v51  ;;  %v381_v58 = vld [vmem:[%s7131_s0 + $0x78] sm:$0xff]  ;;  %v380_v12 = vld [vmem:[%s7131_s0 + $0x70] sm:$0xff] }
  0xc8   : > { %1012 = vrot.lane.b32.xlu1 %v689_v60, %s3755_s17  ;;  %1010 = vrot.lane.b32.xlu0 %v688_v5, %s3755_s17  ;;  %v506_v60 = vld [vmem:[%s7132_s1 + $0x60] sm:$0xff] }
  0xc9   : > { %v1527_v3 = vadd.f32 %v1399_v54, %v1271_v57  ;;  %v1526_v6 = vadd.f32 %v1398_v2, %v1270_v4  ;;  %v693_v4 = vld [vmem:[%s3911_s7 + $0x238] sm:$0xff] }
  0xca   : > { %v901_v55 = vpop.permute.xlu1 %900  ;;  %v899_v7 = vpop.permute.xlu0 %898 }
  0xcb   : > { %1655 = vst [vmem:[%s4256_s28 + $0x48] sm:$0xff] %v1527_v3  ;;  %v1401_v49 = vmul.f32 %v901_v55, %v505_v9  ;;  %1654 = vst [vmem:[%s4256_s28 + $0x40] sm:$0xff] %v1526_v6  ;;  %v1400_v57 = vmul.f32 %v899_v7, %v504_v56  ;;  %v1277_v9 = vmul.f32 %v3996_v14, %v381_v58  ;;  %v508_v3 = vld [vmem:[%s7132_s1 + $0x70] sm:$0xff]  ;;  %v695_v56 = vld [vmem:[%s3911_s7 + $0x248] sm:$0xff] }
  0xcc   : > { %1016 = vrot.lane.b32.xlu1 %v691_v52, %s3755_s17  ;;  %1014 = vrot.lane.b32.xlu0 %v690_v0, %s3755_s17  ;;  %v1276_v52 = vmul.f32 %v3999_v15, %v380_v12  ;;  %v694_v55 = vld [vmem:[%s3911_s7 + $0x240] sm:$0xff]  ;;  %v511_v15 = vld [vmem:[%s7132_s1 + $0x88] sm:$0xff] }
  0xcd   : > { %v1529_v1 = vadd.f32 %v1401_v49, %v1273_v53  ;;  %v1528_v62 = vadd.f32 %v1400_v57, %v1272_v61  ;;  %v383_v61 = vld [vmem:[%s7131_s0 + $0x88] sm:$0xff]  ;;  %v382_v14 = vld [vmem:[%s7131_s0 + $0x80] sm:$0xff]  ;;  %v696_v58 = vld [vmem:[%s3911_s7 + $0x250] sm:$0xff] }
  0xce   : > { %v905_v5 = vpop.permute.xlu1 %904  ;;  %v903_v63 = vpop.permute.xlu0 %902  ;;  %v1279_v7 = vmul.f32 %v4006_v16, %v383_v61  ;;  %v384_v16 = vld [vmem:[%s7131_s0 + $0x90] sm:$0xff] }
  0xcf   : > { %1657 = vst [vmem:[%s4256_s28 + $0x58] sm:$0xff] %v1529_v1  ;;  %v1403_v54 = vmul.f32 %v905_v5, %v507_v11  ;;  %1656 = vst [vmem:[%s4256_s28 + $0x50] sm:$0xff] %v1528_v62  ;;  %v1402_v2 = vmul.f32 %v903_v63, %v506_v60  ;;  %v510_v11 = vld [vmem:[%s7132_s1 + $0x80] sm:$0xff]  ;;  %v1278_v1 = vmul.f32 %v4009_v17, %v382_v14  ;;  %v385_v60 = vld [vmem:[%s7131_s0 + $0x98] sm:$0xff] }
  0xd0   : > { %1020 = vrot.lane.b32.xlu1 %v693_v4, %s3755_s17  ;;  %1018 = vrot.lane.b32.xlu0 %v692_v8, %s3755_s17  ;;  %v513_v17 = vld [vmem:[%s7132_s1 + $0x98] sm:$0xff]  ;;  %v1281_v12 = vmul.f32 %v4016_v18, %v385_v60  ;;  %v512_v63 = vld [vmem:[%s7132_s1 + $0x90] sm:$0xff] }
  0xd1   : > { %v1531_v53 = vadd.f32 %v1403_v54, %v1275_v50  ;;  %v1530_v51 = vadd.f32 %v1402_v2, %v1274_v59  ;;  %v697_v50 = vld [vmem:[%s3911_s7 + $0x258] sm:$0xff]  ;;  %v699_v2 = vld [vmem:[%s3911_s7 + $0x268] sm:$0xff]  ;;  %v386_v18 = vld [vmem:[%s7131_s0 + $0xa0] sm:$0xff] }
  0xd2   : > { %v909_v6 = vpop.permute.xlu1 %908  ;;  %v907_v10 = vpop.permute.xlu0 %906  ;;  %v514_v14 = vld [vmem:[%s7132_s1 + $0xa0] sm:$0xff] }
  0xd3   : > { %1659 = vst [vmem:[%s4256_s28 + $0x68] sm:$0xff] %v1531_v53  ;;  %v1405_v0 = vmul.f32 %v909_v6, %v509_v13  ;;  %1658 = vst [vmem:[%s4256_s28 + $0x60] sm:$0xff] %v1530_v51  ;;  %v1404_v49 = vmul.f32 %v907_v10, %v508_v3  ;;  %v1280_v13 = vmul.f32 %v4019_v19, %v384_v16  ;;  %v515_v19 = vld [vmem:[%s7132_s1 + $0xa8] sm:$0xff] }
  0xd4   : > { %1024 = vrot.lane.b32.xlu1 %v695_v56, %s3755_s17  ;;  %1022 = vrot.lane.b32.xlu0 %v694_v55, %s3755_s17  ;;  %v698_v56 = vld [vmem:[%s3911_s7 + $0x260] sm:$0xff]  ;;  %v1282_v10 = vmul.f32 %v4029_v21, %v386_v18  ;;  %v517_v21 = vld [vmem:[%s7132_s1 + $0xb8] sm:$0xff] }
  0xd5   : > { %v1533_v57 = vadd.f32 %v1405_v0, %v1277_v9  ;;  %v1532_v4 = vadd.f32 %v1404_v49, %v1276_v52  ;;  %v387_v9 = vld [vmem:[%s7131_s0 + $0xa8] sm:$0xff]  ;;  %v701_v0 = vld [vmem:[%s3911_s7 + $0x278] sm:$0xff] }
  0xd6   : > { %v913_v59 = vpop.permute.xlu1 %912  ;;  %v911_v5 = vpop.permute.xlu0 %910  ;;  %v1283_v6 = vmul.f32 %v4026_v20, %v387_v9  ;;  %v389_v49 = vld [vmem:[%s7131_s0 + $0xb8] sm:$0xff]  ;;  %v388_v20 = vld [vmem:[%s7131_s0 + $0xb0] sm:$0xff]  ;;  %v518_v9 = vld [vmem:[%s7132_s1 + $0xc0] sm:$0xff] }
  0xd7   : > { %1661 = vst [vmem:[%s4256_s28 + $0x78] sm:$0xff] %v1533_v57  ;;  %v1407_v62 = vmul.f32 %v913_v59, %v511_v15  ;;  %1660 = vst [vmem:[%s4256_s28 + $0x70] sm:$0xff] %v1532_v4  ;;  %v1406_v8 = vmul.f32 %v911_v5, %v510_v11  ;;  %v700_v57 = vld [vmem:[%s3911_s7 + $0x270] sm:$0xff]  ;;  %v1285_v60 = vmul.f32 %v4036_v22, %v389_v49  ;;  %v390_v22 = vld [vmem:[%s7131_s0 + $0xc0] sm:$0xff] }
  0xd8   : > { %1028 = vrot.lane.b32.xlu1 %v697_v50, %s3755_s17  ;;  %1026 = vrot.lane.b32.xlu0 %v696_v58, %s3755_s17  ;;  %v516_v59 = vld [vmem:[%s7132_s1 + $0xb0] sm:$0xff]  ;;  %v703_v58 = vld [vmem:[%s3911_s7 + $0x288] sm:$0xff]  ;;  %v1284_v16 = vmul.f32 %v4039_v23, %v388_v20 }
  0xd9   : > { %v1535_v54 = vadd.f32 %v1407_v62, %v1279_v7  ;;  %v1534_v53 = vadd.f32 %v1406_v8, %v1278_v1  ;;  %v391_v62 = vld [vmem:[%s7131_s0 + $0xc8] sm:$0xff]  ;;  %v706_v20 = vld [vmem:[%s3911_s7 + $0x2a0] sm:$0xff] }
  0xda   : > { %v917_v3 = vpop.permute.xlu1 %916  ;;  %v915_v61 = vpop.permute.xlu0 %914  ;;  %v519_v23 = vld [vmem:[%s7132_s1 + $0xc8] sm:$0xff] }
  0xdb   : > { %1663 = vst [vmem:[%s4256_s28 + $0x88] sm:$0xff] %v1535_v54  ;;  %v1409_v52 = vmul.f32 %v917_v3, %v513_v17  ;;  %1662 = vst [vmem:[%s4256_s28 + $0x80] sm:$0xff] %v1534_v53  ;;  %v1408_v51 = vmul.f32 %v915_v61, %v512_v63  ;;  %v702_v17 = vld [vmem:[%s3911_s7 + $0x280] sm:$0xff]  ;;  %v705_v53 = vld [vmem:[%s3911_s7 + $0x298] sm:$0xff]  ;;  %v1286_v3 = vmul.f32 %v4049_v25, %v390_v22 }
  0xdc   : > { %1032 = vrot.lane.b32.xlu1 %v699_v2, %s3755_s17  ;;  %1030 = vrot.lane.b32.xlu0 %v698_v56, %s3755_s17  ;;  %v1287_v2 = vmul.f32 %v4046_v24, %v391_v62  ;;  %v393_v56 = vld [vmem:[%s7131_s0 + $0xd8] sm:$0xff]  ;;  %v704_v61 = vld [vmem:[%s3911_s7 + $0x290] sm:$0xff] }
  0xdd   : > { %v1537_v55 = vadd.f32 %v1409_v52, %v1281_v12  ;;  %v1536_v15 = vadd.f32 %v1408_v51, %v1280_v13  ;;  %v392_v24 = vld [vmem:[%s7131_s0 + $0xd0] sm:$0xff]  ;;  %v521_v25 = vld [vmem:[%s7132_s1 + $0xd8] sm:$0xff] }
  0xde   : > { %v921_v7 = vpop.permute.xlu1 %920  ;;  %v919_v50 = vpop.permute.xlu0 %918  ;;  %v1288_v49 = vmul.f32 %v4059_v27, %v392_v24  ;;  %v523_v27 = vld [vmem:[%s7132_s1 + $0xe8] sm:$0xff] }
  0xdf   : > { %1665 = vst [vmem:[%s4256_s28 + $0x98] sm:$0xff] %v1537_v55  ;;  %v1411_v11 = vmul.f32 %v921_v7, %v515_v19  ;;  %1664 = vst [vmem:[%s4256_s28 + $0x90] sm:$0xff] %v1536_v15  ;;  %v1410_v1 = vmul.f32 %v919_v50, %v514_v14  ;;  %v1289_v55 = vmul.f32 %v4056_v26, %v393_v56  ;;  %v395_v15 = vld [vmem:[%s7131_s0 + $0xe8] sm:$0xff]  ;;  %v394_v26 = vld [vmem:[%s7131_s0 + $0xe0] sm:$0xff] }
  0xe0   : > { %1036 = vrot.lane.b32.xlu1 %v701_v0, %s3755_s17  ;;  %1034 = vrot.lane.b32.xlu0 %v700_v57, %s3755_s17  ;;  %v520_v0 = vld [vmem:[%s7132_s1 + $0xd0] sm:$0xff]  ;;  %v710_v56 = vld [vmem:[%s3911_s7 + $0x2c0] sm:$0xff] }
  0xe1   : > { %v1539_v4 = vadd.f32 %v1411_v11, %v1283_v6  ;;  %v1538_v5 = vadd.f32 %v1410_v1, %v1282_v10  ;;  %v707_v10 = vld [vmem:[%s3911_s7 + $0x2a8] sm:$0xff] }
  0xe2   : > { %v925_v8 = vpop.permute.xlu1 %924  ;;  %v923_v54 = vpop.permute.xlu0 %922 }
  0xe3   : > { %1667 = vst [vmem:[%s4256_s28 + $0xa8] sm:$0xff] %v1539_v4  ;;  %v1413_v12 = vmul.f32 %v925_v8, %v517_v21  ;;  %1666 = vst [vmem:[%s4256_s28 + $0xa0] sm:$0xff] %v1538_v5  ;;  %v1412_v63 = vmul.f32 %v923_v54, %v516_v59  ;;  %v1291_v21 = vmul.f32 %v4066_v28, %v395_v15  ;;  %v522_v4 = vld [vmem:[%s7132_s1 + $0xe0] sm:$0xff]  ;;  %v709_v59 = vld [vmem:[%s3911_s7 + $0x2b8] sm:$0xff] }
  0xe4   : > { %1040 = vrot.lane.b32.xlu1 %v703_v58, %s3755_s17  ;;  %1038 = vrot.lane.b32.xlu0 %v702_v17, %s3755_s17  ;;  %v1290_v58 = vmul.f32 %v4069_v29, %v394_v26  ;;  %v708_v8 = vld [vmem:[%s3911_s7 + $0x2b0] sm:$0xff]  ;;  %v525_v29 = vld [vmem:[%s7132_s1 + $0xf8] sm:$0xff] }
  0xe5   : > { %v1541_v13 = vadd.f32 %v1413_v12, %v1285_v60  ;;  %v1540_v18 = vadd.f32 %v1412_v63, %v1284_v16  ;;  %v397_v16 = vld [vmem:[%s7131_s0 + $0xf8] sm:$0xff]  ;;  %v396_v28 = vld [vmem:[%s7131_s0 + $0xf0] sm:$0xff] }
  0xe6   : > { %v929_v52 = vpop.permute.xlu1 %928  ;;  %v927_v19 = vpop.permute.xlu0 %926  ;;  %v1293_v54 = vmul.f32 %v4076_v30, %v397_v16  ;;  %v398_v30 = vld [vmem:[%s7131_s0 + $0x100] sm:$0xff] }
  0xe7   : > { %1669 = vst [vmem:[%s4256_s28 + $0xb8] sm:$0xff] %v1541_v13  ;;  %v1415_v51 = vmul.f32 %v929_v52, %v519_v23  ;;  %1668 = vst [vmem:[%s4256_s28 + $0xb0] sm:$0xff] %v1540_v18  ;;  %v1414_v6 = vmul.f32 %v927_v19, %v518_v9  ;;  %v711_v23 = vld [vmem:[%s3911_s7 + $0x2c8] sm:$0xff]  ;;  %v1292_v13 = vmul.f32 %v4079_v31, %v396_v28 }
  0xe8   : > { %1044 = vrot.lane.b32.xlu1 %v705_v53, %s3755_s17  ;;  %1042 = vrot.lane.b32.xlu0 %v704_v61, %s3755_s17  ;;  %v399_v9 = vld [vmem:[%s7131_s0 + $0x108] sm:$0xff] }
  0xe9   : > { %v1543_v14 = vadd.f32 %v1415_v51, %v1287_v2  ;;  %v1542_v7 = vadd.f32 %v1414_v6, %v1286_v3  ;;  %v524_v2 = vld [vmem:[%s7132_s1 + $0xf0] sm:$0xff]  ;;  %v527_v61 = vld [vmem:[%s7132_s1 + $0x108] sm:$0xff]  ;;  %v1295_v24 = vmul.f32 %v4086_v32, %v399_v9  ;;  %v713_v51 = vld [vmem:[%s3911_s7 + $0x2d8] sm:$0xff] }
  0xea   : > { %v933_v57 = vpop.permute.xlu1 %932  ;;  %v931_v50 = vpop.permute.xlu0 %930  ;;  %v526_v6 = vld [vmem:[%s7132_s1 + $0x100] sm:$0xff]  ;;  %v400_v32 = vld [vmem:[%s7131_s0 + $0x110] sm:$0xff] }
  0xeb   : > { %1671 = vst [vmem:[%s4256_s28 + $0xc8] sm:$0xff] %v1543_v14  ;;  %v1417_v11 = vmul.f32 %v933_v57, %v521_v25  ;;  %1670 = vst [vmem:[%s4256_s28 + $0xc0] sm:$0xff] %v1542_v7  ;;  %v1416_v1 = vmul.f32 %v931_v50, %v520_v0  ;;  %v1294_v25 = vmul.f32 %v4089_v33, %v398_v30  ;;  %v712_v0 = vld [vmem:[%s3911_s7 + $0x2d0] sm:$0xff]  ;;  %v529_v7 = vld [vmem:[%s7132_s1 + $0x118] sm:$0xff] }
  0xec   : > { %1048 = vrot.lane.b32.xlu1 %v707_v10, %s3755_s17  ;;  %1046 = vrot.lane.b32.xlu0 %v706_v20, %s3755_s17  ;;  %v715_v20 = vld [vmem:[%s3911_s7 + $0x2e8] sm:$0xff]  ;;  %v1296_v50 = vmul.f32 %v4099_v35, %v400_v32 }
  0xed   : > { %v1545_v60 = vadd.f32 %v1417_v11, %v1289_v55  ;;  %v1544_v62 = vadd.f32 %v1416_v1, %v1288_v49  ;;  %v401_v55 = vld [vmem:[%s7131_s0 + $0x118] sm:$0xff]  ;;  %v528_v11 = vld [vmem:[%s7132_s1 + $0x110] sm:$0xff]  ;;  %v403_v1 = vld [vmem:[%s7131_s0 + $0x128] sm:$0xff] }
  0xee   : > { %v937_v5 = vpop.permute.xlu1 %936  ;;  %v935_v22 = vpop.permute.xlu0 %934  ;;  %v1297_v57 = vmul.f32 %v4096_v34, %v401_v55  ;;  %v402_v34 = vld [vmem:[%s7131_s0 + $0x120] sm:$0xff]  ;;  %v1299_v16 = vmul.f32 %v4106_v36, %v403_v1  ;;  %v404_v36 = vld [vmem:[%s7131_s0 + $0x130] sm:$0xff] }
  0xef   : > { %1673 = vst [vmem:[%s4256_s28 + $0xd8] sm:$0xff] %v1545_v60  ;;  %v1419_v17 = vmul.f32 %v937_v5, %v523_v27  ;;  %1672 = vst [vmem:[%s4256_s28 + $0xd0] sm:$0xff] %v1544_v62  ;;  %v1418_v12 = vmul.f32 %v935_v22, %v522_v4  ;;  %v717_v62 = vld [vmem:[%s3911_s7 + $0x2f8] sm:$0xff]  ;;  %v1298_v28 = vmul.f32 %v4109_v37, %v402_v34 }
  0xf0   : > { %1052 = vrot.lane.b32.xlu1 %v709_v59, %s3755_s17  ;;  %1050 = vrot.lane.b32.xlu0 %v708_v8, %s3755_s17  ;;  %v530_v8 = vld [vmem:[%s7132_s1 + $0x120] sm:$0xff] }
  0xf1   : > { %v1547_v63 = vadd.f32 %v1419_v17, %v1291_v21  ;;  %v1546_v53 = vadd.f32 %v1418_v12, %v1290_v58  ;;  %v714_v21 = vld [vmem:[%s3911_s7 + $0x2e0] sm:$0xff]  ;;  %v531_v58 = vld [vmem:[%s7132_s1 + $0x128] sm:$0xff]  ;;  %v405_v17 = vld [vmem:[%s7131_s0 + $0x138] sm:$0xff] }
  0xf2   : > { %v941_v3 = vpop.permute.xlu1 %940  ;;  %v939_v18 = vpop.permute.xlu0 %938  ;;  %v716_v12 = vld [vmem:[%s3911_s7 + $0x2f0] sm:$0xff] }
  0xf3   : > { %1675 = vst [vmem:[%s4256_s28 + $0xe8] sm:$0xff] %v1547_v63  ;;  %v1421_v52 = vmul.f32 %v941_v3, %v525_v29  ;;  %1674 = vst [vmem:[%s4256_s28 + $0xe0] sm:$0xff] %v1546_v53  ;;  %v1420_v31 = vmul.f32 %v939_v18, %v524_v2  ;;  %v1301_v2 = vmul.f32 %v4116_v38, %v405_v17  ;;  %v532_v53 = vld [vmem:[%s7132_s1 + $0x130] sm:$0xff]  ;;  %v718_v18 = vld [vmem:[%s3911_s7 + $0x300] sm:$0xff] }
  0xf4   : > { %1056 = vrot.lane.b32.xlu1 %v711_v23, %s3755_s17  ;;  %1054 = vrot.lane.b32.xlu0 %v710_v56, %s3755_s17  ;;  %v533_v23 = vld [vmem:[%s7132_s1 + $0x138] sm:$0xff]  ;;  %v1300_v3 = vmul.f32 %v4119_v39, %v404_v36  ;;  %v407_v56 = vld [vmem:[%s7131_s0 + $0x148] sm:$0xff] }
  0xf5   : > { %v1549_v19 = vadd.f32 %v1421_v52, %v1293_v54  ;;  %v1548_v10 = vadd.f32 %v1420_v31, %v1292_v13  ;;  %v719_v13 = vld [vmem:[%s3911_s7 + $0x308] sm:$0xff]  ;;  %v406_v38 = vld [vmem:[%s7131_s0 + $0x140] sm:$0xff] }
  0xf6   : > { %v945_v14 = vpop.permute.xlu1 %944  ;;  %v943_v49 = vpop.permute.xlu0 %942  ;;  %v1302_v55 = vmul.f32 %v4129_v41, %v406_v38 }
  0xf7   : > { %1677 = vst [vmem:[%s4256_s28 + $0xf8] sm:$0xff] %v1549_v19  ;;  %v1423_v15 = vmul.f32 %v945_v14, %v527_v61  ;;  %1676 = vst [vmem:[%s4256_s28 + $0xf0] sm:$0xff] %v1548_v10  ;;  %v1422_v33 = vmul.f32 %v943_v49, %v526_v6  ;;  %v721_v19 = vld [vmem:[%s3911_s7 + $0x318] sm:$0xff]  ;;  %v720_v10 = vld [vmem:[%s3911_s7 + $0x310] sm:$0xff] }
  0xf8   : > { %1060 = vrot.lane.b32.xlu1 %v713_v51, %s3755_s17  ;;  %1058 = vrot.lane.b32.xlu0 %v712_v0, %s3755_s17  ;;  %v1303_v51 = vmul.f32 %v4126_v40, %v407_v56  ;;  %v409_v14 = vld [vmem:[%s7131_s0 + $0x158] sm:$0xff]  ;;  %v408_v40 = vld [vmem:[%s7131_s0 + $0x150] sm:$0xff] }
  0xf9   : > { %v1551_v26 = vadd.f32 %v1423_v15, %v1295_v24  ;;  %v1550_v60 = vadd.f32 %v1422_v33, %v1294_v25  ;;  %v535_v24 = vld [vmem:[%s7132_s1 + $0x148] sm:$0xff]  ;;  %v534_v25 = vld [vmem:[%s7132_s1 + $0x140] sm:$0xff]  ;;  %v537_v33 = vld [vmem:[%s7132_s1 + $0x158] sm:$0xff] }
  0xfa   : > { %v949_v27 = vpop.permute.xlu1 %948  ;;  %v947_v4 = vpop.permute.xlu0 %946 }
  0xfb   : > { %1679 = vst [vmem:[%s4256_s28 + $0x108] sm:$0xff] %v1551_v26  ;;  %v1425_v59 = vmul.f32 %v949_v27, %v529_v7  ;;  %1678 = vst [vmem:[%s4256_s28 + $0x100] sm:$0xff] %v1550_v60  ;;  %v1424_v35 = vmul.f32 %v947_v4, %v528_v11  ;;  %v1305_v7 = vmul.f32 %v4136_v42, %v409_v14  ;;  %v536_v26 = vld [vmem:[%s7132_s1 + $0x150] sm:$0xff]  ;;  %v722_v27 = vld [vmem:[%s3911_s7 + $0x320] sm:$0xff] }
  0xfc   : > { %1064 = vrot.lane.b32.xlu1 %v715_v20, %s3755_s17  ;;  %1062 = vrot.lane.b32.xlu0 %v714_v21, %s3755_s17  ;;  %v1304_v11 = vmul.f32 %v4139_v43, %v408_v40  ;;  %v410_v42 = vld [vmem:[%s7131_s0 + $0x160] sm:$0xff]  ;;  %v539_v4 = vld [vmem:[%s7132_s1 + $0x168] sm:$0xff] }
  0xfd   : > { %v1553_v5 = vadd.f32 %v1425_v59, %v1297_v57  ;;  %v1552_v29 = vadd.f32 %v1424_v35, %v1296_v50  ;;  %v723_v57 = vld [vmem:[%s3911_s7 + $0x328] sm:$0xff]  ;;  %v725_v35 = vld [vmem:[%s3911_s7 + $0x338] sm:$0xff] }
  0xfe   : > { %v953_v22 = vpop.permute.xlu1 %952  ;;  %v951_v54 = vpop.permute.xlu0 %950  ;;  %v411_v50 = vld [vmem:[%s7131_s0 + $0x168] sm:$0xff] }
  0xff   : > { %1681 = vst [vmem:[%s4256_s28 + $0x118] sm:$0xff] %v1553_v5  ;;  %v1427_v63 = vmul.f32 %v953_v22, %v531_v58  ;;  %1680 = vst [vmem:[%s4256_s28 + $0x110] sm:$0xff] %v1552_v29  ;;  %v1426_v37 = vmul.f32 %v951_v54, %v530_v8  ;;  %v1307_v59 = vmul.f32 %v4146_v44, %v411_v50  ;;  %v413_v5 = vld [vmem:[%s7131_s0 + $0x178] sm:$0xff]  ;;  %v412_v44 = vld [vmem:[%s7131_s0 + $0x170] sm:$0xff] }
 0x100   : > { %1068 = vrot.lane.b32.xlu1 %v717_v62, %s3755_s17  ;;  %1066 = vrot.lane.b32.xlu0 %v716_v12, %s3755_s17  ;;  %v1306_v62 = vmul.f32 %v4149_v45, %v410_v42  ;;  %v541_v29 = vld [vmem:[%s7132_s1 + $0x178] sm:$0xff]  ;;  %v1309_v36 = vmul.f32 %v4156_v46, %v413_v5  ;;  %v727_v54 = vld [vmem:[%s3911_s7 + $0x348] sm:$0xff] }
 0x101   : > { %v1555_v9 = vadd.f32 %v1427_v63, %v1299_v16  ;;  %v1554_v52 = vadd.f32 %v1426_v37, %v1298_v28  ;;  %v538_v16 = vld [vmem:[%s7132_s1 + $0x160] sm:$0xff]  ;;  %v724_v28 = vld [vmem:[%s3911_s7 + $0x330] sm:$0xff]  ;;  %v731_v40 = vld [vmem:[%s3911_s7 + $0x368] sm:$0xff] }
 0x102   : > { %v957_v30 = vpop.permute.xlu1 %956  ;;  %v955_v31 = vpop.permute.xlu0 %954  ;;  %v540_v37 = vld [vmem:[%s7132_s1 + $0x170] sm:$0xff]  ;;  %v414_v46 = vld [vmem:[%s7131_s0 + $0x180] sm:$0xff]  ;;  %v7183_v42 = vld [vmem:[#allocation19_spill] sm:$0xff] }
 0x103   : > { %1683 = vst [vmem:[%s4256_s28 + $0x128] sm:$0xff] %v1555_v9  ;;  %v1429_v61 = vmul.f32 %v957_v30, %v533_v23  ;;  %1682 = vst [vmem:[%s4256_s28 + $0x120] sm:$0xff] %v1554_v52  ;;  %v1428_v39 = vmul.f32 %v955_v31, %v532_v53  ;;  %v1308_v23 = vmul.f32 %v4159_v47, %v412_v44  ;;  %v726_v9 = vld [vmem:[%s3911_s7 + $0x340] sm:$0xff]  ;;  %v543_v30 = vld [vmem:[%s7132_s1 + $0x188] sm:$0xff] }
 0x104   : > { %1072 = vrot.lane.b32.xlu1 %v719_v13, %s3755_s17  ;;  %1070 = vrot.lane.b32.xlu0 %v718_v18, %s3755_s17  ;;  %v729_v52 = vld [vmem:[%s3911_s7 + $0x358] sm:$0xff]  ;;  %v542_v31 = vld [vmem:[%s7132_s1 + $0x180] sm:$0xff] }
 0x105   : > { %v1557_v6 = vadd.f32 %v1429_v61, %v1301_v2  ;;  %v1556_v32 = vadd.f32 %v1428_v39, %v1300_v3  ;;  %v415_v2 = vld [vmem:[%s7131_s0 + $0x188] sm:$0xff]  ;;  %v7180_v61 = vld [vmem:[#allocation16_spill] sm:$0xff] }
 0x106   : > { %v961_v0 = vpop.permute.xlu1 %960  ;;  %v959_v49 = vpop.permute.xlu0 %958  ;;  %v1311_v18 = vmul.f32 %v4166_v48, %v415_v2  ;;  %v1310_v39 = vmul.f32 %v7180_v61, %v414_v46  ;;  %v416_v48 = vld [vmem:[%s7131_s0 + $0x190] sm:$0xff]  ;;  %v7188_v61 = vld [vmem:[#allocation24_spill] sm:$0xff] }
 0x107   : > { %1685 = vst [vmem:[%s4256_s28 + $0x138] sm:$0xff] %v1557_v6  ;;  %v1431_v15 = vmul.f32 %v961_v0, %v535_v24  ;;  %1684 = vst [vmem:[%s4256_s28 + $0x130] sm:$0xff] %v1556_v32  ;;  %v1430_v41 = vmul.f32 %v959_v49, %v534_v25  ;;  %v417_v24 = vld [vmem:[%s7131_s0 + $0x198] sm:$0xff] }
 0x108   : > { %1076 = vrot.lane.b32.xlu1 %v721_v19, %s3755_s17  ;;  %1074 = vrot.lane.b32.xlu0 %v720_v10, %s3755_s17  ;;  %v728_v19 = vld [vmem:[%s3911_s7 + $0x350] sm:$0xff]  ;;  %v545_v0 = vld [vmem:[%s7132_s1 + $0x198] sm:$0xff]  ;;  %v7181_v10 = vld [vmem:[#allocation17_spill] sm:$0xff] }
 0x109   : > { %v1559_v20 = vadd.f32 %v1431_v15, %v1303_v51  ;;  %v1558_v21 = vadd.f32 %v1430_v41, %v1302_v55  ;;  %v1313_v32 = vmul.f32 %v7181_v10, %v417_v24  ;;  %v544_v15 = vld [vmem:[%s7132_s1 + $0x190] sm:$0xff]  ;;  %v425_v24 = vld [vmem:[%s7131_s0 + $0x1d8] sm:$0xff] }
 0x10a   : > { %v965_v1 = vpop.permute.xlu1 %964  ;;  %v963_v60 = vpop.permute.xlu0 %962  ;;  %v7182_v41 = vld [vmem:[#allocation18_spill] sm:$0xff]  ;;  %v3249_v10 = vld [vmem:[%s3911_s7 + $0x1d8] sm:$0xff] }
 0x10b   : > { %1687 = vst [vmem:[%s4256_s28 + $0x148] sm:$0xff] %v1559_v20  ;;  %v1433_v34 = vmul.f32 %v965_v1, %v537_v33  ;;  %1686 = vst [vmem:[%s4256_s28 + $0x140] sm:$0xff] %v1558_v21  ;;  %v1432_v43 = vmul.f32 %v963_v60, %v536_v26  ;;  %v1312_v33 = vmul.f32 %v7182_v41, %v416_v48  ;;  %v730_v20 = vld [vmem:[%s3911_s7 + $0x360] sm:$0xff]  ;;  %v547_v21 = vld [vmem:[%s7132_s1 + $0x1a8] sm:$0xff] }
 0x10c   : > { %1080 = vrot.lane.b32.xlu1 %v723_v57, %s3755_s17  ;;  %1078 = vrot.lane.b32.xlu0 %v722_v27, %s3755_s17  ;;  %v424_v48 = vld [vmem:[%s7131_s0 + $0x1d0] sm:$0xff] }
 0x10d   : > { %v1561_v58 = vadd.f32 %v1433_v34, %v1305_v7  ;;  %v1560_v17 = vadd.f32 %v1432_v43, %v1304_v11  ;;  %v419_v7 = vld [vmem:[%s7131_s0 + $0x1a8] sm:$0xff]  ;;  %v418_v11 = vld [vmem:[%s7131_s0 + $0x1a0] sm:$0xff]  ;;  %v733_v34 = vld [vmem:[%s3911_s7 + $0x378] sm:$0xff] }
 0x10e   : > { %v969_v8 = vpop.permute.xlu1 %968  ;;  %v967_v22 = vpop.permute.xlu0 %966  ;;  %v1315_v60 = vmul.f32 %v7183_v42, %v419_v7  ;;  %v3250_v41 = vld [vmem:[%s3911_s7 + $0x1d0] sm:$0xff]  ;;  %v427_v7 = vld [vmem:[%s7131_s0 + $0x1e8] sm:$0xff] }
 0x10f   : > { %1689 = vst [vmem:[%s4256_s28 + $0x158] sm:$0xff] %v1561_v58  ;;  %v1435_v12 = vmul.f32 %v969_v8, %v539_v4  ;;  %1688 = vst [vmem:[%s4256_s28 + $0x150] sm:$0xff] %v1560_v17  ;;  %v1434_v45 = vmul.f32 %v967_v22, %v538_v16  ;;  %v546_v4 = vld [vmem:[%s7132_s1 + $0x1a0] sm:$0xff]  ;;  %v421_v58 = vld [vmem:[%s7131_s0 + $0x1b8] sm:$0xff] }
 0x110   : > { %1084 = vrot.lane.b32.xlu1 %v725_v35, %s3755_s17  ;;  %1082 = vrot.lane.b32.xlu0 %v724_v28, %s3755_s17  ;;  %v420_v8 = vld [vmem:[%s7131_s0 + $0x1b0] sm:$0xff]  ;;  %v549_v22 = vld [vmem:[%s7132_s1 + $0x1b8] sm:$0xff] }
 0x111   : > { %v1563_v63 = vadd.f32 %v1435_v12, %v1307_v59  ;;  %v1562_v53 = vadd.f32 %v1434_v45, %v1306_v62  ;;  %v7184_v59 = vld [vmem:[#allocation20_spill] sm:$0xff]  ;;  %v732_v62 = vld [vmem:[%s3911_s7 + $0x370] sm:$0xff]  ;;  %v7185_v12 = vld [vmem:[#allocation21_spill] sm:$0xff] }
 0x112   : > { %v973_v13 = vpop.permute.xlu1 %972  ;;  %v971_v3 = vpop.permute.xlu0 %970  ;;  %v1314_v35 = vmul.f32 %v7184_v59, %v418_v11  ;;  %v1317_v45 = vmul.f32 %v7185_v12, %v421_v58  ;;  %v426_v11 = vld [vmem:[%s7131_s0 + $0x1e0] sm:$0xff]  ;;  %v3251_v42 = vld [vmem:[%s3911_s7 + $0x1e8] sm:$0xff]  ;;  %v429_v58 = vld [vmem:[%s7131_s0 + $0x1f8] sm:$0xff] }
 0x113   : > { %1691 = vst [vmem:[%s4256_s28 + $0x168] sm:$0xff] %v1563_v63  ;;  %v1437_v56 = vmul.f32 %v973_v13, %v541_v29  ;;  %1690 = vst [vmem:[%s4256_s28 + $0x160] sm:$0xff] %v1562_v53  ;;  %v1436_v47 = vmul.f32 %v971_v3, %v540_v37  ;;  %v735_v29 = vld [vmem:[%s3911_s7 + $0x388] sm:$0xff]  ;;  %v7186_v63 = vld [vmem:[#allocation22_spill] sm:$0xff] }
 0x114   : > { %1088 = vrot.lane.b32.xlu1 %v727_v54, %s3755_s17  ;;  %1086 = vrot.lane.b32.xlu0 %v726_v9, %s3755_s17  ;;  %v548_v54 = vld [vmem:[%s7132_s1 + $0x1b0] sm:$0xff]  ;;  %v1316_v37 = vmul.f32 %v7186_v63, %v420_v8  ;;  %v734_v13 = vld [vmem:[%s3911_s7 + $0x380] sm:$0xff] }
 0x115   : > { %v1565_v38 = vadd.f32 %v1437_v56, %v1309_v36  ;;  %v1564_v6 = vadd.f32 %v1436_v47, %v1308_v23  ;;  %v423_v23 = vld [vmem:[%s7131_s0 + $0x1c8] sm:$0xff]  ;;  %v422_v53 = vld [vmem:[%s7131_s0 + $0x1c0] sm:$0xff]  ;;  %v428_v8 = vld [vmem:[%s7131_s0 + $0x1f0] sm:$0xff] }
 0x116   : > { %v977_v51 = vpop.permute.xlu1 %976  ;;  %v975_v25 = vpop.permute.xlu0 %974  ;;  %v551_v47 = vld [vmem:[%s7132_s1 + $0x1c8] sm:$0xff]  ;;  %v3252_v59 = vld [vmem:[%s3911_s7 + $0x1e0] sm:$0xff]  ;;  %v3253_v12 = vld [vmem:[%s3911_s7 + $0x1f8] sm:$0xff] }
 0x117   : > { %1693 = vst [vmem:[%s4256_s28 + $0x178] sm:$0xff] %v1565_v38  ;;  %v1439_v55 = vmul.f32 %v977_v51, %v543_v30  ;;  %1692 = vst [vmem:[%s4256_s28 + $0x170] sm:$0xff] %v1564_v6  ;;  %v1438_v14 = vmul.f32 %v975_v25, %v542_v31  ;;  %v7187_v30 = vld [vmem:[#allocation23_spill] sm:$0xff]  ;;  %v550_v31 = vld [vmem:[%s7132_s1 + $0x1c0] sm:$0xff] }
 0x118   : > { %1092 = vrot.lane.b32.xlu1 %v729_v52, %s3755_s17  ;;  %1090 = vrot.lane.b32.xlu0 %v728_v19, %s3755_s17  ;;  %v737_v52 = vld [vmem:[%s3911_s7 + $0x398] sm:$0xff]  ;;  %v736_v19 = vld [vmem:[%s3911_s7 + $0x390] sm:$0xff] }
 0x119   : > { %v1567_v49 = vadd.f32 %v1439_v55, %v1311_v18  ;;  %v1566_v26 = vadd.f32 %v1438_v14, %v1310_v39  ;;  %v1319_v18 = vmul.f32 %v7187_v30, %v423_v23  ;;  %v1318_v39 = vmul.f32 %v7188_v61, %v422_v53  ;;  %v3254_v63 = vld [vmem:[%s3911_s7 + $0x1f0] sm:$0xff]  ;;  %v431_v23 = vld [vmem:[%s7131_s0 + $0x208] sm:$0xff]  ;;  %v430_v53 = vld [vmem:[%s7131_s0 + $0x200] sm:$0xff] }
 0x11a   : > { %v981_v57 = vpop.permute.xlu1 %980  ;;  %v979_v50 = vpop.permute.xlu0 %978  ;;  %v3255_v30 = vld [vmem:[%s3911_s7 + $0x208] sm:$0xff]  ;;  %v3256_v61 = vld [vmem:[%s3911_s7 + $0x200] sm:$0xff] }
 0x11b   : > { %1695 = vst [vmem:[%s4256_s28 + $0x188] sm:$0xff] %v1567_v49  ;;  %v1441_v1 = vmul.f32 %v981_v57, %v545_v0  ;;  %1694 = vst [vmem:[%s4256_s28 + $0x180] sm:$0xff] %v1566_v26  ;;  %v1440_v27 = vmul.f32 %v979_v50, %v544_v15  ;;  %v553_v0 = vld [vmem:[%s7132_s1 + $0x1d8] sm:$0xff]  ;;  %v552_v15 = vld [vmem:[%s7132_s1 + $0x1d0] sm:$0xff] }
 0x11c   : > { %1096 = vrot.lane.b32.xlu1 %v731_v40, %s3755_s17  ;;  %1094 = vrot.lane.b32.xlu0 %v730_v20, %s3755_s17  ;;  %v739_v40 = vld [vmem:[%s3911_s7 + $0x3a8] sm:$0xff]  ;;  %v738_v20 = vld [vmem:[%s3911_s7 + $0x3a0] sm:$0xff] }
 0x11d   : > { %v1569_v43 = vadd.f32 %v1441_v1, %v1313_v32  ;;  %v1568_v5 = vadd.f32 %v1440_v27, %v1312_v33  ;;  %v1321_v32 = vmul.f32 %v3249_v10, %v425_v24  ;;  %v1320_v33 = vmul.f32 %v3250_v41, %v424_v48  ;;  %v433_v24 = vld [vmem:[%s7131_s0 + $0x218] sm:$0xff]  ;;  %v432_v48 = vld [vmem:[%s7131_s0 + $0x210] sm:$0xff] }
 0x11e   : > { %v985_v16 = vpop.permute.xlu1 %984  ;;  %v983_v28 = vpop.permute.xlu0 %982  ;;  %v3257_v10 = vld [vmem:[%s3911_s7 + $0x218] sm:$0xff]  ;;  %v3258_v41 = vld [vmem:[%s3911_s7 + $0x210] sm:$0xff] }
 0x11f   : > { %1697 = vst [vmem:[%s4256_s28 + $0x198] sm:$0xff] %v1569_v43  ;;  %v1443_v17 = vmul.f32 %v985_v16, %v547_v21  ;;  %1696 = vst [vmem:[%s4256_s28 + $0x190] sm:$0xff] %v1568_v5  ;;  %v1442_v44 = vmul.f32 %v983_v28, %v546_v4  ;;  %v555_v21 = vld [vmem:[%s7132_s1 + $0x1e8] sm:$0xff]  ;;  %v554_v4 = vld [vmem:[%s7132_s1 + $0x1e0] sm:$0xff] }
 0x120   : > { %1100 = vrot.lane.b32.xlu1 %v733_v34, %s3755_s17  ;;  %1098 = vrot.lane.b32.xlu0 %v732_v62, %s3755_s17  ;;  %v741_v34 = vld [vmem:[%s3911_s7 + $0x3b8] sm:$0xff]  ;;  %v740_v62 = vld [vmem:[%s3911_s7 + $0x3b0] sm:$0xff] }
 0x121   : > { %v1571_v36 = vadd.f32 %v1443_v17, %v1315_v60  ;;  %v1570_v9 = vadd.f32 %v1442_v44, %v1314_v35  ;;  %v1323_v60 = vmul.f32 %v3251_v42, %v427_v7  ;;  %v1322_v35 = vmul.f32 %v3252_v59, %v426_v11  ;;  %v435_v7 = vld [vmem:[%s7131_s0 + $0x228] sm:$0xff]  ;;  %v434_v11 = vld [vmem:[%s7131_s0 + $0x220] sm:$0xff] }
 0x122   : > { %v989_v2 = vpop.permute.xlu1 %988  ;;  %v987_v46 = vpop.permute.xlu0 %986  ;;  %v3259_v42 = vld [vmem:[%s3911_s7 + $0x228] sm:$0xff]  ;;  %v3260_v59 = vld [vmem:[%s3911_s7 + $0x220] sm:$0xff] }
 0x123   : > { %1699 = vst [vmem:[%s4256_s28 + $0x1a8] sm:$0xff] %v1571_v36  ;;  %v1445_v3 = vmul.f32 %v989_v2, %v549_v22  ;;  %1698 = vst [vmem:[%s4256_s28 + $0x1a0] sm:$0xff] %v1570_v9  ;;  %v1444_v56 = vmul.f32 %v987_v46, %v548_v54  ;;  %v557_v22 = vld [vmem:[%s7132_s1 + $0x1f8] sm:$0xff]  ;;  %v556_v54 = vld [vmem:[%s7132_s1 + $0x1f0] sm:$0xff] }
 0x124   : > { %1104 = vrot.lane.b32.xlu1 %v735_v29, %s3755_s17  ;;  %1102 = vrot.lane.b32.xlu0 %v734_v13, %s3755_s17  ;;  %v743_v29 = vld [vmem:[%s3911_s7 + $0x3c8] sm:$0xff]  ;;  %v742_v13 = vld [vmem:[%s3911_s7 + $0x3c0] sm:$0xff] }
 0x125   : > { %v1573_v38 = vadd.f32 %v1445_v3, %v1317_v45  ;;  %v1572_v6 = vadd.f32 %v1444_v56, %v1316_v37  ;;  %v1325_v45 = vmul.f32 %v3253_v12, %v429_v58  ;;  %v1324_v37 = vmul.f32 %v3254_v63, %v428_v8  ;;  %v437_v58 = vld [vmem:[%s7131_s0 + $0x238] sm:$0xff]  ;;  %v436_v8 = vld [vmem:[%s7131_s0 + $0x230] sm:$0xff]  ;;  %v1774_v63 = vld [vmem:[%s3919_s26] sm:$0xff] }
 0x126   : > { %v993_v51 = vpop.permute.xlu1 %992  ;;  %v991_v25 = vpop.permute.xlu0 %990  ;;  %v3261_v12 = vld [vmem:[%s3911_s7 + $0x238] sm:$0xff] }
 0x127   : > { %1701 = vst [vmem:[%s4256_s28 + $0x1b8] sm:$0xff] %v1573_v38  ;;  %v1447_v55 = vmul.f32 %v993_v51, %v551_v47  ;;  %1700 = vst [vmem:[%s4256_s28 + $0x1b0] sm:$0xff] %v1572_v6  ;;  %v1446_v14 = vmul.f32 %v991_v25, %v550_v31  ;;  %v559_v47 = vld [vmem:[%s7132_s1 + $0x208] sm:$0xff]  ;;  %v558_v31 = vld [vmem:[%s7132_s1 + $0x200] sm:$0xff] }
 0x128   : > { %1108 = vrot.lane.b32.xlu1 %v737_v52, %s3755_s17  ;;  %1106 = vrot.lane.b32.xlu0 %v736_v19, %s3755_s17  ;;  %v745_v52 = vld [vmem:[%s3911_s7 + $0x3d8] sm:$0xff]  ;;  %v744_v19 = vld [vmem:[%s3911_s7 + $0x3d0] sm:$0xff] }
 0x129   : > { %v1575_v49 = vadd.f32 %v1447_v55, %v1319_v18  ;;  %v1574_v26 = vadd.f32 %v1446_v14, %v1318_v39  ;;  %v1327_v18 = vmul.f32 %v3255_v30, %v431_v23  ;;  %v1326_v39 = vmul.f32 %v3256_v61, %v430_v53  ;;  %v438_v53 = vld [vmem:[%s7131_s0 + $0x240] sm:$0xff]  ;;  %v3263_v30 = vld [vmem:[%s3911_s7 + $0x248] sm:$0xff]  ;;  %v1776_v61 = vld [vmem:[%s3919_s26 + $0x10] sm:$0xff] }
 0x12a   : > { %v997_v57 = vpop.permute.xlu1 %996  ;;  %v995_v50 = vpop.permute.xlu0 %994 }
 0x12b   : > { %1703 = vst [vmem:[%s4256_s28 + $0x1c8] sm:$0xff] %v1575_v49  ;;  %v1449_v1 = vmul.f32 %v997_v57, %v553_v0  ;;  %1702 = vst [vmem:[%s4256_s28 + $0x1c0] sm:$0xff] %v1574_v26  ;;  %v1448_v27 = vmul.f32 %v995_v50, %v552_v15  ;;  %v561_v0 = vld [vmem:[%s7132_s1 + $0x218] sm:$0xff]  ;;  %v560_v15 = vld [vmem:[%s7132_s1 + $0x210] sm:$0xff] }
 0x12c   : > { %1112 = vrot.lane.b32.xlu1 %v739_v40, %s3755_s17  ;;  %1110 = vrot.lane.b32.xlu0 %v738_v20, %s3755_s17  ;;  %v747_v40 = vld [vmem:[%s3911_s7 + $0x3e8] sm:$0xff]  ;;  %v746_v20 = vld [vmem:[%s3911_s7 + $0x3e0] sm:$0xff] }
 0x12d   : > { %v1577_v43 = vadd.f32 %v1449_v1, %v1321_v32  ;;  %v1576_v5 = vadd.f32 %v1448_v27, %v1320_v33  ;;  %v1329_v32 = vmul.f32 %v3257_v10, %v433_v24  ;;  %v1328_v33 = vmul.f32 %v3258_v41, %v432_v48  ;;  %v440_v48 = vld [vmem:[%s7131_s0 + $0x250] sm:$0xff]  ;;  %v3265_v10 = vld [vmem:[%s3911_s7 + $0x258] sm:$0xff] }
 0x12e   : > { %v1001_v16 = vpop.permute.xlu1 %1000  ;;  %v999_v28 = vpop.permute.xlu0 %998  ;;  %v3266_v41 = vld [vmem:[%s3911_s7 + $0x250] sm:$0xff] }
 0x12f   : > { %1705 = vst [vmem:[%s4256_s28 + $0x1d8] sm:$0xff] %v1577_v43  ;;  %v1451_v17 = vmul.f32 %v1001_v16, %v555_v21  ;;  %1704 = vst [vmem:[%s4256_s28 + $0x1d0] sm:$0xff] %v1576_v5  ;;  %v1450_v44 = vmul.f32 %v999_v28, %v554_v4  ;;  %v563_v21 = vld [vmem:[%s7132_s1 + $0x228] sm:$0xff]  ;;  %v562_v4 = vld [vmem:[%s7132_s1 + $0x220] sm:$0xff] }
 0x130   : > { %1116 = vrot.lane.b32.xlu1 %v741_v34, %s3755_s17  ;;  %1114 = vrot.lane.b32.xlu0 %v740_v62, %s3755_s17  ;;  %v749_v34 = vld [vmem:[%s3911_s7 + $0x3f8] sm:$0xff]  ;;  %v748_v62 = vld [vmem:[%s3911_s7 + $0x3f0] sm:$0xff] }
 0x131   : > { %v1579_v36 = vadd.f32 %v1451_v17, %v1323_v60  ;;  %v1578_v9 = vadd.f32 %v1450_v44, %v1322_v35  ;;  %v1331_v60 = vmul.f32 %v3259_v42, %v435_v7  ;;  %v1330_v35 = vmul.f32 %v3260_v59, %v434_v11  ;;  %v443_v7 = vld [vmem:[%s7131_s0 + $0x268] sm:$0xff]  ;;  %v442_v11 = vld [vmem:[%s7131_s0 + $0x260] sm:$0xff] }
 0x132   : > { %v1005_v2 = vpop.permute.xlu1 %1004  ;;  %v1003_v46 = vpop.permute.xlu0 %1002  ;;  %v3267_v42 = vld [vmem:[%s3911_s7 + $0x268] sm:$0xff]  ;;  %v3268_v59 = vld [vmem:[%s3911_s7 + $0x260] sm:$0xff] }
 0x133   : > { %1707 = vst [vmem:[%s4256_s28 + $0x1e8] sm:$0xff] %v1579_v36  ;;  %v1453_v3 = vmul.f32 %v1005_v2, %v557_v22  ;;  %1706 = vst [vmem:[%s4256_s28 + $0x1e0] sm:$0xff] %v1578_v9  ;;  %v1452_v56 = vmul.f32 %v1003_v46, %v556_v54  ;;  %v565_v22 = vld [vmem:[%s7132_s1 + $0x238] sm:$0xff]  ;;  %v564_v54 = vld [vmem:[%s7132_s1 + $0x230] sm:$0xff] }
 0x134   : > { %1120 = vrot.lane.b32.xlu1 %v743_v29, %s3755_s17  ;;  %1118 = vrot.lane.b32.xlu0 %v742_v13, %s3755_s17  ;;  %v1775_v29 = vld [vmem:[%s3919_s26 + $0x8] sm:$0xff] }
 0x135   : > { %v1581_v38 = vadd.f32 %v1453_v3, %v1325_v45  ;;  %v1580_v6 = vadd.f32 %v1452_v56, %v1324_v37  ;;  %v1333_v45 = vmul.f32 %v3261_v12, %v437_v58  ;;  %v3262_v37 = vld [vmem:[%s3911_s7 + $0x230] sm:$0xff]  ;;  %v439_v2 = vld [vmem:[%s7131_s0 + $0x248] sm:$0xff]  ;;  %v445_v58 = vld [vmem:[%s7131_s0 + $0x278] sm:$0xff] }
 0x136   : > { %v1009_v51 = vpop.permute.xlu1 %1008  ;;  %v1007_v25 = vpop.permute.xlu0 %1006  ;;  %v1332_v23 = vmul.f32 %v3262_v37, %v436_v8  ;;  %v444_v8 = vld [vmem:[%s7131_s0 + $0x270] sm:$0xff]  ;;  %v3269_v12 = vld [vmem:[%s3911_s7 + $0x278] sm:$0xff] }
 0x137   : > { %1709 = vst [vmem:[%s4256_s28 + $0x1f8] sm:$0xff] %v1581_v38  ;;  %v1455_v55 = vmul.f32 %v1009_v51, %v559_v47  ;;  %1708 = vst [vmem:[%s4256_s28 + $0x1f0] sm:$0xff] %v1580_v6  ;;  %v1454_v14 = vmul.f32 %v1007_v25, %v558_v31  ;;  %v567_v47 = vld [vmem:[%s7132_s1 + $0x248] sm:$0xff]  ;;  %v566_v31 = vld [vmem:[%s7132_s1 + $0x240] sm:$0xff] }
 0x138   : > { %1124 = vrot.lane.b32.xlu1 %v745_v52, %s3755_s17  ;;  %1122 = vrot.lane.b32.xlu0 %v744_v19, %s3755_s17  ;;  %v1777_v52 = vld [vmem:[%s3919_s26 + $0x18] sm:$0xff] }
 0x139   : > { %v1583_v49 = vadd.f32 %v1455_v55, %v1327_v18  ;;  %v1582_v26 = vadd.f32 %v1454_v14, %v1326_v39  ;;  %v1335_v18 = vmul.f32 %v3263_v30, %v439_v2  ;;  %v3264_v39 = vld [vmem:[%s3911_s7 + $0x240] sm:$0xff]  ;;  %v441_v51 = vld [vmem:[%s7131_s0 + $0x258] sm:$0xff]  ;;  %v3271_v30 = vld [vmem:[%s3911_s7 + $0x288] sm:$0xff] }
 0x13a   : > { %v1013_v57 = vpop.permute.xlu1 %1012  ;;  %v1011_v50 = vpop.permute.xlu0 %1010  ;;  %v1334_v24 = vmul.f32 %v3264_v39, %v438_v53  ;;  %v446_v53 = vld [vmem:[%s7131_s0 + $0x280] sm:$0xff] }
 0x13b   : > { %1711 = vst [vmem:[%s4256_s28 + $0x208] sm:$0xff] %v1583_v49  ;;  %v1457_v1 = vmul.f32 %v1013_v57, %v561_v0  ;;  %1710 = vst [vmem:[%s4256_s28 + $0x200] sm:$0xff] %v1582_v26  ;;  %v1456_v27 = vmul.f32 %v1011_v50, %v560_v15  ;;  %v569_v0 = vld [vmem:[%s7132_s1 + $0x258] sm:$0xff]  ;;  %v568_v15 = vld [vmem:[%s7132_s1 + $0x250] sm:$0xff] }
 0x13c   : > { %1128 = vrot.lane.b32.xlu1 %v747_v40, %s3755_s17  ;;  %1126 = vrot.lane.b32.xlu0 %v746_v20, %s3755_s17  ;;  %v4967_v40 = vld [vmem:[%s3919_s26 + $0x28] sm:$0xff]  ;;  %v4977_v20 = vld [vmem:[%s3919_s26 + $0x20] sm:$0xff] }
 0x13d   : > { %v1585_v43 = vadd.f32 %v1457_v1, %v1329_v32  ;;  %v1584_v5 = vadd.f32 %v1456_v27, %v1328_v33  ;;  %v1337_v32 = vmul.f32 %v3265_v10, %v441_v51  ;;  %v1336_v33 = vmul.f32 %v3266_v41, %v440_v48  ;;  %v448_v48 = vld [vmem:[%s7131_s0 + $0x290] sm:$0xff]  ;;  %v3273_v10 = vld [vmem:[%s3911_s7 + $0x298] sm:$0xff] }
 0x13e   : > { %v1017_v16 = vpop.permute.xlu1 %1016  ;;  %v1015_v28 = vpop.permute.xlu0 %1014  ;;  %v576_v41 = vld [vmem:[%s7132_s1 + $0x290] sm:$0xff] }
 0x13f   : > { %1713 = vst [vmem:[%s4256_s28 + $0x218] sm:$0xff] %v1585_v43  ;;  %v1459_v17 = vmul.f32 %v1017_v16, %v563_v21  ;;  %1712 = vst [vmem:[%s4256_s28 + $0x210] sm:$0xff] %v1584_v5  ;;  %v1458_v44 = vmul.f32 %v1015_v28, %v562_v4  ;;  %v571_v21 = vld [vmem:[%s7132_s1 + $0x268] sm:$0xff]  ;;  %v570_v4 = vld [vmem:[%s7132_s1 + $0x260] sm:$0xff] }
 0x140   : > { %1132 = vrot.lane.b32.xlu1 %v749_v34, %s3755_s17  ;;  %1130 = vrot.lane.b32.xlu0 %v748_v62, %s3755_s17  ;;  %v4993_v34 = vld [vmem:[%s3919_s26 + $0x38] sm:$0xff]  ;;  %v5003_v62 = vld [vmem:[%s3919_s26 + $0x30] sm:$0xff] }
 0x141   : > { %v1587_v36 = vadd.f32 %v1459_v17, %v1331_v60  ;;  %v1586_v9 = vadd.f32 %v1458_v44, %v1330_v35  ;;  %v1339_v60 = vmul.f32 %v3267_v42, %v443_v7  ;;  %v1338_v35 = vmul.f32 %v3268_v59, %v442_v11  ;;  %v5081_v11 = vld [vmem:[%s3919_s26 + $0x60] sm:$0xff]  ;;  %v5097_v59 = vld [vmem:[%s3919_s26 + $0x78] sm:$0xff] }
 0x142   : > { %v1021_v13 = vpop.permute.xlu1 %1020  ;;  %v1019_v46 = vpop.permute.xlu0 %1018 }
 0x143   : > { %1715 = vst [vmem:[%s4256_s28 + $0x228] sm:$0xff] %v1587_v36  ;;  %v1461_v3 = vmul.f32 %v1021_v13, %v565_v22  ;;  %1714 = vst [vmem:[%s4256_s28 + $0x220] sm:$0xff] %v1586_v9  ;;  %v1460_v56 = vmul.f32 %v1019_v46, %v564_v54  ;;  %v573_v22 = vld [vmem:[%s7132_s1 + $0x278] sm:$0xff]  ;;  %v572_v54 = vld [vmem:[%s7132_s1 + $0x270] sm:$0xff] }
 0x144   : > { %2032 = vrot.lane.b32.xlu1 %v1775_v29, %s3755_s17  ;;  %2030 = vrot.lane.b32.xlu0 %v1774_v63, %s3755_s17  ;;  %v5019_v29 = vld [vmem:[%s3919_s26 + $0x48] sm:$0xff]  ;;  %v3270_v63 = vld [vmem:[%s3911_s7 + $0x270] sm:$0xff] }
 0x145   : > { %v1589_v38 = vadd.f32 %v1461_v3, %v1333_v45  ;;  %v1588_v6 = vadd.f32 %v1460_v56, %v1332_v23  ;;  %v1341_v45 = vmul.f32 %v3269_v12, %v445_v58  ;;  %v1340_v37 = vmul.f32 %v3270_v63, %v444_v8  ;;  %v447_v23 = vld [vmem:[%s7131_s0 + $0x288] sm:$0xff]  ;;  %v5029_v13 = vld [vmem:[%s3919_s26 + $0x40] sm:$0xff]  ;;  %v453_v8 = vld [vmem:[%s7131_s0 + $0x2b8] sm:$0xff] }
 0x146   : > { %v1025_v19 = vpop.permute.xlu1 %1024  ;;  %v1023_v25 = vpop.permute.xlu0 %1022  ;;  %v578_v58 = vld [vmem:[%s7132_s1 + $0x2a0] sm:$0xff]  ;;  %v3277_v63 = vld [vmem:[%s3911_s7 + $0x2b8] sm:$0xff] }
 0x147   : > { %1717 = vst [vmem:[%s4256_s28 + $0x238] sm:$0xff] %v1589_v38  ;;  %v1463_v55 = vmul.f32 %v1025_v19, %v567_v47  ;;  %1716 = vst [vmem:[%s4256_s28 + $0x230] sm:$0xff] %v1588_v6  ;;  %v1462_v14 = vmul.f32 %v1023_v25, %v566_v31  ;;  %v575_v47 = vld [vmem:[%s7132_s1 + $0x288] sm:$0xff]  ;;  %v574_v31 = vld [vmem:[%s7132_s1 + $0x280] sm:$0xff] }
 0x148   : > { %2036 = vrot.lane.b32.xlu1 %v1777_v52, %s3755_s17  ;;  %2034 = vrot.lane.b32.xlu0 %v1776_v61, %s3755_s17  ;;  %v5045_v52 = vld [vmem:[%s3919_s26 + $0x58] sm:$0xff]  ;;  %v3272_v61 = vld [vmem:[%s3911_s7 + $0x280] sm:$0xff] }
 0x149   : > { %v1591_v49 = vadd.f32 %v1463_v55, %v1335_v18  ;;  %v1590_v26 = vadd.f32 %v1462_v14, %v1334_v24  ;;  %v1343_v18 = vmul.f32 %v3271_v30, %v447_v23  ;;  %v1342_v39 = vmul.f32 %v3272_v61, %v446_v53  ;;  %v449_v24 = vld [vmem:[%s7131_s0 + $0x298] sm:$0xff]  ;;  %v5055_v19 = vld [vmem:[%s3919_s26 + $0x50] sm:$0xff]  ;;  %v5123_v23 = vld [vmem:[%s3919_s26 + $0x88] sm:$0xff] }
 0x14a   : > { %v1029_v57 = vpop.permute.xlu1 %1028  ;;  %v1027_v50 = vpop.permute.xlu0 %1026  ;;  %v3278_v53 = vld [vmem:[%s3911_s7 + $0x2b0] sm:$0xff] }
 0x14b   : > { %1719 = vst [vmem:[%s4256_s28 + $0x248] sm:$0xff] %v1591_v49  ;;  %v1465_v1 = vmul.f32 %v1029_v57, %v569_v0  ;;  %1718 = vst [vmem:[%s4256_s28 + $0x240] sm:$0xff] %v1590_v26  ;;  %v1464_v27 = vmul.f32 %v1027_v50, %v568_v15  ;;  %v577_v0 = vld [vmem:[%s7132_s1 + $0x298] sm:$0xff]  ;;  %v5071_v49 = vld [vmem:[%s3919_s26 + $0x68] sm:$0xff] }
 0x14c   : > { %2040 = vrot.lane.b32.xlu1 %v4967_v40, %s3755_s17  ;;  %2038 = vrot.lane.b32.xlu0 %v4977_v20, %s3755_s17  ;;  %v451_v57 = vld [vmem:[%s7131_s0 + $0x2a8] sm:$0xff] }
 0x14d   : > { %v1593_v43 = vadd.f32 %v1465_v1, %v1337_v32  ;;  %v1592_v5 = vadd.f32 %v1464_v27, %v1336_v33  ;;  %v1345_v32 = vmul.f32 %v3273_v10, %v449_v24  ;;  %v3274_v33 = vld [vmem:[%s3911_s7 + $0x290] sm:$0xff]  ;;  %v450_v1 = vld [vmem:[%s7131_s0 + $0x2a0] sm:$0xff]  ;;  %v3279_v24 = vld [vmem:[%s3911_s7 + $0x2c8] sm:$0xff] }
 0x14e   : > { %v1033_v16 = vpop.permute.xlu1 %1032  ;;  %v1031_v28 = vpop.permute.xlu0 %1030  ;;  %v1344_v7 = vmul.f32 %v3274_v33, %v448_v48 }
 0x14f   : > { %1721 = vst [vmem:[%s4256_s28 + $0x258] sm:$0xff] %v1593_v43  ;;  %v1467_v17 = vmul.f32 %v1033_v16, %v571_v21  ;;  %1720 = vst [vmem:[%s4256_s28 + $0x250] sm:$0xff] %v1592_v5  ;;  %v1466_v44 = vmul.f32 %v1031_v28, %v570_v4  ;;  %v3275_v43 = vld [vmem:[%s3911_s7 + $0x2a8] sm:$0xff]  ;;  %v3276_v16 = vld [vmem:[%s3911_s7 + $0x2a0] sm:$0xff] }
 0x150   : > { %2044 = vrot.lane.b32.xlu1 %v4993_v34, %s3755_s17  ;;  %2042 = vrot.lane.b32.xlu0 %v5003_v62, %s3755_s17  ;;  %v1347_v4 = vmul.f32 %v3275_v43, %v451_v57  ;;  %v1346_v5 = vmul.f32 %v3276_v16, %v450_v1 }
 0x151   : > { %v1595_v36 = vadd.f32 %v1467_v17, %v1339_v60  ;;  %v1594_v9 = vadd.f32 %v1466_v44, %v1338_v35  ;;  %v579_v60 = vld [vmem:[%s7132_s1 + $0x2a8] sm:$0xff]  ;;  %v5107_v17 = vld [vmem:[%s3919_s26 + $0x70] sm:$0xff] }
 0x152   : > { %v1037_v2 = vpop.permute.xlu1 %1036  ;;  %v1035_v46 = vpop.permute.xlu0 %1034 }
 0x153   : > { %1723 = vst [vmem:[%s4256_s28 + $0x268] sm:$0xff] %v1595_v36  ;;  %v1469_v3 = vmul.f32 %v1037_v2, %v573_v22  ;;  %1722 = vst [vmem:[%s4256_s28 + $0x260] sm:$0xff] %v1594_v9  ;;  %v1468_v56 = vmul.f32 %v1035_v46, %v572_v54  ;;  %v452_v22 = vld [vmem:[%s7131_s0 + $0x2b0] sm:$0xff]  ;;  %v581_v54 = vld [vmem:[%s7132_s1 + $0x2b8] sm:$0xff] }
 0x154   : > { %2048 = vrot.lane.b32.xlu1 %v5019_v29, %s3755_s17  ;;  %2046 = vrot.lane.b32.xlu0 %v5029_v13, %s3755_s17  ;;  %v580_v9 = vld [vmem:[%s7132_s1 + $0x2b0] sm:$0xff]  ;;  %v1348_v46 = vmul.f32 %v3278_v53, %v452_v22  ;;  %v587_v22 = vld [vmem:[%s7132_s1 + $0x2e8] sm:$0xff] }
 0x155   : > { %v1597_v38 = vadd.f32 %v1469_v3, %v1341_v45  ;;  %v1596_v6 = vadd.f32 %v1468_v56, %v1340_v37  ;;  %v1349_v37 = vmul.f32 %v3277_v63, %v453_v8  ;;  %v455_v3 = vld [vmem:[%s7131_s0 + $0x2c8] sm:$0xff]  ;;  %v586_v63 = vld [vmem:[%s7132_s1 + $0x2e0] sm:$0xff] }
 0x156   : > { %v1041_v51 = vpop.permute.xlu1 %1040  ;;  %v1039_v25 = vpop.permute.xlu0 %1038 }
 0x157   : > { %1725 = vst [vmem:[%s4256_s28 + $0x278] sm:$0xff] %v1597_v38  ;;  %v1471_v55 = vmul.f32 %v1041_v51, %v575_v47  ;;  %1724 = vst [vmem:[%s4256_s28 + $0x270] sm:$0xff] %v1596_v6  ;;  %v1470_v14 = vmul.f32 %v1039_v25, %v574_v31  ;;  %v5133_v47 = vld [vmem:[%s3919_s26 + $0x80] sm:$0xff]  ;;  %v1351_v51 = vmul.f32 %v3279_v24, %v455_v3  ;;  %v5149_v6 = vld [vmem:[%s3919_s26 + $0x98] sm:$0xff] }
 0x158   : > { %2052 = vrot.lane.b32.xlu1 %v5045_v52, %s3755_s17  ;;  %2050 = vrot.lane.b32.xlu0 %v5055_v19, %s3755_s17  ;;  %v582_v25 = vld [vmem:[%s7132_s1 + $0x2c0] sm:$0xff]  ;;  %v5227_v24 = vld [vmem:[%s3919_s26 + $0xc8] sm:$0xff] }
 0x159   : > { %v1599_v15 = vadd.f32 %v1471_v55, %v1343_v18  ;;  %v1598_v50 = vadd.f32 %v1470_v14, %v1342_v39  ;;  %v454_v18 = vld [vmem:[%s7131_s0 + $0x2c0] sm:$0xff]  ;;  %v583_v39 = vld [vmem:[%s7132_s1 + $0x2c8] sm:$0xff] }
 0x15a   : > { %v1045_v26 = vpop.permute.xlu1 %1044  ;;  %v1043_v27 = vpop.permute.xlu0 %1042  ;;  %v3280_v55 = vld [vmem:[%s3911_s7 + $0x2c0] sm:$0xff] }
 0x15b   : > { %1727 = vst [vmem:[%s4256_s28 + $0x288] sm:$0xff] %v1599_v15  ;;  %v1473_v21 = vmul.f32 %v1045_v26, %v577_v0  ;;  %1726 = vst [vmem:[%s4256_s28 + $0x280] sm:$0xff] %v1598_v50  ;;  %v1472_v42 = vmul.f32 %v1043_v27, %v576_v41  ;;  %v1350_v14 = vmul.f32 %v3280_v55, %v454_v18  ;;  %v457_v0 = vld [vmem:[%s7131_s0 + $0x2d8] sm:$0xff]  ;;  %v456_v41 = vld [vmem:[%s7131_s0 + $0x2d0] sm:$0xff] }
 0x15c   : > { %2056 = vrot.lane.b32.xlu1 %v5071_v49, %s3755_s17  ;;  %2054 = vrot.lane.b32.xlu0 %v5081_v11, %s3755_s17  ;;  %v585_v26 = vld [vmem:[%s7132_s1 + $0x2d8] sm:$0xff]  ;;  %v5175_v27 = vld [vmem:[%s3919_s26 + $0xa8] sm:$0xff] }
 0x15d   : > { %v1601_v35 = vadd.f32 %v1473_v21, %v1345_v32  ;;  %v1600_v44 = vadd.f32 %v1472_v42, %v1344_v7  ;;  %v5159_v32 = vld [vmem:[%s3919_s26 + $0x90] sm:$0xff]  ;;  %v3281_v50 = vld [vmem:[%s3911_s7 + $0x2d8] sm:$0xff] }
 0x15e   : > { %v1049_v28 = vpop.permute.xlu1 %1048  ;;  %v1047_v12 = vpop.permute.xlu0 %1046  ;;  %v1353_v1 = vmul.f32 %v3281_v50, %v457_v0  ;;  %v584_v42 = vld [vmem:[%s7132_s1 + $0x2d0] sm:$0xff]  ;;  %v3287_v50 = vld [vmem:[%s3911_s7 + $0x308] sm:$0xff] }
 0x15f   : > { %1729 = vst [vmem:[%s4256_s28 + $0x298] sm:$0xff] %v1601_v35  ;;  %v1475_v45 = vmul.f32 %v1049_v28, %v579_v60  ;;  %1728 = vst [vmem:[%s4256_s28 + $0x290] sm:$0xff] %v1600_v44  ;;  %v1474_v36 = vmul.f32 %v1047_v12, %v578_v58  ;;  %v3282_v60 = vld [vmem:[%s3911_s7 + $0x2d0] sm:$0xff]  ;;  %v5185_v58 = vld [vmem:[%s3919_s26 + $0xa0] sm:$0xff] }
 0x160   : > { %2060 = vrot.lane.b32.xlu1 %v5097_v59, %s3755_s17  ;;  %2058 = vrot.lane.b32.xlu0 %v5107_v17, %s3755_s17  ;;  %v1352_v43 = vmul.f32 %v3282_v60, %v456_v41  ;;  %v3283_v12 = vld [vmem:[%s3911_s7 + $0x2e8] sm:$0xff]  ;;  %v462_v41 = vld [vmem:[%s7131_s0 + $0x300] sm:$0xff] }
 0x161   : > { %v1603_v2 = vadd.f32 %v1475_v45, %v1347_v4  ;;  %v1602_v30 = vadd.f32 %v1474_v36, %v1346_v5  ;;  %v459_v4 = vld [vmem:[%s7131_s0 + $0x2e8] sm:$0xff]  ;;  %v458_v5 = vld [vmem:[%s7131_s0 + $0x2e0] sm:$0xff]  ;;  %v5201_v36 = vld [vmem:[%s3919_s26 + $0xb8] sm:$0xff] }
 0x162   : > { %v1053_v56 = vpop.permute.xlu1 %1052  ;;  %v1051_v38 = vpop.permute.xlu0 %1050  ;;  %v1355_v45 = vmul.f32 %v3283_v12, %v459_v4  ;;  %v590_v60 = vld [vmem:[%s7132_s1 + $0x300] sm:$0xff] }
 0x163   : > { %1731 = vst [vmem:[%s4256_s28 + $0x2a8] sm:$0xff] %v1603_v2  ;;  %v1477_v31 = vmul.f32 %v1053_v56, %v581_v54  ;;  %1730 = vst [vmem:[%s4256_s28 + $0x2a0] sm:$0xff] %v1602_v30  ;;  %v1476_v61 = vmul.f32 %v1051_v38, %v580_v9  ;;  %v461_v9 = vld [vmem:[%s7131_s0 + $0x2f8] sm:$0xff]  ;;  %v460_v56 = vld [vmem:[%s7131_s0 + $0x2f0] sm:$0xff] }
 0x164   : > { %2064 = vrot.lane.b32.xlu1 %v5123_v23, %s3755_s17  ;;  %2062 = vrot.lane.b32.xlu0 %v5133_v47, %s3755_s17 }
 0x165   : > { %v1605_v48 = vadd.f32 %v1477_v31, %v1349_v37  ;;  %v1604_v15 = vadd.f32 %v1476_v61, %v1348_v46  ;;  %v3284_v37 = vld [vmem:[%s3911_s7 + $0x2e0] sm:$0xff]  ;;  %v5211_v46 = vld [vmem:[%s3919_s26 + $0xb0] sm:$0xff]  ;;  %v589_v31 = vld [vmem:[%s7132_s1 + $0x2f8] sm:$0xff] }
 0x166   : > { %v1057_v10 = vpop.permute.xlu1 %1056  ;;  %v1055_v33 = vpop.permute.xlu0 %1054  ;;  %v1354_v2 = vmul.f32 %v3284_v37, %v458_v5  ;;  %v3285_v61 = vld [vmem:[%s3911_s7 + $0x2f8] sm:$0xff]  ;;  %v5263_v5 = vld [vmem:[%s3919_s26 + $0xd0] sm:$0xff]  ;;  %v5279_v37 = vld [vmem:[%s3919_s26 + $0xe8] sm:$0xff] }
 0x167   : > { %1733 = vst [vmem:[%s4256_s28 + $0x2b8] sm:$0xff] %v1605_v48  ;;  %v1479_v7 = vmul.f32 %v1057_v10, %v583_v39  ;;  %1732 = vst [vmem:[%s4256_s28 + $0x2b0] sm:$0xff] %v1604_v15  ;;  %v1478_v57 = vmul.f32 %v1055_v33, %v582_v25  ;;  %v1357_v39 = vmul.f32 %v3285_v61, %v461_v9  ;;  %v588_v48 = vld [vmem:[%s7132_s1 + $0x2f0] sm:$0xff]  ;;  %v5237_v10 = vld [vmem:[%s3919_s26 + $0xc0] sm:$0xff] }
 0x168   : > { %2068 = vrot.lane.b32.xlu1 %v5149_v6, %s3755_s17  ;;  %2066 = vrot.lane.b32.xlu0 %v5159_v32, %s3755_s17  ;;  %v3286_v25 = vld [vmem:[%s3911_s7 + $0x2f0] sm:$0xff] }
 0x169   : > { %v1607_v21 = vadd.f32 %v1479_v7, %v1351_v51  ;;  %v1606_v16 = vadd.f32 %v1478_v57, %v1350_v14  ;;  %v1356_v55 = vmul.f32 %v3286_v25, %v460_v56  ;;  %v463_v14 = vld [vmem:[%s7131_s0 + $0x308] sm:$0xff]  ;;  %v592_v9 = vld [vmem:[%s7132_s1 + $0x310] sm:$0xff] }
 0x16a   : > { %v1061_v35 = vpop.permute.xlu1 %1060  ;;  %v1059_v8 = vpop.permute.xlu0 %1058  ;;  %v467_v56 = vld [vmem:[%s7131_s0 + $0x328] sm:$0xff] }
 0x16b   : > { %1735 = vst [vmem:[%s4256_s28 + $0x2c8] sm:$0xff] %v1607_v21  ;;  %v1481_v28 = vmul.f32 %v1061_v35, %v585_v26  ;;  %1734 = vst [vmem:[%s4256_s28 + $0x2c0] sm:$0xff] %v1606_v16  ;;  %v1480_v44 = vmul.f32 %v1059_v8, %v584_v42  ;;  %v591_v26 = vld [vmem:[%s7132_s1 + $0x308] sm:$0xff]  ;;  %v5253_v21 = vld [vmem:[%s3919_s26 + $0xd8] sm:$0xff] }
 0x16c   : > { %2072 = vrot.lane.b32.xlu1 %v5175_v27, %s3755_s17  ;;  %2070 = vrot.lane.b32.xlu0 %v5185_v58, %s3755_s17  ;;  %v465_v35 = vld [vmem:[%s7131_s0 + $0x318] sm:$0xff]  ;;  %v3291_v25 = vld [vmem:[%s3911_s7 + $0x328] sm:$0xff] }
 0x16d   : > { %v1609_v54 = vadd.f32 %v1481_v28, %v1353_v1  ;;  %v1608_v3 = vadd.f32 %v1480_v44, %v1352_v43  ;;  %v1359_v1 = vmul.f32 %v3287_v50, %v463_v14  ;;  %v3288_v43 = vld [vmem:[%s3911_s7 + $0x300] sm:$0xff]  ;;  %v464_v28 = vld [vmem:[%s7131_s0 + $0x310] sm:$0xff]  ;;  %v5305_v14 = vld [vmem:[%s3919_s26 + $0xf8] sm:$0xff] }
 0x16e   : > { %v1065_v53 = vpop.permute.xlu1 %1064  ;;  %v1063_v30 = vpop.permute.xlu0 %1062  ;;  %v1358_v4 = vmul.f32 %v3288_v43, %v462_v41  ;;  %v3292_v41 = vld [vmem:[%s3911_s7 + $0x320] sm:$0xff] }
 0x16f   : > { %1737 = vst [vmem:[%s4256_s28 + $0x2d8] sm:$0xff] %v1609_v54  ;;  %v1483_v18 = vmul.f32 %v1065_v53, %v587_v22  ;;  %1736 = vst [vmem:[%s4256_s28 + $0x2d0] sm:$0xff] %v1608_v3  ;;  %v1482_v38 = vmul.f32 %v1063_v30, %v586_v63  ;;  %v3289_v54 = vld [vmem:[%s3911_s7 + $0x318] sm:$0xff]  ;;  %v3290_v53 = vld [vmem:[%s3911_s7 + $0x310] sm:$0xff] }
 0x170   : > { %2076 = vrot.lane.b32.xlu1 %v5201_v36, %s3755_s17  ;;  %2074 = vrot.lane.b32.xlu0 %v5211_v46, %s3755_s17  ;;  %v1361_v63 = vmul.f32 %v3289_v54, %v465_v35  ;;  %v1360_v3 = vmul.f32 %v3290_v53, %v464_v28  ;;  %v3293_v35 = vld [vmem:[%s3911_s7 + $0x338] sm:$0xff] }
 0x171   : > { %v1611_v51 = vadd.f32 %v1483_v18, %v1355_v45  ;;  %v1610_v15 = vadd.f32 %v1482_v38, %v1354_v2  ;;  %v593_v45 = vld [vmem:[%s7132_s1 + $0x318] sm:$0xff]  ;;  %v5289_v18 = vld [vmem:[%s3919_s26 + $0xe0] sm:$0xff] }
 0x172   : > { %v1069_v0 = vpop.permute.xlu1 %1068  ;;  %v1067_v33 = vpop.permute.xlu0 %1066 }
 0x173   : > { %1739 = vst [vmem:[%s4256_s28 + $0x2e8] sm:$0xff] %v1611_v51  ;;  %v1485_v7 = vmul.f32 %v1069_v0, %v589_v31  ;;  %1738 = vst [vmem:[%s4256_s28 + $0x2e0] sm:$0xff] %v1610_v15  ;;  %v1484_v57 = vmul.f32 %v1067_v33, %v588_v48  ;;  %v466_v31 = vld [vmem:[%s7131_s0 + $0x320] sm:$0xff]  ;;  %v595_v48 = vld [vmem:[%s7132_s1 + $0x328] sm:$0xff] }
 0x174   : > { %2080 = vrot.lane.b32.xlu1 %v5227_v24, %s3755_s17  ;;  %2078 = vrot.lane.b32.xlu0 %v5237_v10, %s3755_s17  ;;  %v594_v15 = vld [vmem:[%s7132_s1 + $0x320] sm:$0xff]  ;;  %v1362_v33 = vmul.f32 %v3292_v41, %v466_v31 }
 0x175   : > { %v1613_v42 = vadd.f32 %v1485_v7, %v1357_v39  ;;  %v1612_v8 = vadd.f32 %v1484_v57, %v1356_v55  ;;  %v1363_v55 = vmul.f32 %v3291_v25, %v467_v56  ;;  %v469_v7 = vld [vmem:[%s7131_s0 + $0x338] sm:$0xff] }
 0x176   : > { %v1073_v16 = vpop.permute.xlu1 %1072  ;;  %v1071_v44 = vpop.permute.xlu0 %1070 }
 0x177   : > { %1741 = vst [vmem:[%s4256_s28 + $0x2f8] sm:$0xff] %v1613_v42  ;;  %v1487_v22 = vmul.f32 %v1073_v16, %v591_v26  ;;  %1740 = vst [vmem:[%s4256_s28 + $0x2f0] sm:$0xff] %v1612_v8  ;;  %v1486_v12 = vmul.f32 %v1071_v44, %v590_v60  ;;  %v5315_v26 = vld [vmem:[%s3919_s26 + $0xf0] sm:$0xff]  ;;  %v1365_v16 = vmul.f32 %v3293_v35, %v469_v7  ;;  %v5331_v8 = vld [vmem:[%s3919_s26 + $0x108] sm:$0xff] }
 0x178   : > { %2084 = vrot.lane.b32.xlu1 %v5253_v21, %s3755_s17  ;;  %2082 = vrot.lane.b32.xlu0 %v5263_v5, %s3755_s17  ;;  %v596_v44 = vld [vmem:[%s7132_s1 + $0x330] sm:$0xff] }
 0x179   : > { %v1615_v2 = vadd.f32 %v1487_v22, %v1359_v1  ;;  %v1614_v38 = vadd.f32 %v1486_v12, %v1358_v4  ;;  %v468_v1 = vld [vmem:[%s7131_s0 + $0x330] sm:$0xff]  ;;  %v597_v4 = vld [vmem:[%s7132_s1 + $0x338] sm:$0xff] }
 0x17a   : > { %v1077_v30 = vpop.permute.xlu1 %1076  ;;  %v1075_v61 = vpop.permute.xlu0 %1074  ;;  %v3294_v22 = vld [vmem:[%s3911_s7 + $0x330] sm:$0xff] }
 0x17b   : > { %1743 = vst [vmem:[%s4256_s28 + $0x308] sm:$0xff] %v1615_v2  ;;  %v1489_v39 = vmul.f32 %v1077_v30, %v593_v45  ;;  %1742 = vst [vmem:[%s4256_s28 + $0x300] sm:$0xff] %v1614_v38  ;;  %v1488_v51 = vmul.f32 %v1075_v61, %v592_v9  ;;  %v1364_v12 = vmul.f32 %v3294_v22, %v468_v1  ;;  %v471_v45 = vld [vmem:[%s7131_s0 + $0x348] sm:$0xff]  ;;  %v470_v9 = vld [vmem:[%s7131_s0 + $0x340] sm:$0xff] }
 0x17c   : > { %2088 = vrot.lane.b32.xlu1 %v5279_v37, %s3755_s17  ;;  %2086 = vrot.lane.b32.xlu0 %v5289_v18, %s3755_s17  ;;  %v599_v30 = vld [vmem:[%s7132_s1 + $0x348] sm:$0xff]  ;;  %v5357_v61 = vld [vmem:[%s3919_s26 + $0x118] sm:$0xff] }
 0x17d   : > { %v1617_v0 = vadd.f32 %v1489_v39, %v1361_v63  ;;  %v1616_v50 = vadd.f32 %v1488_v51, %v1360_v3  ;;  %v5341_v63 = vld [vmem:[%s3919_s26 + $0x100] sm:$0xff]  ;;  %v3295_v38 = vld [vmem:[%s3911_s7 + $0x348] sm:$0xff]  ;;  %v601_v1 = vld [vmem:[%s7132_s1 + $0x358] sm:$0xff] }
 0x17e   : > { %v1081_v57 = vpop.permute.xlu1 %1080  ;;  %v1079_v42 = vpop.permute.xlu0 %1078  ;;  %v1367_v31 = vmul.f32 %v3295_v38, %v471_v45  ;;  %v598_v51 = vld [vmem:[%s7132_s1 + $0x340] sm:$0xff]  ;;  %v600_v35 = vld [vmem:[%s7132_s1 + $0x350] sm:$0xff]  ;;  %v5409_v38 = vld [vmem:[%s3919_s26 + $0x138] sm:$0xff] }
 0x17f   : > { %1745 = vst [vmem:[%s4256_s28 + $0x318] sm:$0xff] %v1617_v0  ;;  %v1491_v60 = vmul.f32 %v1081_v57, %v595_v48  ;;  %1744 = vst [vmem:[%s4256_s28 + $0x310] sm:$0xff] %v1616_v50  ;;  %v1490_v43 = vmul.f32 %v1079_v42, %v594_v15  ;;  %v3296_v48 = vld [vmem:[%s3911_s7 + $0x340] sm:$0xff]  ;;  %v5367_v15 = vld [vmem:[%s3919_s26 + $0x110] sm:$0xff] }
 0x180   : > { %2092 = vrot.lane.b32.xlu1 %v5305_v14, %s3755_s17  ;;  %2090 = vrot.lane.b32.xlu0 %v5315_v26, %s3755_s17  ;;  %v1366_v25 = vmul.f32 %v3296_v48, %v470_v9  ;;  %v3297_v42 = vld [vmem:[%s3911_s7 + $0x358] sm:$0xff] }
 0x181   : > { %v1619_v28 = vadd.f32 %v1491_v60, %v1363_v55  ;;  %v1618_v2 = vadd.f32 %v1490_v43, %v1362_v33  ;;  %v473_v55 = vld [vmem:[%s7131_s0 + $0x358] sm:$0xff]  ;;  %v472_v33 = vld [vmem:[%s7131_s0 + $0x350] sm:$0xff]  ;;  %v5383_v43 = vld [vmem:[%s3919_s26 + $0x128] sm:$0xff] }
 0x182   : > { %v1085_v54 = vpop.permute.xlu1 %1084  ;;  %v1083_v53 = vpop.permute.xlu0 %1082  ;;  %v1369_v60 = vmul.f32 %v3297_v42, %v473_v55  ;;  %v3301_v42 = vld [vmem:[%s3911_s7 + $0x378] sm:$0xff] }
 0x183   : > { %1747 = vst [vmem:[%s4256_s28 + $0x328] sm:$0xff] %v1619_v28  ;;  %v1493_v3 = vmul.f32 %v1085_v54, %v597_v4  ;;  %1746 = vst [vmem:[%s4256_s28 + $0x320] sm:$0xff] %v1618_v2  ;;  %v1492_v56 = vmul.f32 %v1083_v53, %v596_v44  ;;  %v475_v44 = vld [vmem:[%s7131_s0 + $0x368] sm:$0xff]  ;;  %v474_v54 = vld [vmem:[%s7131_s0 + $0x360] sm:$0xff] }
 0x184   : > { %2096 = vrot.lane.b32.xlu1 %v5331_v8, %s3755_s17  ;;  %2094 = vrot.lane.b32.xlu0 %v5341_v63, %s3755_s17 }
 0x185   : > { %v1621_v39 = vadd.f32 %v1493_v3, %v1365_v16  ;;  %v1620_v41 = vadd.f32 %v1492_v56, %v1364_v12  ;;  %v3298_v16 = vld [vmem:[%s3911_s7 + $0x350] sm:$0xff]  ;;  %v5393_v12 = vld [vmem:[%s3919_s26 + $0x120] sm:$0xff]  ;;  %v603_v3 = vld [vmem:[%s7132_s1 + $0x368] sm:$0xff] }
 0x186   : > { %v1089_v0 = vpop.permute.xlu1 %1088  ;;  %v1087_v7 = vpop.permute.xlu0 %1086  ;;  %v1368_v28 = vmul.f32 %v3298_v16, %v472_v33  ;;  %v3299_v56 = vld [vmem:[%s3911_s7 + $0x368] sm:$0xff]  ;;  %v476_v33 = vld [vmem:[%s7131_s0 + $0x370] sm:$0xff] }
 0x187   : > { %1749 = vst [vmem:[%s4256_s28 + $0x338] sm:$0xff] %v1621_v39  ;;  %v1495_v57 = vmul.f32 %v1089_v0, %v599_v30  ;;  %1748 = vst [vmem:[%s4256_s28 + $0x330] sm:$0xff] %v1620_v41  ;;  %v1494_v50 = vmul.f32 %v1087_v7, %v598_v51  ;;  %v1371_v30 = vmul.f32 %v3299_v56, %v475_v44  ;;  %v602_v39 = vld [vmem:[%s7132_s1 + $0x360] sm:$0xff]  ;;  %v5419_v0 = vld [vmem:[%s3919_s26 + $0x130] sm:$0xff] }
 0x188   : > { %2100 = vrot.lane.b32.xlu1 %v5357_v61, %s3755_s17  ;;  %2098 = vrot.lane.b32.xlu0 %v5367_v15, %s3755_s17  ;;  %v3300_v51 = vld [vmem:[%s3911_s7 + $0x360] sm:$0xff]  ;;  %v604_v16 = vld [vmem:[%s7132_s1 + $0x370] sm:$0xff] }
 0x189   : > { %v1623_v4 = vadd.f32 %v1495_v57, %v1367_v31  ;;  %v1622_v45 = vadd.f32 %v1494_v50, %v1366_v25  ;;  %v1370_v48 = vmul.f32 %v3300_v51, %v474_v54  ;;  %v477_v25 = vld [vmem:[%s7131_s0 + $0x378] sm:$0xff]  ;;  %v5445_v54 = vld [vmem:[%s3919_s26 + $0x140] sm:$0xff] }
 0x18a   : > { %v1093_v22 = vpop.permute.xlu1 %1092  ;;  %v1091_v2 = vpop.permute.xlu0 %1090  ;;  %v5461_v51 = vld [vmem:[%s3919_s26 + $0x158] sm:$0xff] }
 0x18b   : > { %1751 = vst [vmem:[%s4256_s28 + $0x348] sm:$0xff] %v1623_v4  ;;  %v1497_v9 = vmul.f32 %v1093_v22, %v601_v1  ;;  %1750 = vst [vmem:[%s4256_s28 + $0x340] sm:$0xff] %v1622_v45  ;;  %v1496_v53 = vmul.f32 %v1091_v2, %v600_v35  ;;  %v605_v1 = vld [vmem:[%s7132_s1 + $0x378] sm:$0xff]  ;;  %v5435_v4 = vld [vmem:[%s3919_s26 + $0x148] sm:$0xff] }
 0x18c   : > { %2104 = vrot.lane.b32.xlu1 %v5383_v43, %s3755_s17  ;;  %2102 = vrot.lane.b32.xlu0 %v5393_v12, %s3755_s17  ;;  %v479_v22 = vld [vmem:[%s7131_s0 + $0x388] sm:$0xff] }
 0x18d   : > { %v1625_v31 = vadd.f32 %v1497_v9, %v1369_v60  ;;  %v1624_v41 = vadd.f32 %v1496_v53, %v1368_v28  ;;  %v1373_v60 = vmul.f32 %v3301_v42, %v477_v25  ;;  %v3302_v28 = vld [vmem:[%s3911_s7 + $0x370] sm:$0xff]  ;;  %v478_v9 = vld [vmem:[%s7131_s0 + $0x380] sm:$0xff] }
 0x18e   : > { %v1097_v55 = vpop.permute.xlu1 %1096  ;;  %v1095_v7 = vpop.permute.xlu0 %1094  ;;  %v1372_v44 = vmul.f32 %v3302_v28, %v476_v33  ;;  %v606_v25 = vld [vmem:[%s7132_s1 + $0x380] sm:$0xff]  ;;  %v481_v33 = vld [vmem:[%s7131_s0 + $0x398] sm:$0xff] }
 0x18f   : > { %1753 = vst [vmem:[%s4256_s28 + $0x358] sm:$0xff] %v1625_v31  ;;  %v1499_v57 = vmul.f32 %v1097_v55, %v603_v3  ;;  %1752 = vst [vmem:[%s4256_s28 + $0x350] sm:$0xff] %v1624_v41  ;;  %v1498_v50 = vmul.f32 %v1095_v7, %v602_v39  ;;  %v3303_v31 = vld [vmem:[%s3911_s7 + $0x388] sm:$0xff]  ;;  %v3304_v55 = vld [vmem:[%s3911_s7 + $0x380] sm:$0xff] }
 0x190   : > { %2108 = vrot.lane.b32.xlu1 %v5409_v38, %s3755_s17  ;;  %2106 = vrot.lane.b32.xlu0 %v5419_v0, %s3755_s17  ;;  %v1375_v39 = vmul.f32 %v3303_v31, %v479_v22  ;;  %v1374_v41 = vmul.f32 %v3304_v55, %v478_v9  ;;  %v3305_v28 = vld [vmem:[%s3911_s7 + $0x398] sm:$0xff]  ;;  %v5487_v22 = vld [vmem:[%s3919_s26 + $0x168] sm:$0xff] }
 0x191   : > { %v1627_v35 = vadd.f32 %v1499_v57, %v1371_v30  ;;  %v1626_v2 = vadd.f32 %v1498_v50, %v1370_v48  ;;  %v607_v30 = vld [vmem:[%s7132_s1 + $0x388] sm:$0xff]  ;;  %v5471_v57 = vld [vmem:[%s3919_s26 + $0x150] sm:$0xff] }
 0x192   : > { %v1101_v45 = vpop.permute.xlu1 %1100  ;;  %v1099_v53 = vpop.permute.xlu0 %1098  ;;  %v3306_v9 = vld [vmem:[%s3911_s7 + $0x390] sm:$0xff] }
 0x193   : > { %1755 = vst [vmem:[%s4256_s28 + $0x368] sm:$0xff] %v1627_v35  ;;  %v1501_v3 = vmul.f32 %v1101_v45, %v605_v1  ;;  %1754 = vst [vmem:[%s4256_s28 + $0x360] sm:$0xff] %v1626_v2  ;;  %v1500_v56 = vmul.f32 %v1099_v53, %v604_v16  ;;  %v480_v1 = vld [vmem:[%s7131_s0 + $0x390] sm:$0xff]  ;;  %v609_v16 = vld [vmem:[%s7132_s1 + $0x398] sm:$0xff] }
 0x194   : > { %2112 = vrot.lane.b32.xlu1 %v5435_v4, %s3755_s17  ;;  %2110 = vrot.lane.b32.xlu0 %v5445_v54, %s3755_s17  ;;  %v608_v2 = vld [vmem:[%s7132_s1 + $0x390] sm:$0xff]  ;;  %v1376_v53 = vmul.f32 %v3306_v9, %v480_v1 }
 0x195   : > { %v1629_v48 = vadd.f32 %v1501_v3, %v1373_v60  ;;  %v1628_v50 = vadd.f32 %v1500_v56, %v1372_v44  ;;  %v1377_v44 = vmul.f32 %v3305_v28, %v481_v33  ;;  %v483_v3 = vld [vmem:[%s7131_s0 + $0x3a8] sm:$0xff] }
 0x196   : > { %v1105_v7 = vpop.permute.xlu1 %1104  ;;  %v1103_v42 = vpop.permute.xlu0 %1102  ;;  %v611_v33 = vld [vmem:[%s7132_s1 + $0x3a8] sm:$0xff] }
 0x197   : > { %1757 = vst [vmem:[%s4256_s28 + $0x378] sm:$0xff] %v1629_v48  ;;  %v1503_v60 = vmul.f32 %v1105_v7, %v607_v30  ;;  %1756 = vst [vmem:[%s4256_s28 + $0x370] sm:$0xff] %v1628_v50  ;;  %v1502_v35 = vmul.f32 %v1103_v42, %v606_v25  ;;  %v5497_v30 = vld [vmem:[%s3919_s26 + $0x160] sm:$0xff]  ;;  %v3307_v7 = vld [vmem:[%s3911_s7 + $0x3a8] sm:$0xff] }
 0x198   : > { %2116 = vrot.lane.b32.xlu1 %v5461_v51, %s3755_s17  ;;  %2114 = vrot.lane.b32.xlu0 %v5471_v57, %s3755_s17  ;;  %v5513_v50 = vld [vmem:[%s3919_s26 + $0x178] sm:$0xff]  ;;  %v610_v42 = vld [vmem:[%s7132_s1 + $0x3a0] sm:$0xff] }
 0x199   : > { %v1631_v45 = vadd.f32 %v1503_v60, %v1375_v39  ;;  %v1630_v31 = vadd.f32 %v1502_v35, %v1374_v41  ;;  %v482_v39 = vld [vmem:[%s7131_s0 + $0x3a0] sm:$0xff]  ;;  %v1379_v41 = vmul.f32 %v3307_v7, %v483_v3 }
 0x19a   : > { %v1109_v56 = vpop.permute.xlu1 %1108  ;;  %v1107_v48 = vpop.permute.xlu0 %1106  ;;  %v3308_v60 = vld [vmem:[%s3911_s7 + $0x3a0] sm:$0xff] }
 0x19b   : > { %1759 = vst [vmem:[%s4256_s28 + $0x388] sm:$0xff] %v1631_v45  ;;  %v1505_v25 = vmul.f32 %v1109_v56, %v609_v16  ;;  %1758 = vst [vmem:[%s4256_s28 + $0x380] sm:$0xff] %v1630_v31  ;;  %v1504_v55 = vmul.f32 %v1107_v48, %v608_v2  ;;  %v1378_v35 = vmul.f32 %v3308_v60, %v482_v39  ;;  %v485_v16 = vld [vmem:[%s7131_s0 + $0x3b8] sm:$0xff]  ;;  %v5523_v45 = vld [vmem:[%s3919_s26 + $0x170] sm:$0xff] }
 0x19c   : > { %2120 = vrot.lane.b32.xlu1 %v5487_v22, %s3755_s17  ;;  %2118 = vrot.lane.b32.xlu0 %v5497_v30, %s3755_s17  ;;  %v613_v31 = vld [vmem:[%s7132_s1 + $0x3b8] sm:$0xff]  ;;  %v5539_v48 = vld [vmem:[%s3919_s26 + $0x188] sm:$0xff] }
 0x19d   : > { %v1633_v1 = vadd.f32 %v1505_v25, %v1377_v44  ;;  %v1632_v2 = vadd.f32 %v1504_v55, %v1376_v53  ;;  %v484_v44 = vld [vmem:[%s7131_s0 + $0x3b0] sm:$0xff]  ;;  %v3309_v39 = vld [vmem:[%s3911_s7 + $0x3b8] sm:$0xff]  ;;  %v5549_v60 = vld [vmem:[%s3919_s26 + $0x180] sm:$0xff] }
 0x19e   : > { %v1113_v28 = vpop.permute.xlu1 %1112  ;;  %v1111_v9 = vpop.permute.xlu0 %1110  ;;  %v1381_v53 = vmul.f32 %v3309_v39, %v485_v16  ;;  %v612_v55 = vld [vmem:[%s7132_s1 + $0x3b0] sm:$0xff] }
 0x19f   : > { %1761 = vst [vmem:[%s4256_s28 + $0x398] sm:$0xff] %v1633_v1  ;;  %v1507_v3 = vmul.f32 %v1113_v28, %v611_v33  ;;  %1760 = vst [vmem:[%s4256_s28 + $0x390] sm:$0xff] %v1632_v2  ;;  %v1506_v56 = vmul.f32 %v1111_v9, %v610_v42  ;;  %v3310_v33 = vld [vmem:[%s3911_s7 + $0x3b0] sm:$0xff]  ;;  %v487_v1 = vld [vmem:[%s7131_s0 + $0x3c8] sm:$0xff] }
 0x1a0   : > { %2124 = vrot.lane.b32.xlu1 %v5513_v50, %s3755_s17  ;;  %2122 = vrot.lane.b32.xlu0 %v5523_v45, %s3755_s17  ;;  %v1380_v7 = vmul.f32 %v3310_v33, %v484_v44  ;;  %v615_v9 = vld [vmem:[%s7132_s1 + $0x3c8] sm:$0xff]  ;;  %v489_v33 = vld [vmem:[%s7131_s0 + $0x3d8] sm:$0xff] }
 0x1a1   : > { %v1635_v25 = vadd.f32 %v1507_v3, %v1379_v41  ;;  %v1634_v16 = vadd.f32 %v1506_v56, %v1378_v35  ;;  %v486_v41 = vld [vmem:[%s7131_s0 + $0x3c0] sm:$0xff]  ;;  %v3311_v3 = vld [vmem:[%s3911_s7 + $0x3c8] sm:$0xff]  ;;  %v5565_v56 = vld [vmem:[%s3919_s26 + $0x198] sm:$0xff] }
 0x1a2   : > { %v1117_v42 = vpop.permute.xlu1 %1116  ;;  %v1115_v28 = vpop.permute.xlu0 %1114  ;;  %v1383_v35 = vmul.f32 %v3311_v3, %v487_v1  ;;  %7189 = vst [vmem:[#allocation16_spill] sm:$0xff] %v5565_v56  ;;  %v617_v3 = vld [vmem:[%s7132_s1 + $0x3d8] sm:$0xff] }
 0x1a3   : > { %1763 = vst [vmem:[%s4256_s28 + $0x3a8] sm:$0xff] %v1635_v25  ;;  %v1509_v2 = vmul.f32 %v1117_v42, %v613_v31  ;;  %1762 = vst [vmem:[%s4256_s28 + $0x3a0] sm:$0xff] %v1634_v16  ;;  %v1508_v44 = vmul.f32 %v1115_v28, %v612_v55  ;;  %v614_v31 = vld [vmem:[%s7132_s1 + $0x3c0] sm:$0xff]  ;;  %v5575_v42 = vld [vmem:[%s3919_s26 + $0x190] sm:$0xff] }
 0x1a4   : > { %2128 = vrot.lane.b32.xlu1 %v5539_v48, %s3755_s17  ;;  %2126 = vrot.lane.b32.xlu0 %v5549_v60, %s3755_s17  ;;  %v3312_v25 = vld [vmem:[%s3911_s7 + $0x3c0] sm:$0xff]  ;;  %7190 = vst [vmem:[#allocation17_spill] sm:$0xff] %v5575_v42 }
 0x1a5   : > { %v1637_v39 = vadd.f32 %v1509_v2, %v1381_v53  ;;  %v1382_v55 = vmul.f32 %v3312_v25, %v486_v41  ;;  %v1636_v16 = vadd.f32 %v1508_v44, %v1380_v7  ;;  %v488_v53 = vld [vmem:[%s7131_s0 + $0x3d0] sm:$0xff]  ;;  %v3313_v25 = vld [vmem:[%s3911_s7 + $0x3d8] sm:$0xff]  ;;  %v5591_v44 = vld [vmem:[%s3919_s26 + $0x1a8] sm:$0xff] }
 0x1a6   : > { %v1121_v1 = vpop.permute.xlu1 %1120  ;;  %v1119_v28 = vpop.permute.xlu0 %1118  ;;  %v1385_v7 = vmul.f32 %v3313_v25, %v489_v33  ;;  %7191 = vst [vmem:[#allocation18_spill] sm:$0xff] %v5591_v44 }
 0x1a7   : > { %1765 = vst [vmem:[%s4256_s28 + $0x3b8] sm:$0xff] %v1637_v39  ;;  %v1511_v2 = vmul.f32 %v1121_v1, %v615_v9  ;;  %1764 = vst [vmem:[%s4256_s28 + $0x3b0] sm:$0xff] %v1636_v16  ;;  %v1510_v41 = vmul.f32 %v1119_v28, %v614_v31  ;;  %v616_v9 = vld [vmem:[%s7132_s1 + $0x3d0] sm:$0xff]  ;;  %v491_v16 = vld [vmem:[%s7131_s0 + $0x3e8] sm:$0xff] }
 0x1a8   : > { %2132 = vrot.lane.b32.xlu1 %v5565_v56, %s3755_s17  ;;  %2130 = vrot.lane.b32.xlu0 %v5575_v42, %s3755_s17  ;;  %v3314_v31 = vld [vmem:[%s3911_s7 + $0x3d0] sm:$0xff]  ;;  %v5601_v28 = vld [vmem:[%s3919_s26 + $0x1a0] sm:$0xff] }
 0x1a9   : > { %v1639_v39 = vadd.f32 %v1511_v2, %v1383_v35  ;;  %v1384_v1 = vmul.f32 %v3314_v31, %v488_v53  ;;  %7192 = vst [vmem:[#allocation19_spill] sm:$0xff] %v5601_v28  ;;  %v1638_v25 = vadd.f32 %v1510_v41, %v1382_v55  ;;  %v490_v35 = vld [vmem:[%s7131_s0 + $0x3e0] sm:$0xff]  ;;  %v619_v31 = vld [vmem:[%s7132_s1 + $0x3e8] sm:$0xff]  ;;  %v5617_v41 = vld [vmem:[%s3919_s26 + $0x1b8] sm:$0xff] }
 0x1aa   : > { %v1125_v33 = vpop.permute.xlu1 %1124  ;;  %v1123_v2 = vpop.permute.xlu0 %1122  ;;  %v3315_v56 = vld [vmem:[%s3911_s7 + $0x3e8] sm:$0xff]  ;;  %7193 = vst [vmem:[#allocation20_spill] sm:$0xff] %v5617_v41 }
 0x1ab   : > { %1767 = vst [vmem:[%s4256_s28 + $0x3c8] sm:$0xff] %v1639_v39  ;;  %v1513_v42 = vmul.f32 %v1125_v33, %v617_v3  ;;  %1766 = vst [vmem:[%s4256_s28 + $0x3c0] sm:$0xff] %v1638_v25  ;;  %v1512_v53 = vmul.f32 %v1123_v2, %v616_v9  ;;  %v1387_v55 = vmul.f32 %v3315_v56, %v491_v16  ;;  %v618_v3 = vld [vmem:[%s7132_s1 + $0x3e0] sm:$0xff]  ;;  %v493_v25 = vld [vmem:[%s7131_s0 + $0x3f8] sm:$0xff] }
 0x1ac   : > { %2136 = vrot.lane.b32.xlu1 %v5591_v44, %s3755_s17  ;;  %2134 = vrot.lane.b32.xlu0 %v5601_v28, %s3755_s17  ;;  %v3316_v9 = vld [vmem:[%s3911_s7 + $0x3e0] sm:$0xff]  ;;  %v5627_v16 = vld [vmem:[%s3919_s26 + $0x1b0] sm:$0xff] }
 0x1ad   : > { %v1641_v39 = vadd.f32 %v1513_v42, %v1385_v7  ;;  %v1386_v33 = vmul.f32 %v3316_v9, %v490_v35  ;;  %v1640_v2 = vadd.f32 %v1512_v53, %v1384_v1  ;;  %v492_v42 = vld [vmem:[%s7131_s0 + $0x3f0] sm:$0xff]  ;;  %v621_v9 = vld [vmem:[%s7132_s1 + $0x3f8] sm:$0xff]  ;;  %v5643_v44 = vld [vmem:[%s3919_s26 + $0x1c8] sm:$0xff] }
 0x1ae   : > { %v1129_v56 = vpop.permute.xlu1 %1128  ;;  %v1127_v7 = vpop.permute.xlu0 %1126  ;;  %v3317_v1 = vld [vmem:[%s3911_s7 + $0x3f8] sm:$0xff] }
 0x1af   : > { %1769 = vst [vmem:[%s4256_s28 + $0x3d8] sm:$0xff] %v1641_v39  ;;  %v1515_v28 = vmul.f32 %v1129_v56, %v619_v31  ;;  %1768 = vst [vmem:[%s4256_s28 + $0x3d0] sm:$0xff] %v1640_v2  ;;  %v1514_v35 = vmul.f32 %v1127_v7, %v618_v3  ;;  %v1389_v53 = vmul.f32 %v3317_v1, %v493_v25  ;;  %v620_v39 = vld [vmem:[%s7132_s1 + $0x3f0] sm:$0xff]  ;;  %v5650_v7 = vld [vmem:[%s3919_s26 + $0x1c0] sm:$0xff] }
 0x1b0   : > { %2140 = vrot.lane.b32.xlu1 %v5617_v41, %s3755_s17  ;;  %2138 = vrot.lane.b32.xlu0 %v5627_v16, %s3755_s17  ;;  %v3318_v3 = vld [vmem:[%s3911_s7 + $0x3f0] sm:$0xff]  ;;  %7194 = vst [vmem:[#allocation21_spill] sm:$0xff] %v5650_v7  ;;  %s2927_s7 = scalar_lea.sflag [#allocation4], %s3904_s9 }
 0x1b1   : > { %v1643_v31 = vadd.f32 %v1515_v28, %v1387_v55  ;;  %v1388_v56 = vmul.f32 %v3318_v3, %v492_v42  ;;  %v1642_v41 = vadd.f32 %v1514_v35, %v1386_v33  ;;  %v3319_v55 = vld [vmem:[%s7131_s0 + $0x8] sm:$0xff]  ;;  %v5663_v33 = vld [vmem:[%s3919_s26 + $0x1d8] sm:$0xff] }
 0x1b2   : > { %v1133_v2 = vpop.permute.xlu1 %1132  ;;  %v1131_v25 = vpop.permute.xlu0 %1130  ;;  %v3320_v42 = vld [vmem:[%s3919_s26 + $0x8] sm:$0xff]  ;;  %7195 = vst [vmem:[#allocation22_spill] sm:$0xff] %v5663_v33 }
 0x1b3   : > { %1771 = vst [vmem:[%s4256_s28 + $0x3e8] sm:$0xff] %v1643_v31  ;;  %v1517_v1 = vmul.f32 %v1133_v2, %v621_v9  ;;  %1770 = vst [vmem:[%s4256_s28 + $0x3e0] sm:$0xff] %v1642_v41  ;;  %v1516_v28 = vmul.f32 %v1131_v25, %v620_v39  ;;  %v2415_v3 = vmul.f32 %v3320_v42, %v3319_v55  ;;  %v3321_v41 = vld [vmem:[%s7131_s0] sm:$0xff]  ;;  %v5670_v2 = vld [vmem:[%s3919_s26 + $0x1d0] sm:$0xff] }
 0x1b4   : > { %2144 = vrot.lane.b32.xlu1 %v5643_v44, %s3755_s17  ;;  %2142 = vrot.lane.b32.xlu0 %v5650_v7, %s3755_s17  ;;  %v3322_v9 = vld [vmem:[%s3919_s26] sm:$0xff]  ;;  %v3323_v55 = vld [vmem:[%s7132_s1 + $0x8] sm:$0xff] }
 0x1b5   : > { %v1645_v35 = vadd.f32 %v1517_v1, %v1389_v53  ;;  %v2414_v31 = vmul.f32 %v3322_v9, %v3321_v41  ;;  %v1644_v25 = vadd.f32 %v1516_v28, %v1388_v56  ;;  %v3324_v53 = vld [vmem:[%s7132_s1] sm:$0xff]  ;;  %v3325_v56 = vld [vmem:[%s7131_s0 + $0x18] sm:$0xff] }
 0x1b6   : > { %v2033_v39 = vpop.permute.xlu1 %2032  ;;  %v2031_v7 = vpop.permute.xlu0 %2030  ;;  %v3326_v28 = vld [vmem:[%s3919_s26 + $0x18] sm:$0xff] }
 0x1b7   : > { %v2543_v42 = vmul.f32 %v3323_v55, %v2033_v39  ;;  %1773 = vst [vmem:[%s4256_s28 + $0x3f8] sm:$0xff] %v1645_v35  ;;  %v2542_v1 = vmul.f32 %v3324_v53, %v2031_v7  ;;  %1772 = vst [vmem:[%s4256_s28 + $0x3f0] sm:$0xff] %v1644_v25  ;;  %v2417_v41 = vmul.f32 %v3326_v28, %v3325_v56  ;;  %v5689_v35 = vld [vmem:[%s3919_s26 + $0x1e8] sm:$0xff]  ;;  %v3327_v7 = vld [vmem:[%s7131_s0 + $0x10] sm:$0xff] }
 0x1b8   : > { %2148 = vrot.lane.b32.xlu1 %v5663_v33, %s3755_s17  ;;  %2146 = vrot.lane.b32.xlu0 %v5670_v2, %s3755_s17  ;;  %v3328_v39 = vld [vmem:[%s3919_s26 + $0x10] sm:$0xff]  ;;  %v5696_v33 = vld [vmem:[%s3919_s26 + $0x1e0] sm:$0xff] }
 0x1b9   : > { %v2671_v9 = vadd.f32 %v2543_v42, %v2415_v3  ;;  %v2416_v55 = vmul.f32 %v3328_v39, %v3327_v7  ;;  %v2670_v53 = vadd.f32 %v2542_v1, %v2414_v31  ;;  %v3329_v3 = vld [vmem:[%s7132_s1 + $0x18] sm:$0xff]  ;;  %v3330_v31 = vld [vmem:[%s7132_s1 + $0x10] sm:$0xff]  ;;  %v3331_v28 = vld [vmem:[%s7131_s0 + $0x28] sm:$0xff] }
 0x1ba   : > { %v2037_v25 = vpop.permute.xlu1 %2036  ;;  %v2035_v56 = vpop.permute.xlu0 %2034  ;;  %v5718_v39 = vld [vmem:[%s3919_s26 + $0x1f8] sm:$0xff] }
 0x1bb   : > { %2799 = vst [vmem:[%s5699_s29 + $0x8] sm:$0xff] %v2671_v9  ;;  %v2545_v42 = vmul.f32 %v3329_v3, %v2037_v25  ;;  %2798 = vst [vmem:[%s5699_s29] sm:$0xff] %v2670_v53  ;;  %v2544_v1 = vmul.f32 %v3330_v31, %v2035_v56  ;;  %v2419_v9 = vmul.f32 %v3331_v28, %v4967_v40  ;;  %v3332_v53 = vld [vmem:[%s7131_s0 + $0x20] sm:$0xff]  ;;  %v5725_v31 = vld [vmem:[%s3919_s26 + $0x1f0] sm:$0xff] }
 0x1bc   : > { %2152 = vrot.lane.b32.xlu1 %v5689_v35, %s3755_s17  ;;  %2150 = vrot.lane.b32.xlu0 %v5696_v33, %s3755_s17  ;;  %v2418_v25 = vmul.f32 %v3332_v53, %v4977_v20  ;;  %v3333_v40 = vld [vmem:[%s7132_s1 + $0x28] sm:$0xff]  ;;  %v3334_v28 = vld [vmem:[%s7132_s1 + $0x20] sm:$0xff] }
 0x1bd   : > { %v2673_v7 = vadd.f32 %v2545_v42, %v2417_v41  ;;  %v2672_v3 = vadd.f32 %v2544_v1, %v2416_v55  ;;  %v3335_v55 = vld [vmem:[%s7131_s0 + $0x38] sm:$0xff]  ;;  %v5744_v53 = vld [vmem:[%s3919_s26 + $0x208] sm:$0xff] }
 0x1be   : > { %v2041_v56 = vpop.permute.xlu1 %2040  ;;  %v2039_v42 = vpop.permute.xlu0 %2038  ;;  %v2421_v1 = vmul.f32 %v3335_v55, %v4993_v34  ;;  %v3337_v34 = vld [vmem:[%s7132_s1 + $0x38] sm:$0xff]  ;;  %v3338_v55 = vld [vmem:[%s7132_s1 + $0x30] sm:$0xff] }
 0x1bf   : > { %2801 = vst [vmem:[%s5699_s29 + $0x18] sm:$0xff] %v2673_v7  ;;  %v2547_v41 = vmul.f32 %v3333_v40, %v2041_v56  ;;  %2800 = vst [vmem:[%s5699_s29 + $0x10] sm:$0xff] %v2672_v3  ;;  %v2546_v20 = vmul.f32 %v3334_v28, %v2039_v42  ;;  %v3336_v3 = vld [vmem:[%s7131_s0 + $0x30] sm:$0xff]  ;;  %v5751_v28 = vld [vmem:[%s3919_s26 + $0x200] sm:$0xff] }
 0x1c0   : > { %2156 = vrot.lane.b32.xlu1 %v5718_v39, %s3755_s17  ;;  %2154 = vrot.lane.b32.xlu0 %v5725_v31, %s3755_s17  ;;  %v2420_v56 = vmul.f32 %v3336_v3, %v5003_v62  ;;  %v5770_v3 = vld [vmem:[%s3919_s26 + $0x218] sm:$0xff] }
 0x1c1   : > { %v2675_v7 = vadd.f32 %v2547_v41, %v2419_v9  ;;  %v2674_v40 = vadd.f32 %v2546_v20, %v2418_v25  ;;  %v3339_v25 = vld [vmem:[%s7131_s0 + $0x48] sm:$0xff] }
 0x1c2   : > { %v2045_v42 = vpop.permute.xlu1 %2044  ;;  %v2043_v41 = vpop.permute.xlu0 %2042  ;;  %v2423_v20 = vmul.f32 %v3339_v25, %v5019_v29  ;;  %v3341_v29 = vld [vmem:[%s7132_s1 + $0x48] sm:$0xff]  ;;  %v3342_v25 = vld [vmem:[%s7132_s1 + $0x40] sm:$0xff] }
 0x1c3   : > { %2803 = vst [vmem:[%s5699_s29 + $0x28] sm:$0xff] %v2675_v7  ;;  %v2549_v9 = vmul.f32 %v3337_v34, %v2045_v42  ;;  %2802 = vst [vmem:[%s5699_s29 + $0x20] sm:$0xff] %v2674_v40  ;;  %v2548_v62 = vmul.f32 %v3338_v55, %v2043_v41  ;;  %v3340_v40 = vld [vmem:[%s7131_s0 + $0x40] sm:$0xff]  ;;  %v5777_v55 = vld [vmem:[%s3919_s26 + $0x210] sm:$0xff] }
 0x1c4   : > { %2160 = vrot.lane.b32.xlu1 %v5744_v53, %s3755_s17  ;;  %2158 = vrot.lane.b32.xlu0 %v5751_v28, %s3755_s17  ;;  %v2422_v42 = vmul.f32 %v3340_v40, %v5029_v13  ;;  %v5796_v40 = vld [vmem:[%s3919_s26 + $0x228] sm:$0xff] }
 0x1c5   : > { %v2677_v7 = vadd.f32 %v2549_v9, %v2421_v1  ;;  %v2676_v34 = vadd.f32 %v2548_v62, %v2420_v56  ;;  %v3343_v56 = vld [vmem:[%s7131_s0 + $0x58] sm:$0xff] }
 0x1c6   : > { %v2049_v41 = vpop.permute.xlu1 %2048  ;;  %v2047_v9 = vpop.permute.xlu0 %2046  ;;  %v2425_v62 = vmul.f32 %v3343_v56, %v5045_v52  ;;  %v3345_v52 = vld [vmem:[%s7132_s1 + $0x58] sm:$0xff]  ;;  %v3346_v56 = vld [vmem:[%s7132_s1 + $0x50] sm:$0xff] }
 0x1c7   : > { %2805 = vst [vmem:[%s5699_s29 + $0x38] sm:$0xff] %v2677_v7  ;;  %v2551_v1 = vmul.f32 %v3341_v29, %v2049_v41  ;;  %2804 = vst [vmem:[%s5699_s29 + $0x30] sm:$0xff] %v2676_v34  ;;  %v2550_v13 = vmul.f32 %v3342_v25, %v2047_v9  ;;  %v3344_v34 = vld [vmem:[%s7131_s0 + $0x50] sm:$0xff]  ;;  %v5803_v25 = vld [vmem:[%s3919_s26 + $0x220] sm:$0xff] }
 0x1c8   : > { %2164 = vrot.lane.b32.xlu1 %v5770_v3, %s3755_s17  ;;  %2162 = vrot.lane.b32.xlu0 %v5777_v55, %s3755_s17  ;;  %v2424_v41 = vmul.f32 %v3344_v34, %v5055_v19  ;;  %v5822_v34 = vld [vmem:[%s3919_s26 + $0x238] sm:$0xff] }
 0x1c9   : > { %v2679_v7 = vadd.f32 %v2551_v1, %v2423_v20  ;;  %v2678_v29 = vadd.f32 %v2550_v13, %v2422_v42  ;;  %v3347_v42 = vld [vmem:[%s7131_s0 + $0x68] sm:$0xff] }
 0x1ca   : > { %v2053_v9 = vpop.permute.xlu1 %2052  ;;  %v2051_v1 = vpop.permute.xlu0 %2050  ;;  %v2427_v13 = vmul.f32 %v3347_v42, %v5071_v49  ;;  %v3349_v49 = vld [vmem:[%s7132_s1 + $0x68] sm:$0xff]  ;;  %v3350_v42 = vld [vmem:[%s7132_s1 + $0x60] sm:$0xff] }
 0x1cb   : > { %2807 = vst [vmem:[%s5699_s29 + $0x48] sm:$0xff] %v2679_v7  ;;  %v2553_v20 = vmul.f32 %v3345_v52, %v2053_v9  ;;  %2806 = vst [vmem:[%s5699_s29 + $0x40] sm:$0xff] %v2678_v29  ;;  %v2552_v19 = vmul.f32 %v3346_v56, %v2051_v1  ;;  %v3348_v29 = vld [vmem:[%s7131_s0 + $0x60] sm:$0xff]  ;;  %v5829_v56 = vld [vmem:[%s3919_s26 + $0x230] sm:$0xff] }
 0x1cc   : > { %2168 = vrot.lane.b32.xlu1 %v5796_v40, %s3755_s17  ;;  %2166 = vrot.lane.b32.xlu0 %v5803_v25, %s3755_s17  ;;  %v2426_v9 = vmul.f32 %v3348_v29, %v5081_v11  ;;  %v5848_v29 = vld [vmem:[%s3919_s26 + $0x248] sm:$0xff] }
 0x1cd   : > { %v2681_v7 = vadd.f32 %v2553_v20, %v2425_v62  ;;  %v2680_v52 = vadd.f32 %v2552_v19, %v2424_v41  ;;  %v3351_v41 = vld [vmem:[%s7131_s0 + $0x78] sm:$0xff] }
 0x1ce   : > { %v2057_v1 = vpop.permute.xlu1 %2056  ;;  %v2055_v20 = vpop.permute.xlu0 %2054  ;;  %v2429_v19 = vmul.f32 %v3351_v41, %v5097_v59  ;;  %v3353_v59 = vld [vmem:[%s7132_s1 + $0x78] sm:$0xff]  ;;  %v3354_v41 = vld [vmem:[%s7132_s1 + $0x70] sm:$0xff] }
 0x1cf   : > { %2809 = vst [vmem:[%s5699_s29 + $0x58] sm:$0xff] %v2681_v7  ;;  %v2555_v62 = vmul.f32 %v3349_v49, %v2057_v1  ;;  %2808 = vst [vmem:[%s5699_s29 + $0x50] sm:$0xff] %v2680_v52  ;;  %v2554_v11 = vmul.f32 %v3350_v42, %v2055_v20  ;;  %v3352_v52 = vld [vmem:[%s7131_s0 + $0x70] sm:$0xff]  ;;  %v5855_v42 = vld [vmem:[%s3919_s26 + $0x240] sm:$0xff] }
 0x1d0   : > { %2172 = vrot.lane.b32.xlu1 %v5822_v34, %s3755_s17  ;;  %2170 = vrot.lane.b32.xlu0 %v5829_v56, %s3755_s17  ;;  %v2428_v1 = vmul.f32 %v3352_v52, %v5107_v17  ;;  %v5874_v52 = vld [vmem:[%s3919_s26 + $0x258] sm:$0xff] }
 0x1d1   : > { %v2683_v7 = vadd.f32 %v2555_v62, %v2427_v13  ;;  %v2682_v49 = vadd.f32 %v2554_v11, %v2426_v9  ;;  %v3355_v9 = vld [vmem:[%s7131_s0 + $0x88] sm:$0xff] }
 0x1d2   : > { %v2061_v20 = vpop.permute.xlu1 %2060  ;;  %v2059_v62 = vpop.permute.xlu0 %2058  ;;  %v2431_v11 = vmul.f32 %v3355_v9, %v5123_v23  ;;  %v3357_v23 = vld [vmem:[%s7132_s1 + $0x88] sm:$0xff]  ;;  %v3358_v9 = vld [vmem:[%s7132_s1 + $0x80] sm:$0xff] }
 0x1d3   : > { %2811 = vst [vmem:[%s5699_s29 + $0x68] sm:$0xff] %v2683_v7  ;;  %v2557_v13 = vmul.f32 %v3353_v59, %v2061_v20  ;;  %2810 = vst [vmem:[%s5699_s29 + $0x60] sm:$0xff] %v2682_v49  ;;  %v2556_v17 = vmul.f32 %v3354_v41, %v2059_v62  ;;  %v3356_v49 = vld [vmem:[%s7131_s0 + $0x80] sm:$0xff]  ;;  %v5881_v41 = vld [vmem:[%s3919_s26 + $0x250] sm:$0xff] }
 0x1d4   : > { %2176 = vrot.lane.b32.xlu1 %v5848_v29, %s3755_s17  ;;  %2174 = vrot.lane.b32.xlu0 %v5855_v42, %s3755_s17  ;;  %v2430_v20 = vmul.f32 %v3356_v49, %v5133_v47  ;;  %v5900_v49 = vld [vmem:[%s3919_s26 + $0x268] sm:$0xff] }
 0x1d5   : > { %v2685_v7 = vadd.f32 %v2557_v13, %v2429_v19  ;;  %v2684_v59 = vadd.f32 %v2556_v17, %v2428_v1  ;;  %v3359_v1 = vld [vmem:[%s7131_s0 + $0x98] sm:$0xff] }
 0x1d6   : > { %v2065_v62 = vpop.permute.xlu1 %2064  ;;  %v2063_v13 = vpop.permute.xlu0 %2062  ;;  %v2433_v17 = vmul.f32 %v3359_v1, %v5149_v6  ;;  %v3361_v6 = vld [vmem:[%s7132_s1 + $0x98] sm:$0xff]  ;;  %v3362_v1 = vld [vmem:[%s7132_s1 + $0x90] sm:$0xff] }
 0x1d7   : > { %2813 = vst [vmem:[%s5699_s29 + $0x78] sm:$0xff] %v2685_v7  ;;  %v2559_v19 = vmul.f32 %v3357_v23, %v2065_v62  ;;  %2812 = vst [vmem:[%s5699_s29 + $0x70] sm:$0xff] %v2684_v59  ;;  %v2558_v47 = vmul.f32 %v3358_v9, %v2063_v13  ;;  %v3360_v59 = vld [vmem:[%s7131_s0 + $0x90] sm:$0xff]  ;;  %v5907_v9 = vld [vmem:[%s3919_s26 + $0x260] sm:$0xff] }
 0x1d8   : > { %2180 = vrot.lane.b32.xlu1 %v5874_v52, %s3755_s17  ;;  %2178 = vrot.lane.b32.xlu0 %v5881_v41, %s3755_s17  ;;  %v2432_v62 = vmul.f32 %v3360_v59, %v5159_v32  ;;  %v5926_v59 = vld [vmem:[%s3919_s26 + $0x278] sm:$0xff] }
 0x1d9   : > { %v2687_v7 = vadd.f32 %v2559_v19, %v2431_v11  ;;  %v2686_v23 = vadd.f32 %v2558_v47, %v2430_v20  ;;  %v3363_v20 = vld [vmem:[%s7131_s0 + $0xa8] sm:$0xff] }
 0x1da   : > { %v2069_v13 = vpop.permute.xlu1 %2068  ;;  %v2067_v19 = vpop.permute.xlu0 %2066  ;;  %v2435_v47 = vmul.f32 %v3363_v20, %v5175_v27  ;;  %v3365_v27 = vld [vmem:[%s7132_s1 + $0xa8] sm:$0xff]  ;;  %v3366_v20 = vld [vmem:[%s7132_s1 + $0xa0] sm:$0xff] }
 0x1db   : > { %2815 = vst [vmem:[%s5699_s29 + $0x88] sm:$0xff] %v2687_v7  ;;  %v2561_v11 = vmul.f32 %v3361_v6, %v2069_v13  ;;  %2814 = vst [vmem:[%s5699_s29 + $0x80] sm:$0xff] %v2686_v23  ;;  %v2560_v32 = vmul.f32 %v3362_v1, %v2067_v19  ;;  %v3364_v23 = vld [vmem:[%s7131_s0 + $0xa0] sm:$0xff]  ;;  %v5933_v1 = vld [vmem:[%s3919_s26 + $0x270] sm:$0xff] }
 0x1dc   : > { %2184 = vrot.lane.b32.xlu1 %v5900_v49, %s3755_s17  ;;  %2182 = vrot.lane.b32.xlu0 %v5907_v9, %s3755_s17  ;;  %v2434_v13 = vmul.f32 %v3364_v23, %v5185_v58  ;;  %v5952_v23 = vld [vmem:[%s3919_s26 + $0x288] sm:$0xff] }
 0x1dd   : > { %v2689_v7 = vadd.f32 %v2561_v11, %v2433_v17  ;;  %v2688_v6 = vadd.f32 %v2560_v32, %v2432_v62  ;;  %v3367_v62 = vld [vmem:[%s7131_s0 + $0xb8] sm:$0xff] }
 0x1de   : > { %v2073_v19 = vpop.permute.xlu1 %2072  ;;  %v2071_v11 = vpop.permute.xlu0 %2070  ;;  %v2437_v32 = vmul.f32 %v3367_v62, %v5201_v36  ;;  %v3369_v36 = vld [vmem:[%s7132_s1 + $0xb8] sm:$0xff]  ;;  %v3370_v62 = vld [vmem:[%s7132_s1 + $0xb0] sm:$0xff] }
 0x1df   : > { %2817 = vst [vmem:[%s5699_s29 + $0x98] sm:$0xff] %v2689_v7  ;;  %v2563_v17 = vmul.f32 %v3365_v27, %v2073_v19  ;;  %2816 = vst [vmem:[%s5699_s29 + $0x90] sm:$0xff] %v2688_v6  ;;  %v2562_v58 = vmul.f32 %v3366_v20, %v2071_v11  ;;  %v3368_v6 = vld [vmem:[%s7131_s0 + $0xb0] sm:$0xff]  ;;  %v5959_v20 = vld [vmem:[%s3919_s26 + $0x280] sm:$0xff] }
 0x1e0   : > { %2188 = vrot.lane.b32.xlu1 %v5926_v59, %s3755_s17  ;;  %2186 = vrot.lane.b32.xlu0 %v5933_v1, %s3755_s17  ;;  %v2436_v19 = vmul.f32 %v3368_v6, %v5211_v46  ;;  %v5978_v6 = vld [vmem:[%s3919_s26 + $0x298] sm:$0xff] }
 0x1e1   : > { %v2691_v7 = vadd.f32 %v2563_v17, %v2435_v47  ;;  %v2690_v27 = vadd.f32 %v2562_v58, %v2434_v13  ;;  %v3371_v13 = vld [vmem:[%s7131_s0 + $0xc8] sm:$0xff] }
 0x1e2   : > { %v2077_v11 = vpop.permute.xlu1 %2076  ;;  %v2075_v17 = vpop.permute.xlu0 %2074  ;;  %v2439_v58 = vmul.f32 %v3371_v13, %v5227_v24  ;;  %v3373_v24 = vld [vmem:[%s7132_s1 + $0xc8] sm:$0xff]  ;;  %v3374_v13 = vld [vmem:[%s7132_s1 + $0xc0] sm:$0xff] }
 0x1e3   : > { %2819 = vst [vmem:[%s5699_s29 + $0xa8] sm:$0xff] %v2691_v7  ;;  %v2565_v47 = vmul.f32 %v3369_v36, %v2077_v11  ;;  %2818 = vst [vmem:[%s5699_s29 + $0xa0] sm:$0xff] %v2690_v27  ;;  %v2564_v46 = vmul.f32 %v3370_v62, %v2075_v17  ;;  %v3372_v27 = vld [vmem:[%s7131_s0 + $0xc0] sm:$0xff]  ;;  %v5985_v62 = vld [vmem:[%s3919_s26 + $0x290] sm:$0xff] }
 0x1e4   : > { %2192 = vrot.lane.b32.xlu1 %v5952_v23, %s3755_s17  ;;  %2190 = vrot.lane.b32.xlu0 %v5959_v20, %s3755_s17  ;;  %v2438_v11 = vmul.f32 %v3372_v27, %v5237_v10  ;;  %v6004_v27 = vld [vmem:[%s3919_s26 + $0x2a8] sm:$0xff] }
 0x1e5   : > { %v2693_v7 = vadd.f32 %v2565_v47, %v2437_v32  ;;  %v2692_v36 = vadd.f32 %v2564_v46, %v2436_v19  ;;  %v3375_v19 = vld [vmem:[%s7131_s0 + $0xd8] sm:$0xff] }
 0x1e6   : > { %v2081_v17 = vpop.permute.xlu1 %2080  ;;  %v2079_v47 = vpop.permute.xlu0 %2078  ;;  %v2441_v46 = vmul.f32 %v3375_v19, %v5253_v21  ;;  %v3377_v21 = vld [vmem:[%s7132_s1 + $0xd8] sm:$0xff]  ;;  %v3378_v19 = vld [vmem:[%s7132_s1 + $0xd0] sm:$0xff] }
 0x1e7   : > { %2821 = vst [vmem:[%s5699_s29 + $0xb8] sm:$0xff] %v2693_v7  ;;  %v2567_v32 = vmul.f32 %v3373_v24, %v2081_v17  ;;  %2820 = vst [vmem:[%s5699_s29 + $0xb0] sm:$0xff] %v2692_v36  ;;  %v2566_v10 = vmul.f32 %v3374_v13, %v2079_v47  ;;  %v3376_v36 = vld [vmem:[%s7131_s0 + $0xd0] sm:$0xff]  ;;  %v6011_v13 = vld [vmem:[%s3919_s26 + $0x2a0] sm:$0xff] }
 0x1e8   : > { %2196 = vrot.lane.b32.xlu1 %v5978_v6, %s3755_s17  ;;  %2194 = vrot.lane.b32.xlu0 %v5985_v62, %s3755_s17  ;;  %v2440_v17 = vmul.f32 %v3376_v36, %v5263_v5  ;;  %v6030_v36 = vld [vmem:[%s3919_s26 + $0x2b8] sm:$0xff] }
 0x1e9   : > { %v2695_v7 = vadd.f32 %v2567_v32, %v2439_v58  ;;  %v2694_v24 = vadd.f32 %v2566_v10, %v2438_v11  ;;  %v3379_v11 = vld [vmem:[%s7131_s0 + $0xe8] sm:$0xff] }
 0x1ea   : > { %v2085_v47 = vpop.permute.xlu1 %2084  ;;  %v2083_v32 = vpop.permute.xlu0 %2082  ;;  %v2443_v10 = vmul.f32 %v3379_v11, %v5279_v37  ;;  %v3381_v37 = vld [vmem:[%s7132_s1 + $0xe8] sm:$0xff]  ;;  %v3382_v11 = vld [vmem:[%s7132_s1 + $0xe0] sm:$0xff] }
 0x1eb   : > { %2823 = vst [vmem:[%s5699_s29 + $0xc8] sm:$0xff] %v2695_v7  ;;  %v2569_v58 = vmul.f32 %v3377_v21, %v2085_v47  ;;  %2822 = vst [vmem:[%s5699_s29 + $0xc0] sm:$0xff] %v2694_v24  ;;  %v2568_v5 = vmul.f32 %v3378_v19, %v2083_v32  ;;  %v3380_v24 = vld [vmem:[%s7131_s0 + $0xe0] sm:$0xff]  ;;  %v6037_v19 = vld [vmem:[%s3919_s26 + $0x2b0] sm:$0xff] }
 0x1ec   : > { %2200 = vrot.lane.b32.xlu1 %v6004_v27, %s3755_s17  ;;  %2198 = vrot.lane.b32.xlu0 %v6011_v13, %s3755_s17  ;;  %v2442_v47 = vmul.f32 %v3380_v24, %v5289_v18  ;;  %v6056_v24 = vld [vmem:[%s3919_s26 + $0x2c8] sm:$0xff] }
 0x1ed   : > { %v2697_v7 = vadd.f32 %v2569_v58, %v2441_v46  ;;  %v2696_v21 = vadd.f32 %v2568_v5, %v2440_v17  ;;  %v3383_v5 = vld [vmem:[%s7131_s0 + $0xf8] sm:$0xff] }
 0x1ee   : > { %v2089_v32 = vpop.permute.xlu1 %2088  ;;  %v2087_v58 = vpop.permute.xlu0 %2086 }
 0x1ef   : > { %2825 = vst [vmem:[%s5699_s29 + $0xd8] sm:$0xff] %v2697_v7  ;;  %v2571_v46 = vmul.f32 %v3381_v37, %v2089_v32  ;;  %2824 = vst [vmem:[%s5699_s29 + $0xd0] sm:$0xff] %v2696_v21  ;;  %v2570_v18 = vmul.f32 %v3382_v11, %v2087_v58  ;;  %v2445_v7 = vmul.f32 %v3383_v5, %v5305_v14  ;;  %v3384_v37 = vld [vmem:[%s7131_s0 + $0xf0] sm:$0xff]  ;;  %v3385_v58 = vld [vmem:[%s7132_s1 + $0xf8] sm:$0xff] }
 0x1f0   : > { %2204 = vrot.lane.b32.xlu1 %v6030_v36, %s3755_s17  ;;  %2202 = vrot.lane.b32.xlu0 %v6037_v19, %s3755_s17 }
 0x1f1   : > { %v2699_v17 = vadd.f32 %v2571_v46, %v2443_v10  ;;  %v2698_v21 = vadd.f32 %v2570_v18, %v2442_v47  ;;  %v2444_v10 = vmul.f32 %v3384_v37, %v5315_v26  ;;  %v6063_v46 = vld [vmem:[%s3919_s26 + $0x2c0] sm:$0xff]  ;;  %v3386_v47 = vld [vmem:[%s7132_s1 + $0xf0] sm:$0xff] }
 0x1f2   : > { %v2093_v32 = vpop.permute.xlu1 %2092  ;;  %v2091_v11 = vpop.permute.xlu0 %2090 }
 0x1f3   : > { %2827 = vst [vmem:[%s5699_s29 + $0xe8] sm:$0xff] %v2699_v17  ;;  %v2573_v14 = vmul.f32 %v3385_v58, %v2093_v32  ;;  %2826 = vst [vmem:[%s5699_s29 + $0xe0] sm:$0xff] %v2698_v21  ;;  %v2572_v18 = vmul.f32 %v3386_v47, %v2091_v11  ;;  %v3387_v17 = vld [vmem:[%s7131_s0 + $0x108] sm:$0xff]  ;;  %v6082_v21 = vld [vmem:[%s3919_s26 + $0x2d8] sm:$0xff] }
 0x1f4   : > { %2208 = vrot.lane.b32.xlu1 %v6056_v24, %s3755_s17  ;;  %2206 = vrot.lane.b32.xlu0 %v6063_v46, %s3755_s17  ;;  %v2447_v5 = vmul.f32 %v3387_v17, %v5331_v8  ;;  %v3388_v58 = vld [vmem:[%s7131_s0 + $0x100] sm:$0xff]  ;;  %v3389_v11 = vld [vmem:[%s7132_s1 + $0x108] sm:$0xff] }
 0x1f5   : > { %v2701_v26 = vadd.f32 %v2573_v14, %v2445_v7  ;;  %v2700_v32 = vadd.f32 %v2572_v18, %v2444_v10  ;;  %v2446_v7 = vmul.f32 %v3388_v58, %v5341_v63  ;;  %v6089_v14 = vld [vmem:[%s3919_s26 + $0x2d0] sm:$0xff]  ;;  %v3390_v10 = vld [vmem:[%s7132_s1 + $0x100] sm:$0xff] }
 0x1f6   : > { %v2097_v37 = vpop.permute.xlu1 %2096  ;;  %v2095_v47 = vpop.permute.xlu0 %2094 }
 0x1f7   : > { %2829 = vst [vmem:[%s5699_s29 + $0xf8] sm:$0xff] %v2701_v26  ;;  %v2575_v8 = vmul.f32 %v3389_v11, %v2097_v37  ;;  %2828 = vst [vmem:[%s5699_s29 + $0xf0] sm:$0xff] %v2700_v32  ;;  %v2574_v18 = vmul.f32 %v3390_v10, %v2095_v47  ;;  %v3391_v26 = vld [vmem:[%s7131_s0 + $0x118] sm:$0xff]  ;;  %v6108_v32 = vld [vmem:[%s3919_s26 + $0x2e8] sm:$0xff] }
 0x1f8   : > { %2212 = vrot.lane.b32.xlu1 %v6082_v21, %s3755_s17  ;;  %2210 = vrot.lane.b32.xlu0 %v6089_v14, %s3755_s17  ;;  %v2449_v17 = vmul.f32 %v3391_v26, %v5357_v61  ;;  %v3392_v11 = vld [vmem:[%s7131_s0 + $0x110] sm:$0xff]  ;;  %v3393_v47 = vld [vmem:[%s7132_s1 + $0x118] sm:$0xff] }
 0x1f9   : > { %v2703_v63 = vadd.f32 %v2575_v8, %v2447_v5  ;;  %v2702_v37 = vadd.f32 %v2574_v18, %v2446_v7  ;;  %v2448_v5 = vmul.f32 %v3392_v11, %v5367_v15  ;;  %v6115_v8 = vld [vmem:[%s3919_s26 + $0x2e0] sm:$0xff]  ;;  %v3394_v7 = vld [vmem:[%s7132_s1 + $0x110] sm:$0xff] }
 0x1fa   : > { %v2101_v58 = vpop.permute.xlu1 %2100  ;;  %v2099_v10 = vpop.permute.xlu0 %2098 }
 0x1fb   : > { %2831 = vst [vmem:[%s5699_s29 + $0x108] sm:$0xff] %v2703_v63  ;;  %v2577_v61 = vmul.f32 %v3393_v47, %v2101_v58  ;;  %2830 = vst [vmem:[%s5699_s29 + $0x100] sm:$0xff] %v2702_v37  ;;  %v2576_v18 = vmul.f32 %v3394_v7, %v2099_v10  ;;  %v3395_v63 = vld [vmem:[%s7131_s0 + $0x128] sm:$0xff]  ;;  %v6134_v37 = vld [vmem:[%s3919_s26 + $0x2f8] sm:$0xff] }
 0x1fc   : > { %2216 = vrot.lane.b32.xlu1 %v6108_v32, %s3755_s17  ;;  %2214 = vrot.lane.b32.xlu0 %v6115_v8, %s3755_s17  ;;  %v2451_v26 = vmul.f32 %v3395_v63, %v5383_v43  ;;  %v3396_v47 = vld [vmem:[%s7131_s0 + $0x120] sm:$0xff]  ;;  %v3397_v10 = vld [vmem:[%s7132_s1 + $0x128] sm:$0xff] }
 0x1fd   : > { %v2705_v15 = vadd.f32 %v2577_v61, %v2449_v17  ;;  %v2704_v58 = vadd.f32 %v2576_v18, %v2448_v5  ;;  %v2450_v17 = vmul.f32 %v3396_v47, %v5393_v12  ;;  %v6141_v61 = vld [vmem:[%s3919_s26 + $0x2f0] sm:$0xff]  ;;  %v3398_v5 = vld [vmem:[%s7132_s1 + $0x120] sm:$0xff] }
 0x1fe   : > { %v2105_v11 = vpop.permute.xlu1 %2104  ;;  %v2103_v7 = vpop.permute.xlu0 %2102 }
 0x1ff   : > { %2833 = vst [vmem:[%s5699_s29 + $0x118] sm:$0xff] %v2705_v15  ;;  %v2579_v43 = vmul.f32 %v3397_v10, %v2105_v11  ;;  %2832 = vst [vmem:[%s5699_s29 + $0x110] sm:$0xff] %v2704_v58  ;;  %v2578_v18 = vmul.f32 %v3398_v5, %v2103_v7  ;;  %v3399_v15 = vld [vmem:[%s7131_s0 + $0x138] sm:$0xff]  ;;  %v6160_v58 = vld [vmem:[%s3919_s26 + $0x308] sm:$0xff] }
 0x200   : > { %2220 = vrot.lane.b32.xlu1 %v6134_v37, %s3755_s17  ;;  %2218 = vrot.lane.b32.xlu0 %v6141_v61, %s3755_s17  ;;  %v2453_v63 = vmul.f32 %v3399_v15, %v5409_v38  ;;  %v3400_v10 = vld [vmem:[%s7131_s0 + $0x130] sm:$0xff]  ;;  %v3401_v7 = vld [vmem:[%s7132_s1 + $0x138] sm:$0xff] }
 0x201   : > { %v2707_v12 = vadd.f32 %v2579_v43, %v2451_v26  ;;  %v2706_v11 = vadd.f32 %v2578_v18, %v2450_v17  ;;  %v2452_v26 = vmul.f32 %v3400_v10, %v5419_v0  ;;  %v6167_v43 = vld [vmem:[%s3919_s26 + $0x300] sm:$0xff]  ;;  %v3402_v17 = vld [vmem:[%s7132_s1 + $0x130] sm:$0xff] }
 0x202   : > { %v2109_v47 = vpop.permute.xlu1 %2108  ;;  %v2107_v5 = vpop.permute.xlu0 %2106 }
 0x203   : > { %2835 = vst [vmem:[%s5699_s29 + $0x128] sm:$0xff] %v2707_v12  ;;  %v2581_v38 = vmul.f32 %v3401_v7, %v2109_v47  ;;  %2834 = vst [vmem:[%s5699_s29 + $0x120] sm:$0xff] %v2706_v11  ;;  %v2580_v18 = vmul.f32 %v3402_v17, %v2107_v5  ;;  %v3403_v12 = vld [vmem:[%s7131_s0 + $0x148] sm:$0xff]  ;;  %v6186_v11 = vld [vmem:[%s3919_s26 + $0x318] sm:$0xff] }
 0x204   : > { %2224 = vrot.lane.b32.xlu1 %v6160_v58, %s3755_s17  ;;  %2222 = vrot.lane.b32.xlu0 %v6167_v43, %s3755_s17  ;;  %v2455_v15 = vmul.f32 %v3403_v12, %v5435_v4  ;;  %v3404_v7 = vld [vmem:[%s7131_s0 + $0x140] sm:$0xff]  ;;  %v3405_v5 = vld [vmem:[%s7132_s1 + $0x148] sm:$0xff] }
 0x205   : > { %v2709_v0 = vadd.f32 %v2581_v38, %v2453_v63  ;;  %v2708_v47 = vadd.f32 %v2580_v18, %v2452_v26  ;;  %v2454_v63 = vmul.f32 %v3404_v7, %v5445_v54  ;;  %v6193_v38 = vld [vmem:[%s3919_s26 + $0x310] sm:$0xff]  ;;  %v3406_v26 = vld [vmem:[%s7132_s1 + $0x140] sm:$0xff] }
 0x206   : > { %v2113_v10 = vpop.permute.xlu1 %2112  ;;  %v2111_v17 = vpop.permute.xlu0 %2110 }
 0x207   : > { %2837 = vst [vmem:[%s5699_s29 + $0x138] sm:$0xff] %v2709_v0  ;;  %v2583_v4 = vmul.f32 %v3405_v5, %v2113_v10  ;;  %2836 = vst [vmem:[%s5699_s29 + $0x130] sm:$0xff] %v2708_v47  ;;  %v2582_v18 = vmul.f32 %v3406_v26, %v2111_v17  ;;  %v3407_v0 = vld [vmem:[%s7131_s0 + $0x158] sm:$0xff]  ;;  %v6212_v47 = vld [vmem:[%s3919_s26 + $0x328] sm:$0xff] }
 0x208   : > { %2228 = vrot.lane.b32.xlu1 %v6186_v11, %s3755_s17  ;;  %2226 = vrot.lane.b32.xlu0 %v6193_v38, %s3755_s17  ;;  %v2457_v12 = vmul.f32 %v3407_v0, %v5461_v51  ;;  %v3408_v5 = vld [vmem:[%s7131_s0 + $0x150] sm:$0xff]  ;;  %v3409_v17 = vld [vmem:[%s7132_s1 + $0x158] sm:$0xff] }
 0x209   : > { %v2711_v54 = vadd.f32 %v2583_v4, %v2455_v15  ;;  %v2710_v10 = vadd.f32 %v2582_v18, %v2454_v63  ;;  %v2456_v15 = vmul.f32 %v3408_v5, %v5471_v57  ;;  %v6219_v4 = vld [vmem:[%s3919_s26 + $0x320] sm:$0xff]  ;;  %v3410_v63 = vld [vmem:[%s7132_s1 + $0x150] sm:$0xff] }
 0x20a   : > { %v2117_v7 = vpop.permute.xlu1 %2116  ;;  %v2115_v26 = vpop.permute.xlu0 %2114 }
 0x20b   : > { %2839 = vst [vmem:[%s5699_s29 + $0x148] sm:$0xff] %v2711_v54  ;;  %v2585_v51 = vmul.f32 %v3409_v17, %v2117_v7  ;;  %2838 = vst [vmem:[%s5699_s29 + $0x140] sm:$0xff] %v2710_v10  ;;  %v2584_v18 = vmul.f32 %v3410_v63, %v2115_v26  ;;  %v3411_v54 = vld [vmem:[%s7131_s0 + $0x168] sm:$0xff]  ;;  %v6238_v10 = vld [vmem:[%s3919_s26 + $0x338] sm:$0xff] }
 0x20c   : > { %2232 = vrot.lane.b32.xlu1 %v6212_v47, %s3755_s17  ;;  %2230 = vrot.lane.b32.xlu0 %v6219_v4, %s3755_s17  ;;  %v2459_v0 = vmul.f32 %v3411_v54, %v5487_v22  ;;  %v3412_v17 = vld [vmem:[%s7131_s0 + $0x160] sm:$0xff]  ;;  %v3413_v26 = vld [vmem:[%s7132_s1 + $0x168] sm:$0xff] }
 0x20d   : > { %v2713_v57 = vadd.f32 %v2585_v51, %v2457_v12  ;;  %v2712_v7 = vadd.f32 %v2584_v18, %v2456_v15  ;;  %v2458_v12 = vmul.f32 %v3412_v17, %v5497_v30  ;;  %v6245_v51 = vld [vmem:[%s3919_s26 + $0x330] sm:$0xff]  ;;  %v3414_v15 = vld [vmem:[%s7132_s1 + $0x160] sm:$0xff] }
 0x20e   : > { %v2121_v5 = vpop.permute.xlu1 %2120  ;;  %v2119_v63 = vpop.permute.xlu0 %2118 }
 0x20f   : > { %2841 = vst [vmem:[%s5699_s29 + $0x158] sm:$0xff] %v2713_v57  ;;  %v2587_v22 = vmul.f32 %v3413_v26, %v2121_v5  ;;  %2840 = vst [vmem:[%s5699_s29 + $0x150] sm:$0xff] %v2712_v7  ;;  %v2586_v18 = vmul.f32 %v3414_v15, %v2119_v63  ;;  %v3415_v57 = vld [vmem:[%s7131_s0 + $0x178] sm:$0xff]  ;;  %v6264_v7 = vld [vmem:[%s3919_s26 + $0x348] sm:$0xff] }
 0x210   : > { %2236 = vrot.lane.b32.xlu1 %v6238_v10, %s3755_s17  ;;  %2234 = vrot.lane.b32.xlu0 %v6245_v51, %s3755_s17  ;;  %v2461_v54 = vmul.f32 %v3415_v57, %v5513_v50  ;;  %v3416_v26 = vld [vmem:[%s7131_s0 + $0x170] sm:$0xff]  ;;  %v3417_v63 = vld [vmem:[%s7132_s1 + $0x178] sm:$0xff] }
 0x211   : > { %v2715_v30 = vadd.f32 %v2587_v22, %v2459_v0  ;;  %v2714_v5 = vadd.f32 %v2586_v18, %v2458_v12  ;;  %v2460_v0 = vmul.f32 %v3416_v26, %v5523_v45  ;;  %v6271_v22 = vld [vmem:[%s3919_s26 + $0x340] sm:$0xff]  ;;  %v3418_v12 = vld [vmem:[%s7132_s1 + $0x170] sm:$0xff] }
 0x212   : > { %v2125_v17 = vpop.permute.xlu1 %2124  ;;  %v2123_v15 = vpop.permute.xlu0 %2122 }
 0x213   : > { %2843 = vst [vmem:[%s5699_s29 + $0x168] sm:$0xff] %v2715_v30  ;;  %v2589_v50 = vmul.f32 %v3417_v63, %v2125_v17  ;;  %2842 = vst [vmem:[%s5699_s29 + $0x160] sm:$0xff] %v2714_v5  ;;  %v2588_v18 = vmul.f32 %v3418_v12, %v2123_v15  ;;  %v3419_v30 = vld [vmem:[%s7131_s0 + $0x188] sm:$0xff]  ;;  %v6290_v5 = vld [vmem:[%s3919_s26 + $0x358] sm:$0xff] }
 0x214   : > { %2240 = vrot.lane.b32.xlu1 %v6264_v7, %s3755_s17  ;;  %2238 = vrot.lane.b32.xlu0 %v6271_v22, %s3755_s17  ;;  %v2463_v57 = vmul.f32 %v3419_v30, %v5539_v48  ;;  %7196 = vst [vmem:[#allocation23_spill] sm:$0xff] %v6290_v5  ;;  %v3420_v63 = vld [vmem:[%s7131_s0 + $0x180] sm:$0xff]  ;;  %v3421_v15 = vld [vmem:[%s7132_s1 + $0x188] sm:$0xff] }
 0x215   : > { %v2717_v45 = vadd.f32 %v2589_v50, %v2461_v54  ;;  %v2716_v17 = vadd.f32 %v2588_v18, %v2460_v0  ;;  %v2462_v54 = vmul.f32 %v3420_v63, %v5549_v60  ;;  %v6297_v50 = vld [vmem:[%s3919_s26 + $0x350] sm:$0xff]  ;;  %v3422_v0 = vld [vmem:[%s7132_s1 + $0x180] sm:$0xff] }
 0x216   : > { %v2129_v26 = vpop.permute.xlu1 %2128  ;;  %7197 = vst [vmem:[#allocation24_spill] sm:$0xff] %v6297_v50  ;;  %v2127_v12 = vpop.permute.xlu0 %2126  ;;  %v7198_v30 = vld [vmem:[#allocation16_spill] sm:$0xff] }
 0x217   : > { %2845 = vst [vmem:[%s5699_s29 + $0x178] sm:$0xff] %v2717_v45  ;;  %v2591_v48 = vmul.f32 %v3421_v15, %v2129_v26  ;;  %2844 = vst [vmem:[%s5699_s29 + $0x170] sm:$0xff] %v2716_v17  ;;  %v2590_v18 = vmul.f32 %v3422_v0, %v2127_v12  ;;  %v3423_v45 = vld [vmem:[%s7131_s0 + $0x198] sm:$0xff]  ;;  %v6316_v17 = vld [vmem:[%s3919_s26 + $0x368] sm:$0xff] }
 0x218   : > { %2244 = vrot.lane.b32.xlu1 %v6290_v5, %s3755_s17  ;;  %2242 = vrot.lane.b32.xlu0 %v6297_v50, %s3755_s17  ;;  %v2465_v26 = vmul.f32 %v3423_v45, %v7198_v30  ;;  %7199 = vst [vmem:[#allocation16_spill] sm:$0xff] %v6316_v17  ;;  %v3424_v12 = vld [vmem:[%s7131_s0 + $0x190] sm:$0xff]  ;;  %v7200_v0 = vld [vmem:[#allocation17_spill] sm:$0xff]  ;;  %v3425_v50 = vld [vmem:[%s7132_s1 + $0x198] sm:$0xff] }
 0x219   : > { %v2719_v60 = vadd.f32 %v2591_v48, %v2463_v57  ;;  %v2718_v63 = vadd.f32 %v2590_v18, %v2462_v54  ;;  %v2464_v57 = vmul.f32 %v3424_v12, %v7200_v0  ;;  %v6323_v48 = vld [vmem:[%s3919_s26 + $0x360] sm:$0xff]  ;;  %v3426_v54 = vld [vmem:[%s7132_s1 + $0x190] sm:$0xff] }
 0x21a   : > { %v2133_v15 = vpop.permute.xlu1 %2132  ;;  %7201 = vst [vmem:[#allocation17_spill] sm:$0xff] %v6323_v48  ;;  %v2131_v30 = vpop.permute.xlu0 %2130 }
 0x21b   : > { %2847 = vst [vmem:[%s5699_s29 + $0x188] sm:$0xff] %v2719_v60  ;;  %v2593_v45 = vmul.f32 %v3425_v50, %v2133_v15  ;;  %2846 = vst [vmem:[%s5699_s29 + $0x180] sm:$0xff] %v2718_v63  ;;  %v2592_v18 = vmul.f32 %v3426_v54, %v2131_v30  ;;  %v3427_v50 = vld [vmem:[%s7131_s0 + $0x1a8] sm:$0xff]  ;;  %v7202_v60 = vld [vmem:[#allocation18_spill] sm:$0xff] }
 0x21c   : > { %2248 = vrot.lane.b32.xlu1 %v6316_v17, %s3755_s17  ;;  %2246 = vrot.lane.b32.xlu0 %v6323_v48, %s3755_s17  ;;  %v2467_v15 = vmul.f32 %v3427_v50, %v7202_v60  ;;  %v6342_v63 = vld [vmem:[%s3919_s26 + $0x378] sm:$0xff]  ;;  %v3428_v30 = vld [vmem:[%s7131_s0 + $0x1a0] sm:$0xff] }
 0x21d   : > { %v2721_v12 = vadd.f32 %v2593_v45, %v2465_v26  ;;  %v2720_v0 = vadd.f32 %v2592_v18, %v2464_v57  ;;  %v7203_v54 = vld [vmem:[#allocation19_spill] sm:$0xff]  ;;  %v6349_v45 = vld [vmem:[%s3919_s26 + $0x370] sm:$0xff]  ;;  %v3429_v48 = vld [vmem:[%s7132_s1 + $0x1a8] sm:$0xff] }
 0x21e   : > { %v2137_v5 = vpop.permute.xlu1 %2136  ;;  %v2466_v26 = vmul.f32 %v3428_v30, %v7203_v54  ;;  %v2135_v60 = vpop.permute.xlu0 %2134  ;;  %v3430_v57 = vld [vmem:[%s7132_s1 + $0x1a0] sm:$0xff] }
 0x21f   : > { %2849 = vst [vmem:[%s5699_s29 + $0x198] sm:$0xff] %v2721_v12  ;;  %v2595_v50 = vmul.f32 %v3429_v48, %v2137_v5  ;;  %2848 = vst [vmem:[%s5699_s29 + $0x190] sm:$0xff] %v2720_v0  ;;  %v2594_v18 = vmul.f32 %v3430_v57, %v2135_v60  ;;  %v3431_v5 = vld [vmem:[%s7131_s0 + $0x1b8] sm:$0xff]  ;;  %v7204_v48 = vld [vmem:[#allocation20_spill] sm:$0xff] }
 0x220   : > { %2252 = vrot.lane.b32.xlu1 %v6342_v63, %s3755_s17  ;;  %2250 = vrot.lane.b32.xlu0 %v6349_v45, %s3755_s17  ;;  %v2469_v12 = vmul.f32 %v3431_v5, %v7204_v48  ;;  %v6368_v0 = vld [vmem:[%s3919_s26 + $0x388] sm:$0xff]  ;;  %v3432_v60 = vld [vmem:[%s7131_s0 + $0x1b0] sm:$0xff] }
 0x221   : > { %v2723_v30 = vadd.f32 %v2595_v50, %v2467_v15  ;;  %7205 = vst [vmem:[#allocation18_spill] sm:$0xff] %v6368_v0  ;;  %v2722_v54 = vadd.f32 %v2594_v18, %v2466_v26  ;;  %v2468_v15 = vmul.f32 %v3432_v60, %v5627_v16  ;;  %v6375_v50 = vld [vmem:[%s3919_s26 + $0x380] sm:$0xff]  ;;  %v3433_v57 = vld [vmem:[%s7132_s1 + $0x1b8] sm:$0xff]  ;;  %v3434_v26 = vld [vmem:[%s7132_s1 + $0x1b0] sm:$0xff] }
 0x222   : > { %v2141_v17 = vpop.permute.xlu1 %2140  ;;  %7206 = vst [vmem:[#allocation19_spill] sm:$0xff] %v6375_v50  ;;  %v2139_v48 = vpop.permute.xlu0 %2138 }
 0x223   : > { %2851 = vst [vmem:[%s5699_s29 + $0x1a8] sm:$0xff] %v2723_v30  ;;  %v2597_v5 = vmul.f32 %v3433_v57, %v2141_v17  ;;  %2850 = vst [vmem:[%s5699_s29 + $0x1a0] sm:$0xff] %v2722_v54  ;;  %v2596_v18 = vmul.f32 %v3434_v26, %v2139_v48  ;;  %v3435_v17 = vld [vmem:[%s7131_s0 + $0x1c8] sm:$0xff]  ;;  %v6394_v54 = vld [vmem:[%s3919_s26 + $0x398] sm:$0xff] }
 0x224   : > { %2256 = vrot.lane.b32.xlu1 %v6368_v0, %s3755_s17  ;;  %2254 = vrot.lane.b32.xlu0 %v6375_v50, %s3755_s17  ;;  %v2471_v30 = vmul.f32 %v3435_v17, %v5643_v44  ;;  %v3436_v48 = vld [vmem:[%s7131_s0 + $0x1c0] sm:$0xff]  ;;  %v7207_v26 = vld [vmem:[#allocation21_spill] sm:$0xff] }
 0x225   : > { %v2725_v16 = vadd.f32 %v2597_v5, %v2469_v12  ;;  %v2724_v60 = vadd.f32 %v2596_v18, %v2468_v15  ;;  %v2470_v12 = vmul.f32 %v3436_v48, %v7207_v26  ;;  %v6401_v5 = vld [vmem:[%s3919_s26 + $0x390] sm:$0xff]  ;;  %v3437_v50 = vld [vmem:[%s7132_s1 + $0x1c8] sm:$0xff]  ;;  %v3438_v15 = vld [vmem:[%s7132_s1 + $0x1c0] sm:$0xff] }
 0x226   : > { %v2145_v57 = vpop.permute.xlu1 %2144  ;;  %v2143_v17 = vpop.permute.xlu0 %2142 }
 0x227   : > { %2853 = vst [vmem:[%s5699_s29 + $0x1b8] sm:$0xff] %v2725_v16  ;;  %v2599_v44 = vmul.f32 %v3437_v50, %v2145_v57  ;;  %2852 = vst [vmem:[%s5699_s29 + $0x1b0] sm:$0xff] %v2724_v60  ;;  %v2598_v18 = vmul.f32 %v3438_v15, %v2143_v17  ;;  %v3439_v50 = vld [vmem:[%s7131_s0 + $0x1d8] sm:$0xff]  ;;  %v7208_v16 = vld [vmem:[#allocation22_spill] sm:$0xff] }
 0x228   : > { %2260 = vrot.lane.b32.xlu1 %v6394_v54, %s3755_s17  ;;  %2258 = vrot.lane.b32.xlu0 %v6401_v5, %s3755_s17  ;;  %v2473_v57 = vmul.f32 %v3439_v50, %v7208_v16  ;;  %v6420_v60 = vld [vmem:[%s3919_s26 + $0x3a8] sm:$0xff]  ;;  %v3440_v17 = vld [vmem:[%s7131_s0 + $0x1d0] sm:$0xff] }
 0x229   : > { %v2727_v48 = vadd.f32 %v2599_v44, %v2471_v30  ;;  %v2726_v26 = vadd.f32 %v2598_v18, %v2470_v12  ;;  %v2472_v30 = vmul.f32 %v3440_v17, %v5670_v2  ;;  %v6427_v44 = vld [vmem:[%s3919_s26 + $0x3a0] sm:$0xff]  ;;  %v3441_v15 = vld [vmem:[%s7132_s1 + $0x1d8] sm:$0xff]  ;;  %v3442_v12 = vld [vmem:[%s7132_s1 + $0x1d0] sm:$0xff] }
 0x22a   : > { %v2149_v0 = vpop.permute.xlu1 %2148  ;;  %v2147_v16 = vpop.permute.xlu0 %2146 }
 0x22b   : > { %2855 = vst [vmem:[%s5699_s29 + $0x1c8] sm:$0xff] %v2727_v48  ;;  %v2601_v50 = vmul.f32 %v3441_v15, %v2149_v0  ;;  %2854 = vst [vmem:[%s5699_s29 + $0x1c0] sm:$0xff] %v2726_v26  ;;  %v2600_v18 = vmul.f32 %v3442_v12, %v2147_v16  ;;  %v3443_v0 = vld [vmem:[%s7131_s0 + $0x1e8] sm:$0xff]  ;;  %v6446_v26 = vld [vmem:[%s3919_s26 + $0x3b8] sm:$0xff] }
 0x22c   : > { %2264 = vrot.lane.b32.xlu1 %v6420_v60, %s3755_s17  ;;  %2262 = vrot.lane.b32.xlu0 %v6427_v44, %s3755_s17  ;;  %v2475_v48 = vmul.f32 %v3443_v0, %v5689_v35  ;;  %v3444_v16 = vld [vmem:[%s7131_s0 + $0x1e0] sm:$0xff]  ;;  %v3445_v12 = vld [vmem:[%s7132_s1 + $0x1e8] sm:$0xff] }
 0x22d   : > { %v2729_v2 = vadd.f32 %v2601_v50, %v2473_v57  ;;  %v2728_v17 = vadd.f32 %v2600_v18, %v2472_v30  ;;  %v2474_v57 = vmul.f32 %v3444_v16, %v5696_v33  ;;  %v6453_v50 = vld [vmem:[%s3919_s26 + $0x3b0] sm:$0xff]  ;;  %v3446_v30 = vld [vmem:[%s7132_s1 + $0x1e0] sm:$0xff] }
 0x22e   : > { %v2153_v15 = vpop.permute.xlu1 %2152  ;;  %v2151_v0 = vpop.permute.xlu0 %2150 }
 0x22f   : > { %2857 = vst [vmem:[%s5699_s29 + $0x1d8] sm:$0xff] %v2729_v2  ;;  %v2603_v35 = vmul.f32 %v3445_v12, %v2153_v15  ;;  %2856 = vst [vmem:[%s5699_s29 + $0x1d0] sm:$0xff] %v2728_v17  ;;  %v2602_v18 = vmul.f32 %v3446_v30, %v2151_v0  ;;  %v3447_v2 = vld [vmem:[%s7131_s0 + $0x1f8] sm:$0xff]  ;;  %v6472_v17 = vld [vmem:[%s3919_s26 + $0x3c8] sm:$0xff] }
 0x230   : > { %2268 = vrot.lane.b32.xlu1 %v6446_v26, %s3755_s17  ;;  %2266 = vrot.lane.b32.xlu0 %v6453_v50, %s3755_s17  ;;  %v2477_v15 = vmul.f32 %v3447_v2, %v5718_v39  ;;  %v3448_v0 = vld [vmem:[%s7131_s0 + $0x1f0] sm:$0xff]  ;;  %v3449_v30 = vld [vmem:[%s7132_s1 + $0x1f8] sm:$0xff] }
 0x231   : > { %v2731_v33 = vadd.f32 %v2603_v35, %v2475_v48  ;;  %v2730_v16 = vadd.f32 %v2602_v18, %v2474_v57  ;;  %v2476_v48 = vmul.f32 %v3448_v0, %v5725_v31  ;;  %v6479_v35 = vld [vmem:[%s3919_s26 + $0x3c0] sm:$0xff]  ;;  %v3450_v57 = vld [vmem:[%s7132_s1 + $0x1f0] sm:$0xff] }
 0x232   : > { %v2157_v12 = vpop.permute.xlu1 %2156  ;;  %v2155_v2 = vpop.permute.xlu0 %2154 }
 0x233   : > { %2859 = vst [vmem:[%s5699_s29 + $0x1e8] sm:$0xff] %v2731_v33  ;;  %v2605_v39 = vmul.f32 %v3449_v30, %v2157_v12  ;;  %2858 = vst [vmem:[%s5699_s29 + $0x1e0] sm:$0xff] %v2730_v16  ;;  %v2604_v18 = vmul.f32 %v3450_v57, %v2155_v2  ;;  %v3451_v33 = vld [vmem:[%s7131_s0 + $0x208] sm:$0xff]  ;;  %v6498_v12 = vld [vmem:[%s3919_s26 + $0x3d8] sm:$0xff] }
 0x234   : > { %2272 = vrot.lane.b32.xlu1 %v6472_v17, %s3755_s17  ;;  %2270 = vrot.lane.b32.xlu0 %v6479_v35, %s3755_s17  ;;  %v2479_v16 = vmul.f32 %v3451_v33, %v5744_v53  ;;  %v3452_v2 = vld [vmem:[%s7131_s0 + $0x200] sm:$0xff]  ;;  %v3453_v57 = vld [vmem:[%s7132_s1 + $0x208] sm:$0xff] }
 0x235   : > { %v2733_v31 = vadd.f32 %v2605_v39, %v2477_v15  ;;  %v2732_v0 = vadd.f32 %v2604_v18, %v2476_v48  ;;  %v2478_v15 = vmul.f32 %v3452_v2, %v5751_v28  ;;  %v6505_v39 = vld [vmem:[%s3919_s26 + $0x3d0] sm:$0xff]  ;;  %v3454_v48 = vld [vmem:[%s7132_s1 + $0x200] sm:$0xff] }
 0x236   : > { %v2161_v30 = vpop.permute.xlu1 %2160  ;;  %v2159_v33 = vpop.permute.xlu0 %2158 }
 0x237   : > { %2861 = vst [vmem:[%s5699_s29 + $0x1f8] sm:$0xff] %v2733_v31  ;;  %v2607_v53 = vmul.f32 %v3453_v57, %v2161_v30  ;;  %2860 = vst [vmem:[%s5699_s29 + $0x1f0] sm:$0xff] %v2732_v0  ;;  %v2606_v28 = vmul.f32 %v3454_v48, %v2159_v33  ;;  %v3455_v31 = vld [vmem:[%s7131_s0 + $0x218] sm:$0xff]  ;;  %v6533_v30 = vld [vmem:[%s3919_s26 + $0x3e8] sm:$0xff] }
 0x238   : > { %2276 = vrot.lane.b32.xlu1 %v6498_v12, %s3755_s17  ;;  %2274 = vrot.lane.b32.xlu0 %v6505_v39, %s3755_s17  ;;  %v2481_v0 = vmul.f32 %v3455_v31, %v5770_v3  ;;  %v6542_v33 = vld [vmem:[%s3919_s26 + $0x3e0] sm:$0xff]  ;;  %v3457_v3 = vld [vmem:[%s7132_s1 + $0x218] sm:$0xff] }
 0x239   : > { %v2735_v18 = vadd.f32 %v2607_v53, %v2479_v16  ;;  %v2734_v2 = vadd.f32 %v2606_v28, %v2478_v15  ;;  %v3456_v16 = vld [vmem:[%s7131_s0 + $0x210] sm:$0xff]  ;;  %7209 = vst [vmem:[#allocation20_spill] sm:$0xff] %v6542_v33 }
 0x23a   : > { %v2165_v57 = vpop.permute.xlu1 %2164  ;;  %v2480_v53 = vmul.f32 %v3456_v16, %v5777_v55  ;;  %v2163_v31 = vpop.permute.xlu0 %2162 }
 0x23b   : > { %2863 = vst [vmem:[%s5699_s29 + $0x208] sm:$0xff] %v2735_v18  ;;  %v2609_v48 = vmul.f32 %v3457_v3, %v2165_v57 }
 0x23c   : > { %3648 = shalt.err (!%p3645_p7)
}
 0x23d   : > { %s3649_s28 = scalar_lea.hbm %s6524_s13, 16384  ;;  %s3653_s25 = scalar_lea.hbm %s7135_s4, 32768 }
 0x23e   : > { %p3650_p10 = scmp.ne.s32.totalorder %s6524_s13, %s3649_s28  ;;  %p3654_p3 = scmp.lt.s32.totalorder %s6524_s13, %s7135_s4 }
 0x23f   : > { %p3655_p8 = scmp.lt.s32.totalorder %s3653_s25, %s3649_s28 }
 0x240   : > { %p3651_p1 = pnand %p3650_p10, %p3841_p9 }
 0x241   : > { %p3656_p0 = por %p3655_p8, %p3654_p3 }
 0x242   : > { %p3652_p13 = pneg %p3651_p1 }
 0x244   : > { %p3657_p2 = pnand %p3656_p0, %p3652_p13 }
 0x246   : > { %3660 = shalt.err (!%p3657_p2)
}
 0x247   : > { %s3757_s24 = smov 128   ;;  %s3758_s2 = smov 8   ;;  %2862 = vst [vmem:[%s5699_s29 + $0x200] sm:$0xff] %v2734_v2  ;;  %v3458_v55 = vld [vmem:[%s7132_s1 + $0x210] sm:$0xff]  ;;  %2280 = vrot.lane.b32.xlu1 %v6533_v30, %s3755_s17  ;;  %v2737_v28 = vadd.f32 %v2609_v48, %v2481_v0  ;;  %2278 = vrot.lane.b32.xlu0 %v6542_v33, %s3755_s17  ;;  %v2169_v3 = vpop.permute.xlu1 %2168 }
 0x248   : > { %3176 = dma.vmem_to_hbm [thread:$0]  (%p3841_p9), %s6535_s10, 16384, %s6524_s13, %s2927_s7, %s3757_s24, %s3757_s24, %s3758_s2   ;;  %v2608_v15 = vmul.f32 %v3458_v55, %v2163_v31 }
 0x249   : > { %v3459_v18 = vld [vmem:[%s7131_s0 + $0x228] sm:$0xff]  ;;  %v6587_v2 = vld [vmem:[%s3919_s26 + $0x3f8] sm:$0xff]  ;;  %v3460_v31 = vld [vmem:[%s7131_s0 + $0x220] sm:$0xff]  ;;  %2865 = vst [vmem:[%s5699_s29 + $0x218] sm:$0xff] %v2737_v28  ;;  %s2965_s7 = sshll.u32 %s5699_s29, 4  ;;  %s7078_s16 = scalar_lea.hbm %s7136_s5, %s3170_s11  ;;  %s7080_s7 = int_to_ptr.vmem [resolvable:$true] %s2965_s7 }
 0x24a   : > { %v2483_v57 = vmul.f32 %v3459_v18, %v5796_v40  ;;  %v2736_v16 = vadd.f32 %v2608_v15, %v2480_v53  ;;  %v2482_v55 = vmul.f32 %v3460_v31, %v5803_v25  ;;  %v6594_v0 = vld [vmem:[%s3919_s26 + $0x3f0] sm:$0xff]  ;;  %v3461_v48 = vld [vmem:[%s7132_s1 + $0x228] sm:$0xff]  ;;  %v2167_v40 = vpop.permute.xlu0 %2166  ;;  %v3462_v53 = vld [vmem:[%s7132_s1 + $0x220] sm:$0xff]  ;;  %s2932_s30 = scalar_lea.sflag [#allocation9], %s3904_s9  ;;  %s3661_s12 = scalar_lea.vmem %s7080_s7, 16384 }
 0x24b   : > { %v2611_v33 = vmul.f32 %v3461_v48, %v2169_v3  ;;  %v2610_v15 = vmul.f32 %v3462_v53, %v2167_v40  ;;  %2284 = vrot.lane.b32.xlu1 %v6587_v2, %s3755_s17  ;;  %2282 = vrot.lane.b32.xlu0 %v6594_v0, %s3755_s17  ;;  %v3463_v28 = vld [vmem:[%s7131_s0 + $0x238] sm:$0xff]  ;;  %v2173_v3 = vpop.permute.xlu1 %2172  ;;  %v3464_v31 = vld [vmem:[%s7131_s0 + $0x230] sm:$0xff]  ;;  %p3662_p5 = scmp.ne.s32.totalorder %s7080_s7, %s3661_s12  ;;  %s3759_s28 = smov [#allocation8]  }
 0x24c   : > { %2864 = vst [vmem:[%s5699_s29 + $0x210] sm:$0xff] %v2736_v16  ;;  %v2485_v18 = vmul.f32 %v3463_v28, %v5822_v34  ;;  %v2484_v48 = vmul.f32 %v3464_v31, %v5829_v56  ;;  %v3466_v34 = vld [vmem:[%s7132_s1 + $0x230] sm:$0xff]  ;;  %s3665_s21 = sshll.u32 %s3759_s28, 4  ;;  %s3666_s21 = int_to_ptr.vmem [resolvable:$false] %s3665_s21 }
 0x24d   : > { %v2739_v25 = vadd.f32 %v2611_v33, %v2483_v57  ;;  %v2738_v16 = vadd.f32 %v2610_v15, %v2482_v55  ;;  %v3465_v33 = vld [vmem:[%s7132_s1 + $0x238] sm:$0xff]  ;;  %v3467_v15 = vld [vmem:[%s7131_s0 + $0x248] sm:$0xff]  ;;  %p3663_p6 = pnand %p3662_p5, %p3841_p9  ;;  %s3667_s15 = scalar_lea.vmem %s3666_s21, 32768 }
 0x24e   : > { %v2613_v57 = vmul.f32 %v3465_v33, %v2173_v3  ;;  %v2171_v40 = vpop.permute.xlu0 %2170  ;;  %v2487_v56 = vmul.f32 %v3467_v15, %v5848_v29  ;;  %v3468_v3 = vld [vmem:[%s7131_s0 + $0x240] sm:$0xff]  ;;  %p3668_p7 = scmp.lt.s32.totalorder %s7080_s7, %s3666_s21  ;;  %p3669_p10 = scmp.lt.s32.totalorder %s3667_s15, %s3661_s12 }
 0x24f   : > { %2867 = vst [vmem:[%s5699_s29 + $0x228] sm:$0xff] %v2739_v25  ;;  %2866 = vst [vmem:[%s5699_s29 + $0x220] sm:$0xff] %v2738_v16  ;;  %v2612_v55 = vmul.f32 %v3466_v34, %v2171_v40  ;;  %v2177_v28 = vpop.permute.xlu1 %2176  ;;  %v2486_v16 = vmul.f32 %v3468_v3, %v5855_v42  ;;  %v3470_v29 = vld [vmem:[%s7132_s1 + $0x240] sm:$0xff]  ;;  %v3471_v40 = vld [vmem:[%s7131_s0 + $0x258] sm:$0xff]  ;;  %p3664_p4 = pneg %p3663_p6 }
 0x250   : > { %v2741_v53 = vadd.f32 %v2613_v57, %v2485_v18  ;;  %v3469_v18 = vld [vmem:[%s7132_s1 + $0x248] sm:$0xff]  ;;  %v2489_v42 = vmul.f32 %v3471_v40, %v5874_v52  ;;  %v3474_v52 = vld [vmem:[%s7132_s1 + $0x250] sm:$0xff]  ;;  %p3670_p1 = por %p3669_p10, %p3668_p7 }
 0x251   : > { %v2740_v25 = vadd.f32 %v2612_v55, %v2484_v48  ;;  %v2615_v31 = vmul.f32 %v3469_v18, %v2177_v28  ;;  %v3475_v18 = vld [vmem:[%s7131_s0 + $0x268] sm:$0xff] }
 0x252   : > { %2869 = vst [vmem:[%s5699_s29 + $0x238] sm:$0xff] %v2741_v53  ;;  %v2175_v33 = vpop.permute.xlu0 %2174  ;;  %v3472_v53 = vld [vmem:[%s7131_s0 + $0x250] sm:$0xff]  ;;  %p3671_p13 = pnand %p3670_p1, %p3664_p4 }
 0x253   : > { %2868 = vst [vmem:[%s5699_s29 + $0x230] sm:$0xff] %v2740_v25  ;;  %v2614_v48 = vmul.f32 %v3470_v29, %v2175_v33  ;;  %v2743_v57 = vadd.f32 %v2615_v31, %v2487_v56  ;;  %v2181_v55 = vpop.permute.xlu1 %2180  ;;  %v2488_v15 = vmul.f32 %v3472_v53, %v5881_v41  ;;  %v3473_v56 = vld [vmem:[%s7132_s1 + $0x258] sm:$0xff]  ;;  %v2491_v41 = vmul.f32 %v3475_v18, %v5900_v49  ;;  %v3476_v29 = vld [vmem:[%s7131_s0 + $0x260] sm:$0xff] }
 0x254   : > { %v2617_v25 = vmul.f32 %v3473_v56, %v2181_v55  ;;  %v3478_v49 = vld [vmem:[%s7132_s1 + $0x260] sm:$0xff]  ;;  %v3479_v53 = vld [vmem:[%s7131_s0 + $0x278] sm:$0xff] }
 0x255   : > { %v2742_v34 = vadd.f32 %v2614_v48, %v2486_v16  ;;  %2871 = vst [vmem:[%s5699_s29 + $0x248] sm:$0xff] %v2743_v57  ;;  %v2490_v48 = vmul.f32 %v3476_v29, %v5907_v9  ;;  %v3477_v57 = vld [vmem:[%s7132_s1 + $0x268] sm:$0xff]  ;;  %v2493_v9 = vmul.f32 %v3479_v53, %v5926_v59  ;;  %v3482_v59 = vld [vmem:[%s7132_s1 + $0x270] sm:$0xff]  ;;  %v3487_v53 = vld [vmem:[%s7131_s0 + $0x298] sm:$0xff] }
 0x256   : > { %v2179_v28 = vpop.permute.xlu0 %2178  ;;  %v2745_v16 = vadd.f32 %v2617_v25, %v2489_v42  ;;  %v3480_v25 = vld [vmem:[%s7131_s0 + $0x270] sm:$0xff] }
 0x257   : > { %2870 = vst [vmem:[%s5699_s29 + $0x240] sm:$0xff] %v2742_v34  ;;  %v2616_v3 = vmul.f32 %v3474_v52, %v2179_v28  ;;  %v2185_v33 = vpop.permute.xlu1 %2184  ;;  %v2492_v28 = vmul.f32 %v3480_v25, %v5933_v1  ;;  %v3481_v52 = vld [vmem:[%s7132_s1 + $0x278] sm:$0xff] }
 0x258   : > { %2873 = vst [vmem:[%s5699_s29 + $0x258] sm:$0xff] %v2745_v16  ;;  %v2619_v40 = vmul.f32 %v3477_v57, %v2185_v33 }
 0x259   : > { %v2744_v31 = vadd.f32 %v2616_v3, %v2488_v15 }
 0x25a   : > { %v2183_v42 = vpop.permute.xlu0 %2182  ;;  %v2747_v55 = vadd.f32 %v2619_v40, %v2491_v41  ;;  %v3485_v40 = vld [vmem:[%s7132_s1 + $0x288] sm:$0xff] }
 0x25b   : > { %2872 = vst [vmem:[%s5699_s29 + $0x250] sm:$0xff] %v2744_v31  ;;  %v2618_v34 = vmul.f32 %v3478_v49, %v2183_v42  ;;  %v2189_v56 = vpop.permute.xlu1 %2188  ;;  %v3483_v31 = vld [vmem:[%s7131_s0 + $0x288] sm:$0xff] }
 0x25c   : > { %2875 = vst [vmem:[%s5699_s29 + $0x268] sm:$0xff] %v2747_v55  ;;  %v2621_v3 = vmul.f32 %v3481_v52, %v2189_v56  ;;  %v2495_v1 = vmul.f32 %v3483_v31, %v5952_v23  ;;  %v3486_v23 = vld [vmem:[%s7132_s1 + $0x280] sm:$0xff]  ;;  %v3488_v56 = vld [vmem:[%s7131_s0 + $0x290] sm:$0xff] }
 0x25d   : > { %v2746_v15 = vadd.f32 %v2618_v34, %v2490_v48  ;;  %v3484_v48 = vld [vmem:[%s7131_s0 + $0x280] sm:$0xff]  ;;  %v2496_v25 = vmul.f32 %v3488_v56, %v5985_v62 }
 0x25e   : > { %v2187_v16 = vpop.permute.xlu0 %2186  ;;  %v2749_v41 = vadd.f32 %v2621_v3, %v2493_v9  ;;  %v2494_v57 = vmul.f32 %v3484_v48, %v5959_v20  ;;  %v2497_v20 = vmul.f32 %v3487_v53, %v5978_v6  ;;  %v3490_v6 = vld [vmem:[%s7132_s1 + $0x290] sm:$0xff] }
 0x25f   : > { %2874 = vst [vmem:[%s5699_s29 + $0x260] sm:$0xff] %v2746_v15  ;;  %v2620_v18 = vmul.f32 %v3482_v59, %v2187_v16  ;;  %v2193_v29 = vpop.permute.xlu1 %2192 }
 0x260   : > { %2877 = vst [vmem:[%s5699_s29 + $0x278] sm:$0xff] %v2749_v41  ;;  %v2623_v42 = vmul.f32 %v3485_v40, %v2193_v29  ;;  %v3493_v29 = vld [vmem:[%s7132_s1 + $0x2a8] sm:$0xff] }
 0x261   : > { %v2748_v33 = vadd.f32 %v2620_v18, %v2492_v28  ;;  %v3489_v28 = vld [vmem:[%s7132_s1 + $0x298] sm:$0xff]  ;;  %v3491_v18 = vld [vmem:[%s7131_s0 + $0x2a8] sm:$0xff] }
 0x262   : > { %v2191_v49 = vpop.permute.xlu0 %2190  ;;  %v2751_v55 = vadd.f32 %v2623_v42, %v2495_v1  ;;  %v2499_v62 = vmul.f32 %v3491_v18, %v6004_v27  ;;  %v3492_v1 = vld [vmem:[%s7131_s0 + $0x2a0] sm:$0xff] }
 0x263   : > { %2876 = vst [vmem:[%s5699_s29 + $0x270] sm:$0xff] %v2748_v33  ;;  %v2622_v34 = vmul.f32 %v3486_v23, %v2191_v49  ;;  %v2197_v15 = vpop.permute.xlu1 %2196  ;;  %v2498_v33 = vmul.f32 %v3492_v1, %v6011_v13  ;;  %v3494_v27 = vld [vmem:[%s7132_s1 + $0x2a0] sm:$0xff]  ;;  %v3495_v49 = vld [vmem:[%s7131_s0 + $0x2b8] sm:$0xff] }
 0x264   : > { %2879 = vst [vmem:[%s5699_s29 + $0x288] sm:$0xff] %v2751_v55  ;;  %v2625_v52 = vmul.f32 %v3489_v28, %v2197_v15  ;;  %v2501_v13 = vmul.f32 %v3495_v49, %v6030_v36  ;;  %v3496_v55 = vld [vmem:[%s7131_s0 + $0x2b0] sm:$0xff]  ;;  %v3499_v28 = vld [vmem:[%s7131_s0 + $0x2c8] sm:$0xff]  ;;  %v3503_v1 = vld [vmem:[%s7131_s0 + $0x2d8] sm:$0xff] }
 0x265   : > { %v2750_v9 = vadd.f32 %v2622_v34, %v2494_v57  ;;  %v2500_v53 = vmul.f32 %v3496_v55, %v6037_v19  ;;  %v3498_v36 = vld [vmem:[%s7132_s1 + $0x2b0] sm:$0xff]  ;;  %v2503_v19 = vmul.f32 %v3499_v28, %v6056_v24  ;;  %v3502_v24 = vld [vmem:[%s7132_s1 + $0x2c0] sm:$0xff]  ;;  %v3511_v28 = vld [vmem:[%s7131_s0 + $0x2f8] sm:$0xff] }
 0x266   : > { %v2195_v3 = vpop.permute.xlu0 %2194  ;;  %v2753_v59 = vadd.f32 %v2625_v52, %v2497_v20  ;;  %v3497_v20 = vld [vmem:[%s7132_s1 + $0x2b8] sm:$0xff] }
 0x267   : > { %2878 = vst [vmem:[%s5699_s29 + $0x280] sm:$0xff] %v2750_v9  ;;  %v2624_v16 = vmul.f32 %v3490_v6, %v2195_v3  ;;  %v2201_v31 = vpop.permute.xlu1 %2200  ;;  %v3500_v6 = vld [vmem:[%s7131_s0 + $0x2c0] sm:$0xff] }
 0x268   : > { %2881 = vst [vmem:[%s5699_s29 + $0x298] sm:$0xff] %v2753_v59  ;;  %v2627_v48 = vmul.f32 %v3493_v29, %v2201_v31  ;;  %v3501_v59 = vld [vmem:[%s7132_s1 + $0x2c8] sm:$0xff] }
 0x269   : > { %v2752_v41 = vadd.f32 %v2624_v16, %v2496_v25  ;;  %v2502_v16 = vmul.f32 %v3500_v6, %v6063_v46  ;;  %v2505_v46 = vmul.f32 %v3503_v1, %v6082_v21  ;;  %v3506_v21 = vld [vmem:[%s7132_s1 + $0x2d0] sm:$0xff] }
 0x26a   : > { %v2199_v57 = vpop.permute.xlu0 %2198  ;;  %v2755_v42 = vadd.f32 %v2627_v48, %v2499_v62  ;;  %v3504_v48 = vld [vmem:[%s7131_s0 + $0x2d0] sm:$0xff] }
 0x26b   : > { %2880 = vst [vmem:[%s5699_s29 + $0x290] sm:$0xff] %v2752_v41  ;;  %v2626_v40 = vmul.f32 %v3494_v27, %v2199_v57  ;;  %v2205_v34 = vpop.permute.xlu1 %2204  ;;  %v2504_v57 = vmul.f32 %v3504_v48, %v6089_v14  ;;  %v3505_v27 = vld [vmem:[%s7132_s1 + $0x2d8] sm:$0xff] }
 0x26c   : > { %2883 = vst [vmem:[%s5699_s29 + $0x2a8] sm:$0xff] %v2755_v42  ;;  %v2629_v9 = vmul.f32 %v3497_v20, %v2205_v34 }
 0x26d   : > { %v2754_v23 = vadd.f32 %v2626_v40, %v2498_v33 }
 0x26e   : > { %v2203_v15 = vpop.permute.xlu0 %2202  ;;  %v2757_v25 = vadd.f32 %v2629_v9, %v2501_v13  ;;  %v3509_v9 = vld [vmem:[%s7132_s1 + $0x2e8] sm:$0xff] }
 0x26f   : > { %2882 = vst [vmem:[%s5699_s29 + $0x2a0] sm:$0xff] %v2754_v23  ;;  %v2628_v56 = vmul.f32 %v3498_v36, %v2203_v15  ;;  %v2209_v3 = vpop.permute.xlu1 %2208  ;;  %v3507_v23 = vld [vmem:[%s7131_s0 + $0x2e8] sm:$0xff] }
 0x270   : > { %2885 = vst [vmem:[%s5699_s29 + $0x2b8] sm:$0xff] %v2757_v25  ;;  %v2631_v18 = vmul.f32 %v3501_v59, %v2209_v3  ;;  %v2507_v14 = vmul.f32 %v3507_v23, %v6108_v32  ;;  %v3510_v32 = vld [vmem:[%s7132_s1 + $0x2e0] sm:$0xff]  ;;  %v3512_v3 = vld [vmem:[%s7131_s0 + $0x2f0] sm:$0xff] }
 0x271   : > { %v2756_v52 = vadd.f32 %v2628_v56, %v2500_v53  ;;  %v3508_v53 = vld [vmem:[%s7131_s0 + $0x2e0] sm:$0xff]  ;;  %v2508_v6 = vmul.f32 %v3512_v3, %v6141_v61  ;;  %v3527_v3 = vld [vmem:[%s7131_s0 + $0x338] sm:$0xff] }
 0x272   : > { %v2207_v62 = vpop.permute.xlu0 %2206  ;;  %v2759_v31 = vadd.f32 %v2631_v18, %v2503_v19  ;;  %v2506_v20 = vmul.f32 %v3508_v53, %v6115_v8  ;;  %v2509_v8 = vmul.f32 %v3511_v28, %v6134_v37  ;;  %v3514_v37 = vld [vmem:[%s7132_s1 + $0x2f0] sm:$0xff] }
 0x273   : > { %2884 = vst [vmem:[%s5699_s29 + $0x2b0] sm:$0xff] %v2756_v52  ;;  %v2630_v41 = vmul.f32 %v3502_v24, %v2207_v62  ;;  %v2213_v29 = vpop.permute.xlu1 %2212 }
 0x274   : > { %2887 = vst [vmem:[%s5699_s29 + $0x2c8] sm:$0xff] %v2759_v31  ;;  %v2633_v40 = vmul.f32 %v3505_v27, %v2213_v29  ;;  %v3517_v29 = vld [vmem:[%s7132_s1 + $0x308] sm:$0xff] }
 0x275   : > { %v2758_v33 = vadd.f32 %v2630_v41, %v2502_v16  ;;  %v3513_v16 = vld [vmem:[%s7132_s1 + $0x2f8] sm:$0xff]  ;;  %v3515_v41 = vld [vmem:[%s7131_s0 + $0x308] sm:$0xff] }
 0x276   : > { %v2211_v42 = vpop.permute.xlu0 %2210  ;;  %v2761_v13 = vadd.f32 %v2633_v40, %v2505_v46  ;;  %v2511_v61 = vmul.f32 %v3515_v41, %v6160_v58  ;;  %v3516_v46 = vld [vmem:[%s7131_s0 + $0x300] sm:$0xff] }
 0x277   : > { %2886 = vst [vmem:[%s5699_s29 + $0x2c0] sm:$0xff] %v2758_v33  ;;  %v2632_v49 = vmul.f32 %v3506_v21, %v2211_v42  ;;  %v2217_v55 = vpop.permute.xlu1 %2216  ;;  %v2510_v33 = vmul.f32 %v3516_v46, %v6167_v43  ;;  %v3518_v58 = vld [vmem:[%s7132_s1 + $0x300] sm:$0xff]  ;;  %v3519_v42 = vld [vmem:[%s7131_s0 + $0x318] sm:$0xff] }
 0x278   : > { %2889 = vst [vmem:[%s5699_s29 + $0x2d8] sm:$0xff] %v2761_v13  ;;  %v2635_v15 = vmul.f32 %v3509_v9, %v2217_v55  ;;  %v2513_v43 = vmul.f32 %v3519_v42, %v6186_v11  ;;  %v3520_v13 = vld [vmem:[%s7131_s0 + $0x310] sm:$0xff]  ;;  %v3523_v9 = vld [vmem:[%s7131_s0 + $0x328] sm:$0xff]  ;;  %v3535_v42 = vld [vmem:[%s7131_s0 + $0x358] sm:$0xff] }
 0x279   : > { %v2760_v34 = vadd.f32 %v2632_v49, %v2504_v57  ;;  %v2512_v23 = vmul.f32 %v3520_v13, %v6193_v38  ;;  %v3522_v11 = vld [vmem:[%s7132_s1 + $0x310] sm:$0xff]  ;;  %v2515_v38 = vmul.f32 %v3523_v9, %v6212_v47  ;;  %v3526_v47 = vld [vmem:[%s7132_s1 + $0x320] sm:$0xff] }
 0x27a   : > { %v2215_v36 = vpop.permute.xlu0 %2214  ;;  %v2763_v25 = vadd.f32 %v2635_v15, %v2507_v14  ;;  %v3521_v14 = vld [vmem:[%s7132_s1 + $0x318] sm:$0xff]  ;;  %v3536_v13 = vld [vmem:[%s7131_s0 + $0x350] sm:$0xff] }
 0x27b   : > { %2888 = vst [vmem:[%s5699_s29 + $0x2d0] sm:$0xff] %v2760_v34  ;;  %v2634_v56 = vmul.f32 %v3510_v32, %v2215_v36  ;;  %v2221_v52 = vpop.permute.xlu1 %2220  ;;  %v3524_v32 = vld [vmem:[%s7131_s0 + $0x320] sm:$0xff] }
 0x27c   : > { %2891 = vst [vmem:[%s5699_s29 + $0x2e8] sm:$0xff] %v2763_v25  ;;  %v2637_v59 = vmul.f32 %v3513_v16, %v2221_v52  ;;  %v3525_v25 = vld [vmem:[%s7132_s1 + $0x328] sm:$0xff] }
 0x27d   : > { %v2762_v19 = vadd.f32 %v2634_v56, %v2506_v20  ;;  %v2514_v56 = vmul.f32 %v3524_v32, %v6219_v4  ;;  %v2517_v4 = vmul.f32 %v3527_v3, %v6238_v10  ;;  %v3530_v10 = vld [vmem:[%s7132_s1 + $0x330] sm:$0xff]  ;;  %v3542_v3 = vld [vmem:[%s7132_s1 + $0x360] sm:$0xff] }
 0x27e   : > { %v2219_v18 = vpop.permute.xlu0 %2218  ;;  %v2765_v24 = vadd.f32 %v2637_v59, %v2509_v8  ;;  %v3528_v59 = vld [vmem:[%s7131_s0 + $0x330] sm:$0xff] }
 0x27f   : > { %2890 = vst [vmem:[%s5699_s29 + $0x2e0] sm:$0xff] %v2762_v19  ;;  %v2636_v62 = vmul.f32 %v3514_v37, %v2219_v18  ;;  %v2225_v1 = vpop.permute.xlu1 %2224  ;;  %v2516_v18 = vmul.f32 %v3528_v59, %v6245_v51  ;;  %v3529_v37 = vld [vmem:[%s7132_s1 + $0x338] sm:$0xff] }
 0x280   : > { %2893 = vst [vmem:[%s5699_s29 + $0x2f8] sm:$0xff] %v2765_v24  ;;  %v2639_v48 = vmul.f32 %v3517_v29, %v2225_v1 }
 0x281   : > { %v2764_v31 = vadd.f32 %v2636_v62, %v2508_v6 }
 0x282   : > { %v2223_v57 = vpop.permute.xlu0 %2222  ;;  %v2767_v40 = vadd.f32 %v2639_v48, %v2511_v61  ;;  %v3533_v48 = vld [vmem:[%s7132_s1 + $0x348] sm:$0xff] }
 0x283   : > { %2892 = vst [vmem:[%s5699_s29 + $0x2f0] sm:$0xff] %v2764_v31  ;;  %v2638_v27 = vmul.f32 %v3518_v58, %v2223_v57  ;;  %v2229_v49 = vpop.permute.xlu1 %2228  ;;  %v3531_v31 = vld [vmem:[%s7131_s0 + $0x348] sm:$0xff] }
 0x284   : > { %2895 = vst [vmem:[%s5699_s29 + $0x308] sm:$0xff] %v2767_v40  ;;  %v2641_v34 = vmul.f32 %v3521_v14, %v2229_v49  ;;  %v2519_v51 = vmul.f32 %v3531_v31, %v6264_v7  ;;  %v3534_v7 = vld [vmem:[%s7132_s1 + $0x340] sm:$0xff] }
 0x285   : > { %v2766_v21 = vadd.f32 %v2638_v27, %v2510_v33  ;;  %v3532_v33 = vld [vmem:[%s7131_s0 + $0x340] sm:$0xff] }
 0x286   : > { %v2227_v55 = vpop.permute.xlu0 %2226  ;;  %v2769_v20 = vadd.f32 %v2641_v34, %v2513_v43  ;;  %v2518_v29 = vmul.f32 %v3532_v33, %v6271_v22  ;;  %v7210_v22 = vld [vmem:[#allocation23_spill] sm:$0xff] }
 0x287   : > { %2894 = vst [vmem:[%s5699_s29 + $0x300] sm:$0xff] %v2766_v21  ;;  %v2640_v53 = vmul.f32 %v3522_v11, %v2227_v55  ;;  %v2233_v36 = vpop.permute.xlu1 %2232  ;;  %v2521_v43 = vmul.f32 %v3535_v42, %v7210_v22  ;;  %v3537_v34 = vld [vmem:[%s7132_s1 + $0x358] sm:$0xff]  ;;  %v3550_v42 = vld [vmem:[%s7132_s1 + $0x380] sm:$0xff] }
 0x288   : > { %2897 = vst [vmem:[%s5699_s29 + $0x318] sm:$0xff] %v2769_v20  ;;  %v2643_v28 = vmul.f32 %v3525_v25, %v2233_v36  ;;  %v3540_v25 = vld [vmem:[%s7131_s0 + $0x360] sm:$0xff] }
 0x289   : > { %v2768_v15 = vadd.f32 %v2640_v53, %v2512_v23  ;;  %v7211_v23 = vld [vmem:[#allocation24_spill] sm:$0xff]  ;;  %v3538_v53 = vld [vmem:[%s7132_s1 + $0x350] sm:$0xff] }
 0x28a   : > { %v2231_v8 = vpop.permute.xlu0 %2230  ;;  %v2771_v52 = vadd.f32 %v2643_v28, %v2515_v38  ;;  %v2520_v14 = vmul.f32 %v3536_v13, %v7211_v23  ;;  %v3539_v38 = vld [vmem:[%s7131_s0 + $0x368] sm:$0xff] }
 0x28b   : > { %2896 = vst [vmem:[%s5699_s29 + $0x310] sm:$0xff] %v2768_v15  ;;  %v2642_v19 = vmul.f32 %v3526_v47, %v2231_v8  ;;  %v2237_v16 = vpop.permute.xlu1 %2236  ;;  %v7212_v15 = vld [vmem:[#allocation16_spill] sm:$0xff]  ;;  %v7213_v28 = vld [vmem:[#allocation17_spill] sm:$0xff] }
 0x28c   : > { %2899 = vst [vmem:[%s5699_s29 + $0x328] sm:$0xff] %v2771_v52  ;;  %v2645_v62 = vmul.f32 %v3529_v37, %v2237_v16  ;;  %v2523_v36 = vmul.f32 %v3539_v38, %v7212_v15  ;;  %v2522_v8 = vmul.f32 %v3540_v25, %v7213_v28  ;;  %v3541_v47 = vld [vmem:[%s7132_s1 + $0x368] sm:$0xff]  ;;  %v3543_v16 = vld [vmem:[%s7131_s0 + $0x378] sm:$0xff] }
 0x28d   : > { %v2770_v6 = vadd.f32 %v2642_v19, %v2514_v56  ;;  %v2525_v59 = vmul.f32 %v3543_v16, %v6342_v63  ;;  %v3546_v63 = vld [vmem:[%s7132_s1 + $0x370] sm:$0xff]  ;;  %v3555_v38 = vld [vmem:[%s7131_s0 + $0x3a8] sm:$0xff] }
 0x28e   : > { %v2235_v24 = vpop.permute.xlu0 %2234  ;;  %v2773_v61 = vadd.f32 %v2645_v62, %v2517_v4  ;;  %v3544_v62 = vld [vmem:[%s7131_s0 + $0x370] sm:$0xff]  ;;  %v3557_v25 = vld [vmem:[%s7132_s1 + $0x3a8] sm:$0xff] }
 0x28f   : > { %2898 = vst [vmem:[%s5699_s29 + $0x320] sm:$0xff] %v2770_v6  ;;  %v2644_v41 = vmul.f32 %v3530_v10, %v2235_v24  ;;  %v2241_v46 = vpop.permute.xlu1 %2240  ;;  %v2524_v24 = vmul.f32 %v3544_v62, %v6349_v45  ;;  %v3545_v10 = vld [vmem:[%s7132_s1 + $0x378] sm:$0xff]  ;;  %v7214_v45 = vld [vmem:[#allocation18_spill] sm:$0xff] }
 0x290   : > { %2901 = vst [vmem:[%s5699_s29 + $0x338] sm:$0xff] %v2773_v61  ;;  %v2647_v57 = vmul.f32 %v3533_v48, %v2241_v46  ;;  %v3548_v48 = vld [vmem:[%s7131_s0 + $0x380] sm:$0xff] }
 0x291   : > { %v2772_v1 = vadd.f32 %v2644_v41, %v2516_v18 }
 0x292   : > { %v2239_v58 = vpop.permute.xlu0 %2238  ;;  %v2775_v40 = vadd.f32 %v2647_v57, %v2519_v51  ;;  %v7215_v57 = vld [vmem:[#allocation19_spill] sm:$0xff] }
 0x293   : > { %2900 = vst [vmem:[%s5699_s29 + $0x330] sm:$0xff] %v2772_v1  ;;  %v2646_v27 = vmul.f32 %v3534_v7, %v2239_v58  ;;  %v2245_v49 = vpop.permute.xlu1 %2244  ;;  %v3547_v1 = vld [vmem:[%s7131_s0 + $0x388] sm:$0xff]  ;;  %v2526_v58 = vmul.f32 %v3548_v48, %v7215_v57 }
 0x294   : > { %2903 = vst [vmem:[%s5699_s29 + $0x348] sm:$0xff] %v2775_v40  ;;  %v2649_v55 = vmul.f32 %v3537_v34, %v2245_v49  ;;  %v2527_v46 = vmul.f32 %v3547_v1, %v7214_v45  ;;  %v3549_v7 = vld [vmem:[%s7132_s1 + $0x388] sm:$0xff] }
 0x295   : > { %v2774_v21 = vadd.f32 %v2646_v27, %v2518_v29 }
 0x296   : > { %v2243_v11 = vpop.permute.xlu0 %2242  ;;  %v2777_v9 = vadd.f32 %v2649_v55, %v2521_v43  ;;  %v3553_v55 = vld [vmem:[%s7132_s1 + $0x398] sm:$0xff] }
 0x297   : > { %2902 = vst [vmem:[%s5699_s29 + $0x340] sm:$0xff] %v2774_v21  ;;  %v2648_v20 = vmul.f32 %v3538_v53, %v2243_v11  ;;  %v2249_v56 = vpop.permute.xlu1 %2248  ;;  %v3551_v21 = vld [vmem:[%s7131_s0 + $0x398] sm:$0xff] }
 0x298   : > { %2905 = vst [vmem:[%s5699_s29 + $0x358] sm:$0xff] %v2777_v9  ;;  %v2651_v19 = vmul.f32 %v3541_v47, %v2249_v56  ;;  %v2529_v49 = vmul.f32 %v3551_v21, %v6394_v54  ;;  %v3554_v54 = vld [vmem:[%s7132_s1 + $0x390] sm:$0xff]  ;;  %v3571_v21 = vld [vmem:[%s7131_s0 + $0x3e8] sm:$0xff] }
 0x299   : > { %v2776_v32 = vadd.f32 %v2648_v20, %v2520_v14  ;;  %v3552_v14 = vld [vmem:[%s7131_s0 + $0x390] sm:$0xff] }
 0x29a   : > { %v2247_v52 = vpop.permute.xlu0 %2246  ;;  %v2779_v6 = vadd.f32 %v2651_v19, %v2523_v36  ;;  %v2528_v34 = vmul.f32 %v3552_v14, %v6401_v5  ;;  %v2531_v5 = vmul.f32 %v3555_v38, %v6420_v60  ;;  %v3558_v60 = vld [vmem:[%s7132_s1 + $0x3a0] sm:$0xff] }
 0x29b   : > { %2904 = vst [vmem:[%s5699_s29 + $0x350] sm:$0xff] %v2776_v32  ;;  %v2650_v4 = vmul.f32 %v3542_v3, %v2247_v52  ;;  %v2253_v37 = vpop.permute.xlu1 %2252  ;;  %v3556_v32 = vld [vmem:[%s7131_s0 + $0x3a0] sm:$0xff]  ;;  %v3559_v52 = vld [vmem:[%s7131_s0 + $0x3b8] sm:$0xff] }
 0x29c   : > { %2907 = vst [vmem:[%s5699_s29 + $0x368] sm:$0xff] %v2779_v6  ;;  %v2653_v41 = vmul.f32 %v3545_v10, %v2253_v37  ;;  %v2530_v56 = vmul.f32 %v3556_v32, %v6427_v44  ;;  %v2533_v44 = vmul.f32 %v3559_v52, %v6446_v26  ;;  %v3560_v6 = vld [vmem:[%s7131_s0 + $0x3b0] sm:$0xff]  ;;  %v3563_v10 = vld [vmem:[%s7131_s0 + $0x3c8] sm:$0xff]  ;;  %v7216_v14 = vld [vmem:[#allocation20_spill] sm:$0xff] }
 0x29d   : > { %v2778_v18 = vadd.f32 %v2650_v4, %v2522_v8  ;;  %v2532_v16 = vmul.f32 %v3560_v6, %v6453_v50  ;;  %v3562_v26 = vld [vmem:[%s7132_s1 + $0x3b0] sm:$0xff]  ;;  %v2535_v50 = vmul.f32 %v3563_v10, %v6472_v17  ;;  %v3566_v17 = vld [vmem:[%s7132_s1 + $0x3c0] sm:$0xff] }
 0x29e   : > { %v2251_v61 = vpop.permute.xlu0 %2250  ;;  %v2781_v51 = vadd.f32 %v2653_v41, %v2525_v59  ;;  %v3561_v59 = vld [vmem:[%s7132_s1 + $0x3b8] sm:$0xff] }
 0x29f   : > { %2906 = vst [vmem:[%s5699_s29 + $0x360] sm:$0xff] %v2778_v18  ;;  %v2652_v31 = vmul.f32 %v3546_v63, %v2251_v61  ;;  %v2257_v29 = vpop.permute.xlu1 %2256  ;;  %v3564_v63 = vld [vmem:[%s7131_s0 + $0x3c0] sm:$0xff] }
 0x2a0   : > { %2909 = vst [vmem:[%s5699_s29 + $0x378] sm:$0xff] %v2781_v51  ;;  %v2655_v27 = vmul.f32 %v3549_v7, %v2257_v29  ;;  %v3565_v51 = vld [vmem:[%s7132_s1 + $0x3c8] sm:$0xff]  ;;  %v3567_v29 = vld [vmem:[%s7131_s0 + $0x3d8] sm:$0xff] }
 0x2a1   : > { %v2780_v33 = vadd.f32 %v2652_v31, %v2524_v24  ;;  %v2534_v31 = vmul.f32 %v3564_v63, %v6479_v35  ;;  %v2537_v35 = vmul.f32 %v3567_v29, %v6498_v12  ;;  %v3570_v12 = vld [vmem:[%s7132_s1 + $0x3d0] sm:$0xff] }
 0x2a2   : > { %v2255_v40 = vpop.permute.xlu0 %2254  ;;  %v2783_v43 = vadd.f32 %v2655_v27, %v2527_v46  ;;  %v3569_v27 = vld [vmem:[%s7132_s1 + $0x3d8] sm:$0xff] }
 0x2a3   : > { %2908 = vst [vmem:[%s5699_s29 + $0x370] sm:$0xff] %v2780_v33  ;;  %v2654_v22 = vmul.f32 %v3550_v42, %v2255_v40  ;;  %v2261_v23 = vpop.permute.xlu1 %2260 }
 0x2a4   : > { %2911 = vst [vmem:[%s5699_s29 + $0x388] sm:$0xff] %v2783_v43  ;;  %v2657_v11 = vmul.f32 %v3553_v55, %v2261_v23  ;;  %v3572_v23 = vld [vmem:[%s7131_s0 + $0x3e0] sm:$0xff]  ;;  %v3573_v55 = vld [vmem:[%s7132_s1 + $0x3e8] sm:$0xff] }
 0x2a5   : > { %v2782_v13 = vadd.f32 %v2654_v22, %v2526_v58  ;;  %v3568_v58 = vld [vmem:[%s7131_s0 + $0x3d0] sm:$0xff] }
 0x2a6   : > { %v2259_v53 = vpop.permute.xlu0 %2258  ;;  %v2785_v9 = vadd.f32 %v2657_v11, %v2529_v49  ;;  %v2536_v7 = vmul.f32 %v3568_v58, %v6505_v39  ;;  %v2539_v39 = vmul.f32 %v3571_v21, %v6533_v30  ;;  %v3574_v30 = vld [vmem:[%s7132_s1 + $0x3e0] sm:$0xff] }
 0x2a7   : > { %2910 = vst [vmem:[%s5699_s29 + $0x380] sm:$0xff] %v2782_v13  ;;  %v2656_v20 = vmul.f32 %v3554_v54, %v2259_v53  ;;  %v2265_v36 = vpop.permute.xlu1 %2264 }
 0x2a8   : > { %2913 = vst [vmem:[%s5699_s29 + $0x398] sm:$0xff] %v2785_v9  ;;  %v2659_v28 = vmul.f32 %v3557_v25, %v2265_v36  ;;  %v3575_v9 = vld [vmem:[%s7131_s0 + $0x3f8] sm:$0xff]  ;;  %v3576_v36 = vld [vmem:[%s7131_s0 + $0x3f0] sm:$0xff] }
 0x2a9   : > { %v2784_v15 = vadd.f32 %v2656_v20, %v2528_v34  ;;  %v2538_v34 = vmul.f32 %v3572_v23, %v7216_v14  ;;  %v2541_v38 = vmul.f32 %v3575_v9, %v6587_v2  ;;  %v2540_v32 = vmul.f32 %v3576_v36, %v6594_v0  ;;  %v3578_v2 = vld [vmem:[%s7132_s1 + $0x3f0] sm:$0xff] }
 0x2aa   : > { %v2263_v8 = vpop.permute.xlu0 %2262  ;;  %v2787_v19 = vadd.f32 %v2659_v28, %v2531_v5 }
 0x2ab   : > { %2912 = vst [vmem:[%s5699_s29 + $0x390] sm:$0xff] %v2784_v15  ;;  %v2658_v47 = vmul.f32 %v3558_v60, %v2263_v8  ;;  %v2269_v4 = vpop.permute.xlu1 %2268 }
 0x2ac   : > { %2915 = vst [vmem:[%s5699_s29 + $0x3a8] sm:$0xff] %v2787_v19  ;;  %v2661_v18 = vmul.f32 %v3561_v59, %v2269_v4 }
 0x2ad   : > { %v2786_v3 = vadd.f32 %v2658_v47, %v2530_v56  ;;  %v3577_v56 = vld [vmem:[%s7132_s1 + $0x3f8] sm:$0xff] }
 0x2ae   : > { %v2267_v37 = vpop.permute.xlu0 %2266  ;;  %v2789_v24 = vadd.f32 %v2661_v18, %v2533_v44 }
 0x2af   : > { %2914 = vst [vmem:[%s5699_s29 + $0x3a0] sm:$0xff] %v2786_v3  ;;  %v2660_v62 = vmul.f32 %v3562_v26, %v2267_v37  ;;  %v2273_v61 = vpop.permute.xlu1 %2272 }
 0x2b0   : > { %2917 = vst [vmem:[%s5699_s29 + $0x3b8] sm:$0xff] %v2789_v24  ;;  %v2663_v1 = vmul.f32 %v3565_v51, %v2273_v61 }
 0x2b1   : > { %v2788_v41 = vadd.f32 %v2660_v62, %v2532_v16 }
 0x2b2   : > { %v2271_v45 = vpop.permute.xlu0 %2270  ;;  %v2791_v33 = vadd.f32 %v2663_v1, %v2535_v50 }
 0x2b3   : > { %2916 = vst [vmem:[%s5699_s29 + $0x3b0] sm:$0xff] %v2788_v41  ;;  %v2662_v46 = vmul.f32 %v3566_v17, %v2271_v45  ;;  %v2277_v57 = vpop.permute.xlu1 %2276 }
 0x2b4   : > { %2919 = vst [vmem:[%s5699_s29 + $0x3c8] sm:$0xff] %v2791_v33  ;;  %v2665_v40 = vmul.f32 %v3569_v27, %v2277_v57 }
 0x2b5   : > { %v2790_v48 = vadd.f32 %v2662_v46, %v2534_v31 }
 0x2b6   : > { %v2275_v42 = vpop.permute.xlu0 %2274  ;;  %v2793_v43 = vadd.f32 %v2665_v40, %v2537_v35 }
 0x2b7   : > { %2918 = vst [vmem:[%s5699_s29 + $0x3c0] sm:$0xff] %v2790_v48  ;;  %v2664_v22 = vmul.f32 %v3570_v12, %v2275_v42 }
 0x2b8   : > { %2921 = vst [vmem:[%s5699_s29 + $0x3d8] sm:$0xff] %v2793_v43 }
 0x2b9   : > { %v2792_v49 = vadd.f32 %v2664_v22, %v2536_v7  ;;  %v2281_v13 = vpop.permute.xlu1 %2280 }
 0x2ba   : > { %v2667_v11 = vmul.f32 %v3573_v55, %v2281_v13  ;;  %v2279_v53 = vpop.permute.xlu0 %2278 }
 0x2bb   : > { %2920 = vst [vmem:[%s5699_s29 + $0x3d0] sm:$0xff] %v2792_v49  ;;  %v2666_v54 = vmul.f32 %v3574_v30, %v2279_v53 }
 0x2bc   : > { %v2795_v20 = vadd.f32 %v2667_v11, %v2539_v39 }
 0x2bd   : > { %v2794_v5 = vadd.f32 %v2666_v54, %v2538_v34  ;;  %v2285_v15 = vpop.permute.xlu1 %2284 }
 0x2be   : > { %2923 = vst [vmem:[%s5699_s29 + $0x3e8] sm:$0xff] %v2795_v20  ;;  %v2669_v25 = vmul.f32 %v3577_v56, %v2285_v15  ;;  %v2283_v28 = vpop.permute.xlu0 %2282 }
 0x2bf   : > { %2922 = vst [vmem:[%s5699_s29 + $0x3e0] sm:$0xff] %v2794_v5  ;;  %v2668_v8 = vmul.f32 %v3578_v2, %v2283_v28 }
 0x2c0   : > { %v2797_v60 = vadd.f32 %v2669_v25, %v2541_v38 }
 0x2c1   : > { %v2796_v47 = vadd.f32 %v2668_v8, %v2540_v32 }
 0x2c2   : > { %2925 = vst [vmem:[%s5699_s29 + $0x3f8] sm:$0xff] %v2797_v60 }
 0x2c3   : > { %2924 = vst [vmem:[%s5699_s29 + $0x3f0] sm:$0xff] %v2796_v47 }
 0x2c4   : > { %3674 = shalt.err (!%p3671_p13)
}
 0x2c5   : > { %s3675_s29 = scalar_lea.hbm %s7078_s16, 16384  ;;  %s3679_s17 = scalar_lea.hbm %s7136_s5, 32768 }
 0x2c6   : > { %p3676_p3 = scmp.ne.s32.totalorder %s7078_s16, %s3675_s29  ;;  %p3680_p2 = scmp.lt.s32.totalorder %s7078_s16, %s7136_s5 }
 0x2c7   : > { %p3681_p5 = scmp.lt.s32.totalorder %s3679_s17, %s3675_s29 }
 0x2c8   : > { %p3677_p8 = pnand %p3676_p3, %p3841_p9 }
 0x2c9   : > { %p3682_p6 = por %p3681_p5, %p3680_p2 }
 0x2ca   : > { %p3678_p0 = pneg %p3677_p8 }
 0x2cc   : > { %p3683_p4 = pnand %p3682_p6, %p3678_p0 }
 0x2ce   : > { %3686 = shalt.err (!%p3683_p4)
}
 0x2cf   : > { %3177 = dma.vmem_to_hbm [thread:$0]  (%p3841_p9), %s7080_s7, 16384, %s7078_s16, %s2932_s30, %s3757_s24, %s3757_s24, %s3758_s2  }
 0x2d0 PF: > { %s2980_s27 = sand.u32 1, %s3729_s18   ;;  %p3188_p7 = pnand %p3148_p12, %p3848_p11 }
 0x2d1   : > { %s2981_s25 = scalar_lea.sflag [#allocation4], %s2980_s27 }
 0x2d2   : > { %p3189_p10 = pneg %p3188_p7 }
 0x2d4   : > { %3720 = dma.done.wait (%p3189_p10), %s2981_s25, 16384  }
 0x2d5   : > { %3722 = vsyncadd (%p3189_p10), %s2981_s25, 4294950912  ;;  %s2990_s14 = scalar_lea.sflag [#allocation9], %s2980_s27 }
 0x2d6   : > { %3724 = dma.done.wait (%p3189_p10), %s2990_s14, 16384  }
 0x2d7   : > { %3726 = vsyncadd (%p3189_p10), %s2990_s14, 4294950912  ;;  %s28_s23 = sadd.s32 1, %s3749_s23   ;;  %s7217_s6 = sld [smem:[#allocation15_spill]] }
 0x2d8   : > { %p25_p1 = scmp.ge.s32.totalorder %s28_s23, 4   ;;  %s7218_s24 = sld [smem:[#allocation14_spill]] }
 0x2d9   : > { %s7219_s18 = smov %s3733_s19  ;;  %s7220_s19 = smov %s3737_s20 }
 0x2da   : > { %s7222_s21 = smov %s3745_s22  ;;  %27 = sbr.rel (!%p25_p1) target bundleno = 12 (0xc), region = 117 }
 0x2dd   : > { %s7221_s20 = smov %s7217_s6 }
 0x2de   : > { %s7223_s22 = smov %s7218_s24 }
 0x2df   :  { %2995 = vsyncpa [#allocation3], 1 }
 0x2e0   :  { %2997 = vsyncpa [#allocation3 + $0x1], 1 }
 0x2e1   :  { %2998 = vsyncpa [#allocation6], 1 }
 0x2e2   :  { %3000 = vsyncpa [#allocation6 + $0x1], 1 }
 0x2e3   :  { %3001 = vsyncpa [#allocation4], 1 }
 0x2e4   :  { %3003 = vsyncpa [#allocation4 + $0x1], 1 }
 0x2e5   :  { %3004 = vsyncpa [#allocation9], 1 }
 0x2e6   :  { %3006 = vsyncpa [#allocation9 + $0x1], 1 }

</bundles_post_ra>
